<compile_context>
chip_gen: v7x
topology: tpu7x:2x2x1
jax: 0.10.0
libtpu: 0.0.40
codegen_flags: <defaults>
</compile_context>

<pallas_src>
import functools

import jax
import jax.numpy as jnp
from jax import lax
from jax.experimental import pallas as pl
from jax.experimental.pallas import tpu as pltpu


# ----------------------------------------------------------------------------
# Fused Pallas kernel: conv1+tanh+pool1 -> conv2+tanh+pool2 -> fc1+tanh -> fc2
# ----------------------------------------------------------------------------
def _mnist_fused_kernel(x_ref, m1a_ref, m1b_ref, b1_ref, m2a_ref, m2b_ref, b2_ref,
                        sel_ref, wf1_ref, bf1_ref, wf2_ref, bf2_ref, out_ref):
    """Whole-network forward for one batch tile.

    x_ref    : (TB*16, 64)      space-to-depth input (row = 16*i + h, lane = 4*w + phase)
    m1a/m1b  : (4, 64, 192)     conv1 unfold matrices (output columns ow = w / ow = w+1)
    m2a/m2b  : (4, 192, 128)    conv2 unfold matrices (output columns ow = w / ow = w+1)
    sel      : (4, TB, TB*16-9) 0/1 row-gather matrices for the classifier
    wf1      : (4, 128, 32)     fc1 weight with the NCHW flatten folded in, per pooled row
    wf2      : (32, 10)
    """
    tb = out_ref.shape[0]
    rows = x_ref.shape[0]                        # TB * 16
    x = x_ref[...]

    # ---- Conv1 (8x8, s2, p2, 1->16) + bias + tanh + MaxPool(2,1), fused ----------
    n1 = rows - 3
    xs = x[0:n1, :]
    c1a = jnp.dot(xs, m1a_ref[0], preferred_element_type=jnp.float32)   # conv1 @ col w
    c1b = jnp.dot(xs, m1b_ref[0], preferred_element_type=jnp.float32)   # conv1 @ col w+1
    for a in range(1, 4):
        xs = x[a:a + n1, :]
        c1a = c1a + jnp.dot(xs, m1a_ref[a], preferred_element_type=jnp.float32)
        c1b = c1b + jnp.dot(xs, m1b_ref[a], preferred_element_type=jnp.float32)
    pool_w = jnp.maximum(c1a, c1b)               # max over the pooling-window column
    n2 = n1 - 1
    # pool over rows; per-channel bias + monotone tanh commute with the max
    h1 = jnp.tanh(jnp.maximum(pool_w[0:n2, :], pool_w[1:n2 + 1, :]) + b1_ref[...])

    # ---- Conv2 (4x4, s2, 16->32) + bias + tanh + MaxPool(2,1), fused -------------
    n3 = n2 - 3
    hs = h1[0:n3, :]
    c2a = jnp.dot(hs, m2a_ref[0], preferred_element_type=jnp.float32)
    c2b = jnp.dot(hs, m2b_ref[0], preferred_element_type=jnp.float32)
    for kh in range(1, 4):
        hs = h1[kh:kh + n3, :]
        c2a = c2a + jnp.dot(hs, m2a_ref[kh], preferred_element_type=jnp.float32)
        c2b = c2b + jnp.dot(hs, m2b_ref[kh], preferred_element_type=jnp.float32)
    pool2_w = jnp.maximum(c2a, c2b)
    n4 = n3 - 2                                  # valid conv2 rows are spaced 2 apart
    h2 = jnp.tanh(jnp.maximum(pool2_w[0:n4, :], pool2_w[2:n4 + 2, :]) + b2_ref[...])

    # ---- Classifier: NCHW flatten folded into wf1; Linear(512,32) + tanh ---------
    acc = jnp.zeros((tb, 32), jnp.float32)
    for r in range(4):
        gathered = jnp.dot(sel_ref[r], h2, preferred_element_type=jnp.float32)   # (TB,128)
        acc = acc + jnp.dot(gathered, wf1_ref[r], preferred_element_type=jnp.float32)
    h3 = jnp.tanh(acc + bf1_ref[...])

    # ---- Linear(32,10) -----------------------------------------------------------
    logits = jnp.dot(h3, wf2_ref[...], preferred_element_type=jnp.float32) + bf2_ref[...]
    out_ref[...] = logits.astype(out_ref.dtype)


# ----------------------------------------------------------------------------
# One-time weight preprocessing (plain JAX, outside the kernel)
# ----------------------------------------------------------------------------
def _build_fused_operands(params, tile_b):
    f32 = jnp.float32

    # Conv1: absorb the stride-2 into 4 "phase" channels (space-to-depth), then build
    # block-Toeplitz unfold matrices  M1[a][4*w' + p, 16*ow + n] = W1p[a, w'-ow, p, n].
    w1 = params["w1"].astype(f32)                                  # (16, 1, 8, 8) OIHW
    w1p = jnp.transpose(w1[:, 0].reshape(16, 4, 2, 4, 2),          # (n, a, dh, b, dw)
                        (1, 3, 2, 4, 0)).reshape(4, 4, 4, 16)      # (a, b, p=2dh+dw, n)
    wp = jnp.arange(16)[:, None]
    ow = jnp.arange(13)[None, :]
    off = wp - ow                                                  # kernel column b
    blk = jnp.where(((off >= 0) & (off <= 3))[None, :, :, None, None],
                    w1p[:, jnp.clip(off, 0, 3)], 0.0)              # (a, w', ow, p, n)
    m1 = jnp.transpose(blk, (0, 1, 3, 2, 4)).reshape(4, 64, 13 * 16)
    m1a, m1b = m1[:, :, :192], m1[:, :, 16:]                       # pool columns w and w+1
    b1t = jnp.tile(params["b1"].astype(f32), 12)[None, :]          # (1, 192)

    # Conv2 unfold matrices:  M2[kh][16*w' + c, 32*ow + n] = W2[n, c, kh, w' - 2*ow].
    w2r = jnp.transpose(params["w2"].astype(f32), (2, 3, 1, 0))    # (kh, kw, c, n)
    wp2 = jnp.arange(12)[:, None]
    ow2 = jnp.arange(5)[None, :]
    off2 = wp2 - 2 * ow2                                           # kernel column kw
    blk2 = jnp.where(((off2 >= 0) & (off2 <= 3))[None, :, :, None, None],
                     w2r[:, jnp.clip(off2, 0, 3)], 0.0)            # (kh, w', ow, c, n)
    m2 = jnp.transpose(blk2, (0, 1, 3, 2, 4)).reshape(4, 192, 5 * 32)
    m2a, m2b = m2[:, :, :128], m2[:, :, 32:]
    b2t = jnp.tile(params["b2"].astype(f32), 4)[None, :]           # (1, 128)

    # fc1: fold the PyTorch NCHW flatten (index = c*16 + r*4 + w) into the weight and
    # split it per pooled spatial row r; kernel activations have lane index 32*w + c.
    wf1 = jnp.transpose(params["fc1_w"].astype(f32).reshape(32, 4, 4, 32),
                        (1, 2, 0, 3)).reshape(4, 128, 32)          # (r, 32*w + c, n)
    bf1 = params["fc1_b"].astype(f32)[None, :]                     # (1, 32)
    wf2 = params["fc2_w"].astype(f32)                              # (32, 10)
    bf2 = params["fc2_b"].astype(f32)[None, :]                     # (1, 10)

    # 0/1 gather matrices: pooled row r of image i lives at stacked row 16*i + 2*r.
    n_rows = tile_b * 16 - 9
    sel = jnp.zeros((4, tile_b, n_rows), f32)
    idx = jnp.arange(tile_b)
    for r in range(4):
        sel = sel.at[r, idx, 16 * idx + 2 * r].set(1.0)

    return (m1a, m1b, b1t, m2a, m2b, b2t, sel, wf1, bf1, wf2, bf2)


# ----------------------------------------------------------------------------
# Forward pass (Pallas version)
# ----------------------------------------------------------------------------
@functools.partial(jax.jit, static_argnames=("tile_b",))
def mnist_cnn_forward(x_nchw, params, tile_b=8):
    assert tile_b % 8 == 0, "tile_b must be a multiple of 8 (sublane tiling)"
    b = x_nchw.shape[0]
    bp = ((b + tile_b - 1) // tile_b) * tile_b

    # NCHW -> pad(p=2) -> space-to-depth so conv1 becomes stride-1 over 4 phase channels.
    # Layout: row = 16*image + h, lane = 4*w + (2*dh + dw).
    x = jnp.pad(x_nchw[:, 0], ((0, bp - b), (2, 2), (2, 2)))               # (bp, 32, 32)
    x = jnp.transpose(x.reshape(bp, 16, 2, 16, 2), (0, 1, 3, 2, 4))        # (bp,16,16,2,2)
    x = x.reshape(bp * 16, 64).astype(jnp.float32)

    ops = _build_fused_operands(params, tile_b)
    rows = tile_b * 16
    n_sel = rows - 9

    weight_specs = [
        pl.BlockSpec((4, 64, 192), lambda i: (0, 0, 0)),        # m1a
        pl.BlockSpec((4, 64, 192), lambda i: (0, 0, 0)),        # m1b
        pl.BlockSpec((1, 192), lambda i: (0, 0)),               # b1 (tiled)
        pl.BlockSpec((4, 192, 128), lambda i: (0, 0, 0)),       # m2a
        pl.BlockSpec((4, 192, 128), lambda i: (0, 0, 0)),       # m2b
        pl.BlockSpec((1, 128), lambda i: (0, 0)),               # b2 (tiled)
        pl.BlockSpec((4, tile_b, n_sel), lambda i: (0, 0, 0)),  # sel
        pl.BlockSpec((4, 128, 32), lambda i: (0, 0, 0)),        # fc1 weight
        pl.BlockSpec((1, 32), lambda i: (0, 0)),                # fc1 bias
        pl.BlockSpec((32, 10), lambda i: (0, 0)),               # fc2 weight
        pl.BlockSpec((1, 10), lambda i: (0, 0)),                # fc2 bias
    ]

    out = pl.pallas_call(
        _mnist_fused_kernel,
        out_shape=jax.ShapeDtypeStruct((bp, 10), jnp.float32),
        grid_spec=pltpu.PrefetchScalarGridSpec(
            num_scalar_prefetch=0,
            grid=(bp // tile_b,),
            in_specs=[pl.BlockSpec((rows, 64), lambda i: (i, 0))] + weight_specs,
            out_specs=pl.BlockSpec((tile_b, 10), lambda i: (i, 0)),
        ),
        compiler_params=pltpu.CompilerParams(
            dimension_semantics=("parallel",),          # lets v7x's 2 TCs split the batch grid
            vmem_limit_bytes=32 * 1024 * 1024,
        ),
    )(x, *ops)
    return out[:b]


# ----------------------------------------------------------------------------
# Pure-JAX reference (XLA convs, default precision) for correctness checking
# ----------------------------------------------------------------------------
def reference_forward(x, params):
    dn1 = lax.conv_dimension_numbers(x.shape, params["w1"].shape, ("NCHW", "OIHW", "NCHW"))
    h = lax.conv_general_dilated(x, params["w1"], (2, 2), [(2, 2), (2, 2)],
                                 dimension_numbers=dn1)
    h = jnp.tanh(h + params["b1"][None, :, None, None])
    h = lax.reduce_window(h, -jnp.inf, lax.max, (1, 1, 2, 2), (1, 1, 1, 1), "VALID")

    dn2 = lax.conv_dimension_numbers(h.shape, params["w2"].shape, ("NCHW", "OIHW", "NCHW"))
    h = lax.conv_general_dilated(h, params["w2"], (2, 2), [(0, 0), (0, 0)],
                                 dimension_numbers=dn2)
    h = jnp.tanh(h + params["b2"][None, :, None, None])
    h = lax.reduce_window(h, -jnp.inf, lax.max, (1, 1, 2, 2), (1, 1, 1, 1), "VALID")

    flat = h.reshape(h.shape[0], -1)
    h = jnp.tanh(flat @ params["fc1_w"] + params["fc1_b"])
    return h @ params["fc2_w"] + params["fc2_b"]


# ----------------------------------------------------------------------------
# Deterministic parameter init (PyTorch-like uniform(-1/sqrt(fan_in), +))
# ----------------------------------------------------------------------------
def init_params(key):
    ks = jax.random.split(key, 8)

    def u(k, shape, fan_in):
        bound = 1.0 / jnp.sqrt(float(fan_in))
        return jax.random.uniform(k, shape, jnp.float32, -bound, bound)

    return {
        "w1": u(ks[0], (16, 1, 8, 8), 1 * 8 * 8),      # OIHW
        "b1": u(ks[1], (16,), 1 * 8 * 8),
        "w2": u(ks[2], (32, 16, 4, 4), 16 * 4 * 4),    # OIHW
        "b2": u(ks[3], (32,), 16 * 4 * 4),
        "fc1_w": u(ks[4], (512, 32), 512),             # (in, out)
        "fc1_b": u(ks[5], (32,), 512),
        "fc2_w": u(ks[6], (32, 10), 32),
        "fc2_b": u(ks[7], (10,), 32),
    }


if __name__ == "__main__":
    key = jax.random.PRNGKey(0)
    k_x, k_p = jax.random.split(key)

    # MNIST-shaped input (in_channels=1 branch requires 28x28 for the 512-d classifier)
    x = jax.random.normal(k_x, (2, 1, 28, 28), jnp.float32)
    params = init_params(k_p)

    out = jax.block_until_ready(mnist_cnn_forward(x, params, tile_b=8))
    assert out.shape == (2, 10), out.shape

    ref = jax.block_until_ready(reference_forward(x, params))
    # Kernel runs at default (bf16 MXU) precision -> loosened tolerance vs the XLA reference.
    assert jnp.allclose(out, ref, atol=3e-2, rtol=3e-2), float(jnp.max(jnp.abs(out - ref)))

    print("KERNEL_OK")
</pallas_src>

<mosaic_0001>
module attributes {stable_mosaic.version = 11 : i64} {
  func.func @_mnist_fused_kernel(%arg0: i32, %arg1: memref<128x64xf32, #tpu.memory_space<vmem>>, %arg2: memref<4x64x192xf32, #tpu.memory_space<vmem>>, %arg3: memref<4x64x192xf32, #tpu.memory_space<vmem>>, %arg4: memref<1x192xf32, #tpu.memory_space<vmem>>, %arg5: memref<4x192x128xf32, #tpu.memory_space<vmem>>, %arg6: memref<4x192x128xf32, #tpu.memory_space<vmem>>, %arg7: memref<1x128xf32, #tpu.memory_space<vmem>>, %arg8: memref<4x8x119xf32, #tpu.memory_space<vmem>>, %arg9: memref<4x128x32xf32, #tpu.memory_space<vmem>>, %arg10: memref<1x32xf32, #tpu.memory_space<vmem>>, %arg11: memref<32x10xf32, #tpu.memory_space<vmem>>, %arg12: memref<1x10xf32, #tpu.memory_space<vmem>>, %arg13: memref<8x10xf32, #tpu.memory_space<vmem>>) attributes {dimension_semantics = [#tpu.dimension_semantics<parallel>], iteration_bounds = array<i64: 1>, scalar_prefetch = 0 : i64, scratch_operands = 0 : i64, tpu.core_type = #tpu.core_type<tc>, window_params = [{transform_indices = @transform_0, window_bounds = array<i64: 128, 64>}, {pipeline_mode = #tpu.pipeline_mode<synchronous>, transform_indices = @transform_1, window_bounds = array<i64: 4, 64, 192>}, {pipeline_mode = #tpu.pipeline_mode<synchronous>, transform_indices = @transform_2, window_bounds = array<i64: 4, 64, 192>}, {pipeline_mode = #tpu.pipeline_mode<synchronous>, transform_indices = @transform_3, window_bounds = array<i64: 1, 192>}, {pipeline_mode = #tpu.pipeline_mode<synchronous>, transform_indices = @transform_4, window_bounds = array<i64: 4, 192, 128>}, {pipeline_mode = #tpu.pipeline_mode<synchronous>, transform_indices = @transform_5, window_bounds = array<i64: 4, 192, 128>}, {pipeline_mode = #tpu.pipeline_mode<synchronous>, transform_indices = @transform_6, window_bounds = array<i64: 1, 128>}, {pipeline_mode = #tpu.pipeline_mode<synchronous>, transform_indices = @transform_7, window_bounds = array<i64: 4, 8, 119>}, {pipeline_mode = #tpu.pipeline_mode<synchronous>, transform_indices = @transform_8, window_bounds = array<i64: 4, 128, 32>}, {pipeline_mode = #tpu.pipeline_mode<synchronous>, transform_indices = @transform_9, window_bounds = array<i64: 1, 32>}, {pipeline_mode = #tpu.pipeline_mode<synchronous>, transform_indices = @transform_10, window_bounds = array<i64: 32, 10>}, {pipeline_mode = #tpu.pipeline_mode<synchronous>, transform_indices = @transform_11, window_bounds = array<i64: 1, 10>}, {transform_indices = @transform_12, window_bounds = array<i64: 8, 10>}]} {
    %c0 = arith.constant 0 : index
    %c0_0 = arith.constant 0 : index
    %0 = vector.load %arg1[%c0, %c0_0] : memref<128x64xf32, #tpu.memory_space<vmem>>, vector<128x64xf32>
    %1 = vector.extract_strided_slice %0 {offsets = [0, 0], sizes = [125, 64], strides = [1, 1]} : vector<128x64xf32> to vector<125x64xf32>
    %c0_1 = arith.constant 0 : index
    %c0_2 = arith.constant 0 : index
    %c0_3 = arith.constant 0 : index
    %2 = vector.load %arg2[%c0_1, %c0_2, %c0_3] : memref<4x64x192xf32, #tpu.memory_space<vmem>>, vector<1x64x192xf32>
    %3 = vector.shape_cast %2 : vector<1x64x192xf32> to vector<64x192xf32>
    %cst = arith.constant dense<0.000000e+00> : vector<125x192xf32>
    %4 = tpu.matmul %1, %3, %cst {dimension_numbers = #tpu.dot_dimension_numbers<[1], [0], [0], [1], [0, 0, 1, 1], [], []>} : vector<125x64xf32>, vector<64x192xf32>, vector<125x192xf32> -> vector<125x192xf32>
    %c0_4 = arith.constant 0 : index
    %c0_5 = arith.constant 0 : index
    %c0_6 = arith.constant 0 : index
    %5 = vector.load %arg3[%c0_4, %c0_5, %c0_6] : memref<4x64x192xf32, #tpu.memory_space<vmem>>, vector<1x64x192xf32>
    %6 = vector.shape_cast %5 : vector<1x64x192xf32> to vector<64x192xf32>
    %cst_7 = arith.constant dense<0.000000e+00> : vector<125x192xf32>
    %7 = tpu.matmul %1, %6, %cst_7 {dimension_numbers = #tpu.dot_dimension_numbers<[1], [0], [0], [1], [0, 0, 1, 1], [], []>} : vector<125x64xf32>, vector<64x192xf32>, vector<125x192xf32> -> vector<125x192xf32>
    %8 = vector.extract_strided_slice %0 {offsets = [1, 0], sizes = [125, 64], strides = [1, 1]} : vector<128x64xf32> to vector<125x64xf32>
    %c1 = arith.constant 1 : index
    %c0_8 = arith.constant 0 : index
    %c0_9 = arith.constant 0 : index
    %9 = vector.load %arg2[%c1, %c0_8, %c0_9] : memref<4x64x192xf32, #tpu.memory_space<vmem>>, vector<1x64x192xf32>
    %10 = vector.shape_cast %9 : vector<1x64x192xf32> to vector<64x192xf32>
    %cst_10 = arith.constant dense<0.000000e+00> : vector<125x192xf32>
    %11 = tpu.matmul %8, %10, %cst_10 {dimension_numbers = #tpu.dot_dimension_numbers<[1], [0], [0], [1], [0, 0, 1, 1], [], []>} : vector<125x64xf32>, vector<64x192xf32>, vector<125x192xf32> -> vector<125x192xf32>
    %12 = arith.addf %4, %11 : vector<125x192xf32>
    %c1_11 = arith.constant 1 : index
    %c0_12 = arith.constant 0 : index
    %c0_13 = arith.constant 0 : index
    %13 = vector.load %arg3[%c1_11, %c0_12, %c0_13] : memref<4x64x192xf32, #tpu.memory_space<vmem>>, vector<1x64x192xf32>
    %14 = vector.shape_cast %13 : vector<1x64x192xf32> to vector<64x192xf32>
    %cst_14 = arith.constant dense<0.000000e+00> : vector<125x192xf32>
    %15 = tpu.matmul %8, %14, %cst_14 {dimension_numbers = #tpu.dot_dimension_numbers<[1], [0], [0], [1], [0, 0, 1, 1], [], []>} : vector<125x64xf32>, vector<64x192xf32>, vector<125x192xf32> -> vector<125x192xf32>
    %16 = arith.addf %7, %15 : vector<125x192xf32>
    %17 = vector.extract_strided_slice %0 {offsets = [2, 0], sizes = [125, 64], strides = [1, 1]} : vector<128x64xf32> to vector<125x64xf32>
    %c2 = arith.constant 2 : index
    %c0_15 = arith.constant 0 : index
    %c0_16 = arith.constant 0 : index
    %18 = vector.load %arg2[%c2, %c0_15, %c0_16] : memref<4x64x192xf32, #tpu.memory_space<vmem>>, vector<1x64x192xf32>
    %19 = vector.shape_cast %18 : vector<1x64x192xf32> to vector<64x192xf32>
    %cst_17 = arith.constant dense<0.000000e+00> : vector<125x192xf32>
    %20 = tpu.matmul %17, %19, %cst_17 {dimension_numbers = #tpu.dot_dimension_numbers<[1], [0], [0], [1], [0, 0, 1, 1], [], []>} : vector<125x64xf32>, vector<64x192xf32>, vector<125x192xf32> -> vector<125x192xf32>
    %21 = arith.addf %12, %20 : vector<125x192xf32>
    %c2_18 = arith.constant 2 : index
    %c0_19 = arith.constant 0 : index
    %c0_20 = arith.constant 0 : index
    %22 = vector.load %arg3[%c2_18, %c0_19, %c0_20] : memref<4x64x192xf32, #tpu.memory_space<vmem>>, vector<1x64x192xf32>
    %23 = vector.shape_cast %22 : vector<1x64x192xf32> to vector<64x192xf32>
    %cst_21 = arith.constant dense<0.000000e+00> : vector<125x192xf32>
    %24 = tpu.matmul %17, %23, %cst_21 {dimension_numbers = #tpu.dot_dimension_numbers<[1], [0], [0], [1], [0, 0, 1, 1], [], []>} : vector<125x64xf32>, vector<64x192xf32>, vector<125x192xf32> -> vector<125x192xf32>
    %25 = arith.addf %16, %24 : vector<125x192xf32>
    %26 = vector.extract_strided_slice %0 {offsets = [3, 0], sizes = [125, 64], strides = [1, 1]} : vector<128x64xf32> to vector<125x64xf32>
    %c3 = arith.constant 3 : index
    %c0_22 = arith.constant 0 : index
    %c0_23 = arith.constant 0 : index
    %27 = vector.load %arg2[%c3, %c0_22, %c0_23] : memref<4x64x192xf32, #tpu.memory_space<vmem>>, vector<1x64x192xf32>
    %28 = vector.shape_cast %27 : vector<1x64x192xf32> to vector<64x192xf32>
    %cst_24 = arith.constant dense<0.000000e+00> : vector<125x192xf32>
    %29 = tpu.matmul %26, %28, %cst_24 {dimension_numbers = #tpu.dot_dimension_numbers<[1], [0], [0], [1], [0, 0, 1, 1], [], []>} : vector<125x64xf32>, vector<64x192xf32>, vector<125x192xf32> -> vector<125x192xf32>
    %30 = arith.addf %21, %29 : vector<125x192xf32>
    %c3_25 = arith.constant 3 : index
    %c0_26 = arith.constant 0 : index
    %c0_27 = arith.constant 0 : index
    %31 = vector.load %arg3[%c3_25, %c0_26, %c0_27] : memref<4x64x192xf32, #tpu.memory_space<vmem>>, vector<1x64x192xf32>
    %32 = vector.shape_cast %31 : vector<1x64x192xf32> to vector<64x192xf32>
    %cst_28 = arith.constant dense<0.000000e+00> : vector<125x192xf32>
    %33 = tpu.matmul %26, %32, %cst_28 {dimension_numbers = #tpu.dot_dimension_numbers<[1], [0], [0], [1], [0, 0, 1, 1], [], []>} : vector<125x64xf32>, vector<64x192xf32>, vector<125x192xf32> -> vector<125x192xf32>
    %34 = arith.addf %25, %33 : vector<125x192xf32>
    %35 = arith.maximumf %30, %34 : vector<125x192xf32>
    %36 = vector.extract_strided_slice %35 {offsets = [0, 0], sizes = [124, 192], strides = [1, 1]} : vector<125x192xf32> to vector<124x192xf32>
    %37 = vector.extract_strided_slice %35 {offsets = [1, 0], sizes = [124, 192], strides = [1, 1]} : vector<125x192xf32> to vector<124x192xf32>
    %38 = arith.maximumf %36, %37 : vector<124x192xf32>
    %c0_29 = arith.constant 0 : index
    %c0_30 = arith.constant 0 : index
    %39 = vector.load %arg4[%c0_29, %c0_30] : memref<1x192xf32, #tpu.memory_space<vmem>>, vector<1x192xf32>
    %40 = vector.broadcast %39 : vector<1x192xf32> to vector<124x192xf32>
    %41 = arith.addf %38, %40 : vector<124x192xf32>
    %42 = math.tanh %41 : vector<124x192xf32>
    %43 = vector.extract_strided_slice %42 {offsets = [0, 0], sizes = [121, 192], strides = [1, 1]} : vector<124x192xf32> to vector<121x192xf32>
    %c0_31 = arith.constant 0 : index
    %c0_32 = arith.constant 0 : index
    %c0_33 = arith.constant 0 : index
    %44 = vector.load %arg5[%c0_31, %c0_32, %c0_33] : memref<4x192x128xf32, #tpu.memory_space<vmem>>, vector<1x192x128xf32>
    %45 = vector.shape_cast %44 : vector<1x192x128xf32> to vector<192x128xf32>
    %cst_34 = arith.constant dense<0.000000e+00> : vector<121x128xf32>
    %46 = tpu.matmul %43, %45, %cst_34 {dimension_numbers = #tpu.dot_dimension_numbers<[1], [0], [0], [1], [0, 0, 1, 1], [], []>} : vector<121x192xf32>, vector<192x128xf32>, vector<121x128xf32> -> vector<121x128xf32>
    %c0_35 = arith.constant 0 : index
    %c0_36 = arith.constant 0 : index
    %c0_37 = arith.constant 0 : index
    %47 = vector.load %arg6[%c0_35, %c0_36, %c0_37] : memref<4x192x128xf32, #tpu.memory_space<vmem>>, vector<1x192x128xf32>
    %48 = vector.shape_cast %47 : vector<1x192x128xf32> to vector<192x128xf32>
    %cst_38 = arith.constant dense<0.000000e+00> : vector<121x128xf32>
    %49 = tpu.matmul %43, %48, %cst_38 {dimension_numbers = #tpu.dot_dimension_numbers<[1], [0], [0], [1], [0, 0, 1, 1], [], []>} : vector<121x192xf32>, vector<192x128xf32>, vector<121x128xf32> -> vector<121x128xf32>
    %50 = vector.extract_strided_slice %42 {offsets = [1, 0], sizes = [121, 192], strides = [1, 1]} : vector<124x192xf32> to vector<121x192xf32>
    %c1_39 = arith.constant 1 : index
    %c0_40 = arith.constant 0 : index
    %c0_41 = arith.constant 0 : index
    %51 = vector.load %arg5[%c1_39, %c0_40, %c0_41] : memref<4x192x128xf32, #tpu.memory_space<vmem>>, vector<1x192x128xf32>
    %52 = vector.shape_cast %51 : vector<1x192x128xf32> to vector<192x128xf32>
    %cst_42 = arith.constant dense<0.000000e+00> : vector<121x128xf32>
    %53 = tpu.matmul %50, %52, %cst_42 {dimension_numbers = #tpu.dot_dimension_numbers<[1], [0], [0], [1], [0, 0, 1, 1], [], []>} : vector<121x192xf32>, vector<192x128xf32>, vector<121x128xf32> -> vector<121x128xf32>
    %54 = arith.addf %46, %53 : vector<121x128xf32>
    %c1_43 = arith.constant 1 : index
    %c0_44 = arith.constant 0 : index
    %c0_45 = arith.constant 0 : index
    %55 = vector.load %arg6[%c1_43, %c0_44, %c0_45] : memref<4x192x128xf32, #tpu.memory_space<vmem>>, vector<1x192x128xf32>
    %56 = vector.shape_cast %55 : vector<1x192x128xf32> to vector<192x128xf32>
    %cst_46 = arith.constant dense<0.000000e+00> : vector<121x128xf32>
    %57 = tpu.matmul %50, %56, %cst_46 {dimension_numbers = #tpu.dot_dimension_numbers<[1], [0], [0], [1], [0, 0, 1, 1], [], []>} : vector<121x192xf32>, vector<192x128xf32>, vector<121x128xf32> -> vector<121x128xf32>
    %58 = arith.addf %49, %57 : vector<121x128xf32>
    %59 = vector.extract_strided_slice %42 {offsets = [2, 0], sizes = [121, 192], strides = [1, 1]} : vector<124x192xf32> to vector<121x192xf32>
    %c2_47 = arith.constant 2 : index
    %c0_48 = arith.constant 0 : index
    %c0_49 = arith.constant 0 : index
    %60 = vector.load %arg5[%c2_47, %c0_48, %c0_49] : memref<4x192x128xf32, #tpu.memory_space<vmem>>, vector<1x192x128xf32>
    %61 = vector.shape_cast %60 : vector<1x192x128xf32> to vector<192x128xf32>
    %cst_50 = arith.constant dense<0.000000e+00> : vector<121x128xf32>
    %62 = tpu.matmul %59, %61, %cst_50 {dimension_numbers = #tpu.dot_dimension_numbers<[1], [0], [0], [1], [0, 0, 1, 1], [], []>} : vector<121x192xf32>, vector<192x128xf32>, vector<121x128xf32> -> vector<121x128xf32>
    %63 = arith.addf %54, %62 : vector<121x128xf32>
    %c2_51 = arith.constant 2 : index
    %c0_52 = arith.constant 0 : index
    %c0_53 = arith.constant 0 : index
    %64 = vector.load %arg6[%c2_51, %c0_52, %c0_53] : memref<4x192x128xf32, #tpu.memory_space<vmem>>, vector<1x192x128xf32>
    %65 = vector.shape_cast %64 : vector<1x192x128xf32> to vector<192x128xf32>
    %cst_54 = arith.constant dense<0.000000e+00> : vector<121x128xf32>
    %66 = tpu.matmul %59, %65, %cst_54 {dimension_numbers = #tpu.dot_dimension_numbers<[1], [0], [0], [1], [0, 0, 1, 1], [], []>} : vector<121x192xf32>, vector<192x128xf32>, vector<121x128xf32> -> vector<121x128xf32>
    %67 = arith.addf %58, %66 : vector<121x128xf32>
    %68 = vector.extract_strided_slice %42 {offsets = [3, 0], sizes = [121, 192], strides = [1, 1]} : vector<124x192xf32> to vector<121x192xf32>
    %c3_55 = arith.constant 3 : index
    %c0_56 = arith.constant 0 : index
    %c0_57 = arith.constant 0 : index
    %69 = vector.load %arg5[%c3_55, %c0_56, %c0_57] : memref<4x192x128xf32, #tpu.memory_space<vmem>>, vector<1x192x128xf32>
    %70 = vector.shape_cast %69 : vector<1x192x128xf32> to vector<192x128xf32>
    %cst_58 = arith.constant dense<0.000000e+00> : vector<121x128xf32>
    %71 = tpu.matmul %68, %70, %cst_58 {dimension_numbers = #tpu.dot_dimension_numbers<[1], [0], [0], [1], [0, 0, 1, 1], [], []>} : vector<121x192xf32>, vector<192x128xf32>, vector<121x128xf32> -> vector<121x128xf32>
    %72 = arith.addf %63, %71 : vector<121x128xf32>
    %c3_59 = arith.constant 3 : index
    %c0_60 = arith.constant 0 : index
    %c0_61 = arith.constant 0 : index
    %73 = vector.load %arg6[%c3_59, %c0_60, %c0_61] : memref<4x192x128xf32, #tpu.memory_space<vmem>>, vector<1x192x128xf32>
    %74 = vector.shape_cast %73 : vector<1x192x128xf32> to vector<192x128xf32>
    %cst_62 = arith.constant dense<0.000000e+00> : vector<121x128xf32>
    %75 = tpu.matmul %68, %74, %cst_62 {dimension_numbers = #tpu.dot_dimension_numbers<[1], [0], [0], [1], [0, 0, 1, 1], [], []>} : vector<121x192xf32>, vector<192x128xf32>, vector<121x128xf32> -> vector<121x128xf32>
    %76 = arith.addf %67, %75 : vector<121x128xf32>
    %77 = arith.maximumf %72, %76 : vector<121x128xf32>
    %78 = vector.extract_strided_slice %77 {offsets = [0, 0], sizes = [119, 128], strides = [1, 1]} : vector<121x128xf32> to vector<119x128xf32>
    %79 = vector.extract_strided_slice %77 {offsets = [2, 0], sizes = [119, 128], strides = [1, 1]} : vector<121x128xf32> to vector<119x128xf32>
    %80 = arith.maximumf %78, %79 : vector<119x128xf32>
    %c0_63 = arith.constant 0 : index
    %c0_64 = arith.constant 0 : index
    %81 = vector.load %arg7[%c0_63, %c0_64] : memref<1x128xf32, #tpu.memory_space<vmem>>, vector<1x128xf32>
    %82 = vector.broadcast %81 : vector<1x128xf32> to vector<119x128xf32>
    %83 = arith.addf %80, %82 : vector<119x128xf32>
    %84 = math.tanh %83 : vector<119x128xf32>
    %cst_65 = arith.constant 0.000000e+00 : f32
    %85 = vector.broadcast %cst_65 : f32 to vector<8x32xf32>
    %c0_66 = arith.constant 0 : index
    %c0_67 = arith.constant 0 : index
    %c0_68 = arith.constant 0 : index
    %86 = vector.load %arg8[%c0_66, %c0_67, %c0_68] : memref<4x8x119xf32, #tpu.memory_space<vmem>>, vector<1x8x119xf32>
    %87 = vector.shape_cast %86 : vector<1x8x119xf32> to vector<8x119xf32>
    %cst_69 = arith.constant dense<0.000000e+00> : vector<8x128xf32>
    %88 = tpu.matmul %87, %84, %cst_69 {dimension_numbers = #tpu.dot_dimension_numbers<[1], [0], [0], [1], [0, 0, 1, 1], [], []>} : vector<8x119xf32>, vector<119x128xf32>, vector<8x128xf32> -> vector<8x128xf32>
    %c0_70 = arith.constant 0 : index
    %c0_71 = arith.constant 0 : index
    %c0_72 = arith.constant 0 : index
    %89 = vector.load %arg9[%c0_70, %c0_71, %c0_72] : memref<4x128x32xf32, #tpu.memory_space<vmem>>, vector<1x128x32xf32>
    %90 = vector.shape_cast %89 : vector<1x128x32xf32> to vector<128x32xf32>
    %cst_73 = arith.constant dense<0.000000e+00> : vector<8x32xf32>
    %91 = tpu.matmul %88, %90, %cst_73 {dimension_numbers = #tpu.dot_dimension_numbers<[1], [0], [0], [1], [0, 0, 1, 1], [], []>} : vector<8x128xf32>, vector<128x32xf32>, vector<8x32xf32> -> vector<8x32xf32>
    %92 = arith.addf %85, %91 : vector<8x32xf32>
    %c1_74 = arith.constant 1 : index
    %c0_75 = arith.constant 0 : index
    %c0_76 = arith.constant 0 : index
    %93 = vector.load %arg8[%c1_74, %c0_75, %c0_76] : memref<4x8x119xf32, #tpu.memory_space<vmem>>, vector<1x8x119xf32>
    %94 = vector.shape_cast %93 : vector<1x8x119xf32> to vector<8x119xf32>
    %cst_77 = arith.constant dense<0.000000e+00> : vector<8x128xf32>
    %95 = tpu.matmul %94, %84, %cst_77 {dimension_numbers = #tpu.dot_dimension_numbers<[1], [0], [0], [1], [0, 0, 1, 1], [], []>} : vector<8x119xf32>, vector<119x128xf32>, vector<8x128xf32> -> vector<8x128xf32>
    %c1_78 = arith.constant 1 : index
    %c0_79 = arith.constant 0 : index
    %c0_80 = arith.constant 0 : index
    %96 = vector.load %arg9[%c1_78, %c0_79, %c0_80] : memref<4x128x32xf32, #tpu.memory_space<vmem>>, vector<1x128x32xf32>
    %97 = vector.shape_cast %96 : vector<1x128x32xf32> to vector<128x32xf32>
    %cst_81 = arith.constant dense<0.000000e+00> : vector<8x32xf32>
    %98 = tpu.matmul %95, %97, %cst_81 {dimension_numbers = #tpu.dot_dimension_numbers<[1], [0], [0], [1], [0, 0, 1, 1], [], []>} : vector<8x128xf32>, vector<128x32xf32>, vector<8x32xf32> -> vector<8x32xf32>
    %99 = arith.addf %92, %98 : vector<8x32xf32>
    %c2_82 = arith.constant 2 : index
    %c0_83 = arith.constant 0 : index
    %c0_84 = arith.constant 0 : index
    %100 = vector.load %arg8[%c2_82, %c0_83, %c0_84] : memref<4x8x119xf32, #tpu.memory_space<vmem>>, vector<1x8x119xf32>
    %101 = vector.shape_cast %100 : vector<1x8x119xf32> to vector<8x119xf32>
    %cst_85 = arith.constant dense<0.000000e+00> : vector<8x128xf32>
    %102 = tpu.matmul %101, %84, %cst_85 {dimension_numbers = #tpu.dot_dimension_numbers<[1], [0], [0], [1], [0, 0, 1, 1], [], []>} : vector<8x119xf32>, vector<119x128xf32>, vector<8x128xf32> -> vector<8x128xf32>
    %c2_86 = arith.constant 2 : index
    %c0_87 = arith.constant 0 : index
    %c0_88 = arith.constant 0 : index
    %103 = vector.load %arg9[%c2_86, %c0_87, %c0_88] : memref<4x128x32xf32, #tpu.memory_space<vmem>>, vector<1x128x32xf32>
    %104 = vector.shape_cast %103 : vector<1x128x32xf32> to vector<128x32xf32>
    %cst_89 = arith.constant dense<0.000000e+00> : vector<8x32xf32>
    %105 = tpu.matmul %102, %104, %cst_89 {dimension_numbers = #tpu.dot_dimension_numbers<[1], [0], [0], [1], [0, 0, 1, 1], [], []>} : vector<8x128xf32>, vector<128x32xf32>, vector<8x32xf32> -> vector<8x32xf32>
    %106 = arith.addf %99, %105 : vector<8x32xf32>
    %c3_90 = arith.constant 3 : index
    %c0_91 = arith.constant 0 : index
    %c0_92 = arith.constant 0 : index
    %107 = vector.load %arg8[%c3_90, %c0_91, %c0_92] : memref<4x8x119xf32, #tpu.memory_space<vmem>>, vector<1x8x119xf32>
    %108 = vector.shape_cast %107 : vector<1x8x119xf32> to vector<8x119xf32>
    %cst_93 = arith.constant dense<0.000000e+00> : vector<8x128xf32>
    %109 = tpu.matmul %108, %84, %cst_93 {dimension_numbers = #tpu.dot_dimension_numbers<[1], [0], [0], [1], [0, 0, 1, 1], [], []>} : vector<8x119xf32>, vector<119x128xf32>, vector<8x128xf32> -> vector<8x128xf32>
    %c3_94 = arith.constant 3 : index
    %c0_95 = arith.constant 0 : index
    %c0_96 = arith.constant 0 : index
    %110 = vector.load %arg9[%c3_94, %c0_95, %c0_96] : memref<4x128x32xf32, #tpu.memory_space<vmem>>, vector<1x128x32xf32>
    %111 = vector.shape_cast %110 : vector<1x128x32xf32> to vector<128x32xf32>
    %cst_97 = arith.constant dense<0.000000e+00> : vector<8x32xf32>
    %112 = tpu.matmul %109, %111, %cst_97 {dimension_numbers = #tpu.dot_dimension_numbers<[1], [0], [0], [1], [0, 0, 1, 1], [], []>} : vector<8x128xf32>, vector<128x32xf32>, vector<8x32xf32> -> vector<8x32xf32>
    %113 = arith.addf %106, %112 : vector<8x32xf32>
    %c0_98 = arith.constant 0 : index
    %c0_99 = arith.constant 0 : index
    %114 = vector.load %arg10[%c0_98, %c0_99] : memref<1x32xf32, #tpu.memory_space<vmem>>, vector<1x32xf32>
    %115 = vector.broadcast %114 : vector<1x32xf32> to vector<8x32xf32>
    %116 = arith.addf %113, %115 : vector<8x32xf32>
    %117 = math.tanh %116 : vector<8x32xf32>
    %c0_100 = arith.constant 0 : index
    %c0_101 = arith.constant 0 : index
    %118 = vector.load %arg11[%c0_100, %c0_101] : memref<32x10xf32, #tpu.memory_space<vmem>>, vector<32x10xf32>
    %cst_102 = arith.constant dense<0.000000e+00> : vector<8x10xf32>
    %119 = tpu.matmul %117, %118, %cst_102 {dimension_numbers = #tpu.dot_dimension_numbers<[1], [0], [0], [1], [0, 0, 1, 1], [], []>} : vector<8x32xf32>, vector<32x10xf32>, vector<8x10xf32> -> vector<8x10xf32>
    %c0_103 = arith.constant 0 : index
    %c0_104 = arith.constant 0 : index
    %120 = vector.load %arg12[%c0_103, %c0_104] : memref<1x10xf32, #tpu.memory_space<vmem>>, vector<1x10xf32>
    %121 = vector.broadcast %120 : vector<1x10xf32> to vector<8x10xf32>
    %122 = arith.addf %119, %121 : vector<8x10xf32>
    %c0_105 = arith.constant 0 : index
    %c0_106 = arith.constant 0 : index
    %123 = vector.load %arg13[%c0_105, %c0_106] : memref<8x10xf32, #tpu.memory_space<vmem>>, vector<8x10xf32>
    tpu.vector_store %arg13[%c0_105, %c0_106], %122 {strides = array<i32>} : memref<8x10xf32, #tpu.memory_space<vmem>>, vector<8x10xf32>,
    return
  }
  func.func @transform_0(%arg0: i32) -> (i32, i32) {
    %c0_i32 = arith.constant 0 : i32
    %c0_i32_0 = arith.constant 0 : i32
    return %arg0, %c0_i32 : i32, i32
  }
  func.func @transform_1(%arg0: i32) -> (i32, i32, i32) {
    %c0_i32 = arith.constant 0 : i32
    %c0_i32_0 = arith.constant 0 : i32
    %c0_i32_1 = arith.constant 0 : i32
    %c0_i32_2 = arith.constant 0 : i32
    return %c0_i32, %c0_i32_0, %c0_i32_1 : i32, i32, i32
  }
  func.func @transform_2(%arg0: i32) -> (i32, i32, i32) {
    %c0_i32 = arith.constant 0 : i32
    %c0_i32_0 = arith.constant 0 : i32
    %c0_i32_1 = arith.constant 0 : i32
    %c0_i32_2 = arith.constant 0 : i32
    return %c0_i32, %c0_i32_0, %c0_i32_1 : i32, i32, i32
  }
  func.func @transform_3(%arg0: i32) -> (i32, i32) {
    %c0_i32 = arith.constant 0 : i32
    %c0_i32_0 = arith.constant 0 : i32
    %c0_i32_1 = arith.constant 0 : i32
    return %c0_i32, %c0_i32_0 : i32, i32
  }
  func.func @transform_4(%arg0: i32) -> (i32, i32, i32) {
    %c0_i32 = arith.constant 0 : i32
    %c0_i32_0 = arith.constant 0 : i32
    %c0_i32_1 = arith.constant 0 : i32
    %c0_i32_2 = arith.constant 0 : i32
    return %c0_i32, %c0_i32_0, %c0_i32_1 : i32, i32, i32
  }
  func.func @transform_5(%arg0: i32) -> (i32, i32, i32) {
    %c0_i32 = arith.constant 0 : i32
    %c0_i32_0 = arith.constant 0 : i32
    %c0_i32_1 = arith.constant 0 : i32
    %c0_i32_2 = arith.constant 0 : i32
    return %c0_i32, %c0_i32_0, %c0_i32_1 : i32, i32, i32
  }
  func.func @transform_6(%arg0: i32) -> (i32, i32) {
    %c0_i32 = arith.constant 0 : i32
    %c0_i32_0 = arith.constant 0 : i32
    %c0_i32_1 = arith.constant 0 : i32
    return %c0_i32, %c0_i32_0 : i32, i32
  }
  func.func @transform_7(%arg0: i32) -> (i32, i32, i32) {
    %c0_i32 = arith.constant 0 : i32
    %c0_i32_0 = arith.constant 0 : i32
    %c0_i32_1 = arith.constant 0 : i32
    %c0_i32_2 = arith.constant 0 : i32
    return %c0_i32, %c0_i32_0, %c0_i32_1 : i32, i32, i32
  }
  func.func @transform_8(%arg0: i32) -> (i32, i32, i32) {
    %c0_i32 = arith.constant 0 : i32
    %c0_i32_0 = arith.constant 0 : i32
    %c0_i32_1 = arith.constant 0 : i32
    %c0_i32_2 = arith.constant 0 : i32
    return %c0_i32, %c0_i32_0, %c0_i32_1 : i32, i32, i32
  }
  func.func @transform_9(%arg0: i32) -> (i32, i32) {
    %c0_i32 = arith.constant 0 : i32
    %c0_i32_0 = arith.constant 0 : i32
    %c0_i32_1 = arith.constant 0 : i32
    return %c0_i32, %c0_i32_0 : i32, i32
  }
  func.func @transform_10(%arg0: i32) -> (i32, i32) {
    %c0_i32 = arith.constant 0 : i32
    %c0_i32_0 = arith.constant 0 : i32
    %c0_i32_1 = arith.constant 0 : i32
    return %c0_i32, %c0_i32_0 : i32, i32
  }
  func.func @transform_11(%arg0: i32) -> (i32, i32) {
    %c0_i32 = arith.constant 0 : i32
    %c0_i32_0 = arith.constant 0 : i32
    %c0_i32_1 = arith.constant 0 : i32
    return %c0_i32, %c0_i32_0 : i32, i32
  }
  func.func @transform_12(%arg0: i32) -> (i32, i32) {
    %c0_i32 = arith.constant 0 : i32
    %c0_i32_0 = arith.constant 0 : i32
    return %arg0, %c0_i32 : i32, i32
  }
}

</mosaic_0001>

<bundles_post_ra>
// kernel: tile.13
= control target key start
LH: loop header
LB: loop body
LE: loop exit
PB: predicated region body
PF: predicated region fallthrough
CT: control target
= control target key end

     0   :  { %s28_s0 = inlined_call_operand.vmem [shape: f32[16], index: 0, kind: input, shape index: {}]   ;;  %s29_s1 = inlined_call_operand.vmem [shape: f32[12,16], index: 1, kind: output, shape index: {}]  }
   0x1   :  { %v4_v0 = vld [vmem:[%s28_s0] ss:$0 sm:$0xff] }
   0x2   :  { %5 = vst [vmem:[%s29_s1] sm:$0xff] %v4_v0  ;;  %8 = vst [vmem:[%s29_s1 + $0x8] sm:$0xff] %v4_v0 }

// kernel: tile.14
= control target key start
LH: loop header
LB: loop body
LE: loop exit
PB: predicated region body
PF: predicated region fallthrough
CT: control target
= control target key end

     0   :  { %s77_s10 = smov 112   ;;  %s78_s11 = smov 80   ;;  %vm4_vm0 = vcmask 130048   ;;  %vm10_vm1 = vcmask 1048448   ;;  %vm16_vm2 = vcmask 917248   ;;  %vm22_vm3 = vcmask 786048   ;;  %s124_s0 = inlined_call_operand.vmem [shape: f32[12,16], index: 0, kind: input, shape index: {}]   ;;  %s125_s1 = inlined_call_operand.vmem [shape: f32[1,192], index: 1, kind: output, shape index: {}]  }
   0x1   :  { %v62_v0 = vld [vmem:[%s124_s0 + $0x7] sm:$0x1]   ;;  %v64_v1 = vld [vmem:[%s124_s0 + $0x5] sm:$0x1]   ;;  %v63_v2 = vld [vmem:[%s124_s0 + $0x6] sm:$0x1]  }
   0x2   :  { %8 = vrot.lane.b32.xlu0 %v62_v0, %s77_s10  ;;  %20 = vrot.lane.b32.xlu1 %v64_v1, %s78_s11  ;;  %v65_v3 = vld [vmem:[%s124_s0 + $0x4] sm:$0x1]   ;;  %s31_s16 = smov 3  ;;  %s38_s17 = smov 3  ;;  %vm28_vm4 = vcmask 654848   ;;  %vm35_vm5 = vcmask 523648  }
   0x3   :  { %s79_s18 = smov 96   ;;  %s80_s19 = smov 64   ;;  %v66_v4 = vld [vmem:[%s124_s0 + $0x3] ss:$8 sm:%s31_s16]   ;;  %v67_v5 = vld [vmem:[%s124_s0 + $0x2] ss:$8 sm:%s38_s17]  }
   0x4   :  { %s2_s22 = smov 3  ;;  %s45_s27 = smov 3  ;;  %vm42_vm6 = vcmask 392448   ;;  %vm49_vm7 = vcmask 261248  }
   0x5   :  { %v3_v6 = vld [vmem:[%s124_s0] ss:$8 sm:%s2_s22]   ;;  %s81_s28 = smov 48   ;;  %s82_s29 = smov 32   ;;  %v68_v7 = vld [vmem:[%s124_s0 + $0x1] ss:$8 sm:%s45_s27]  }
   0x6   :  { %14 = vrot.lane.b32.xlu0 %v63_v2, %s79_s18  ;;  %26 = vrot.lane.b32.xlu1 %v65_v3, %s80_s19  ;;  %5 = vst.msk [vmem:[#allocation0] ss:$8 sm:$0x3] %vm4_vm0, %v3_v6   ;;  %s83_s0 = smov 16  }
   0xa   :  { %33 = vrot.lane.b32.xlu0 %v66_v4, %s81_s28  ;;  %40 = vrot.lane.b32.xlu1 %v67_v5, %s82_s29 }
   0xe   :  { %47 = vrot.lane.b32.xlu0 %v68_v7, %s83_s0 }
  0x74   :  { %v9_v8 = vpop.permute.xlu0 %8   ;;  %v21_v9 = vpop.permute.xlu1 %20  }
  0x75   :  { %11 = vst.msk [vmem:[#allocation0] sm:$0x1] %vm10_vm1, %v9_v8  }
  0x78   :  { %v15_v10 = vpop.permute.xlu0 %14   ;;  %v27_v11 = vpop.permute.xlu1 %26  }
  0x79   :  { %17 = vst.msk [vmem:[#allocation0] sm:$0x1] %vm16_vm2, %v15_v10  }
  0x7a   :  { %23 = vst.msk [vmem:[#allocation0] sm:$0x1] %vm22_vm3, %v21_v9  }
  0x7b   :  { %29 = vst.msk [vmem:[#allocation0] sm:$0x1] %vm28_vm4, %v27_v11  }
  0x7c   :  { %v34_v12 = vpop.permute.xlu0 %33   ;;  %v41_v13 = vpop.permute.xlu1 %40  }
  0x7d   :  { %36 = vst.msk [vmem:[#allocation0] ss:$8 sm:$0x3] %vm35_vm5, %v34_v12  }
  0x7e   :  { %43 = vst.msk [vmem:[#allocation0] ss:$8 sm:$0x3] %vm42_vm6, %v41_v13  }
  0x80   :  { %v48_v14 = vpop.permute.xlu0 %47  }
  0x81   :  { %50 = vst.msk [vmem:[#allocation0] ss:$8 sm:$0x3] %vm49_vm7, %v48_v14  }
  0x88   :  { %v54_v15 = vld [vmem:[#allocation0] sm:$0x1]  ;;  %v58_v16 = vld [vmem:[#allocation0 + $0x8] sm:$0x1] }
  0x89   :  { %56 = vst [vmem:[%s125_s1] sm:$0x1] %v54_v15  ;;  %69 = vst [vmem:[%s125_s1 + $0x1] sm:$0x1] %v58_v16 }

// kernel: tile.18
= control target key start
LH: loop header
LB: loop body
LE: loop exit
PB: predicated region body
PF: predicated region fallthrough
CT: control target
= control target key end

     0   :  { %s22_s0 = inlined_call_operand.vmem [shape: f32[32], index: 0, kind: input, shape index: {}]   ;;  %s23_s1 = inlined_call_operand.vmem [shape: f32[4,32], index: 1, kind: output, shape index: {}]  }
   0x1   :  { %v4_v0 = vld [vmem:[%s22_s0] ss:$0 sm:$0xff] }
   0x2   :  { %5 = vst [vmem:[%s23_s1] sm:$0xf] %v4_v0 }

// kernel: tile.19
= control target key start
LH: loop header
LB: loop body
LE: loop exit
PB: predicated region body
PF: predicated region fallthrough
CT: control target
= control target key end

     0   :  { %vm7_vm0 = vcmask 261120   ;;  %s37_s8 = smov 32   ;;  %s38_s9 = smov 64   ;;  %vm13_vm1 = vcmask 1048320   ;;  %vm19_vm2 = vcmask 785920   ;;  %vm25_vm3 = vcmask 523520   ;;  %s55_s0 = inlined_call_operand.vmem [shape: f32[4,32], index: 0, kind: input, shape index: {}]   ;;  %s56_s1 = inlined_call_operand.vmem [shape: f32[1,128], index: 1, kind: output, shape index: {}]  }
   0x1   :  { %v4_v0 = vld [vmem:[%s55_s0] sm:$0xf]  ;;  %s36_s0 = smov 96  }
   0x2   :  { %5 = vst [vmem:[#allocation1] sm:$0xf] %v4_v0 }
   0x9   :  { %v10_v1 = vld [vmem:[#allocation1 + $0x3] sm:$0x1]   ;;  %v22_v2 = vld [vmem:[#allocation1 + $0x1] sm:$0x1]   ;;  %v6_v3 = vld [vmem:[#allocation1] sm:$0x1]  }
   0xa   :  { %11 = vrot.lane.b32.xlu0 %v10_v1, %s36_s0  ;;  %23 = vrot.lane.b32.xlu1 %v22_v2, %s37_s8  ;;  %v16_v4 = vld [vmem:[#allocation1 + $0x2] sm:$0x1]   ;;  %8 = vst.msk [vmem:[#allocation0] sm:$0x1] %vm7_vm0, %v6_v3  }
   0xe   :  { %17 = vrot.lane.b32.xlu0 %v16_v4, %s38_s9 }
  0x7c   :  { %v12_v5 = vpop.permute.xlu0 %11   ;;  %v24_v6 = vpop.permute.xlu1 %23  }
  0x7d   :  { %14 = vst.msk [vmem:[#allocation0] sm:$0x1] %vm13_vm1, %v12_v5  }
  0x80   :  { %v18_v7 = vpop.permute.xlu0 %17  }
  0x81   :  { %20 = vst.msk [vmem:[#allocation0] sm:$0x1] %vm19_vm2, %v18_v7  }
  0x82   :  { %26 = vst.msk [vmem:[#allocation0] sm:$0x1] %vm25_vm3, %v24_v6  }
  0x89   :  { %v30_v8 = vld [vmem:[#allocation0] sm:$0x1] }
  0x8a   :  { %32 = vst [vmem:[%s56_s1] sm:$0x1] %v30_v8 }

// kernel: mnist_cnn_forward.1
= control target key start
LH: loop header
LB: loop body
LE: loop exit
PB: predicated region body
PF: predicated region fallthrough
CT: control target
= control target key end

     0   :  { %v9683_v3 = vmov 0.0   ;;  %vm122_vm0 = vcmask 1046528   ;;  %vm154_vm1 = vcmask 523264   ;;  %vm897_vm2 = vcmask 1045504   ;;  %s9670_s1 = inlined_call_operand.vmem [shape: f32[4,64,192], index: 1, kind: input, shape index: {}]   ;;  %s9671_s2 = inlined_call_operand.vmem [shape: f32[4,64,192], index: 2, kind: input, shape index: {}]   ;;  %s9672_s0 = inlined_call_operand.vmem [shape: f32[128,64], index: 0, kind: input, shape index: {}]   ;;  %s9673_s4 = inlined_call_operand.vmem [shape: f32[4,192,128], index: 4, kind: input, shape index: {}]   ;;  %s9674_s5 = inlined_call_operand.vmem [shape: f32[4,192,128], index: 5, kind: input, shape index: {}]   ;;  %s9675_s3 = inlined_call_operand.vmem [shape: f32[1,192], index: 3, kind: input, shape index: {}]   ;;  %s9676_s6 = inlined_call_operand.vmem [shape: f32[1,128], index: 6, kind: input, shape index: {}]   ;;  %s9677_s8 = inlined_call_operand.vmem [shape: f32[4,128,32], index: 8, kind: input, shape index: {}]   ;;  %s9678_s7 = inlined_call_operand.vmem [shape: f32[4,8,119], index: 7, kind: input, shape index: {}]   ;;  %s9679_s10 = inlined_call_operand.vmem [shape: f32[32,10], index: 10, kind: input, shape index: {}]   ;;  %s9680_s9 = inlined_call_operand.vmem [shape: f32[1,32], index: 9, kind: input, shape index: {}]   ;;  %s9681_s11 = inlined_call_operand.vmem [shape: f32[1,10], index: 11, kind: input, shape index: {}]   ;;  %s9682_s12 = inlined_call_operand.vmem [shape: f32[8,10], index: 12, kind: output, shape index: {}]  }
   0x1   :  { %v4813_v0 = vld [vmem:[%s9670_s1 + $0x88] sm:$0xff]  ;;  %v4815_v1 = vld [vmem:[%s9670_s1 + $0x98] sm:$0xff]  ;;  %251 = vmatprep.mubr.f32.mxu0 %v9683_v3  ;;  %622 = vmatprep.mubr.f32.mxu1 %v9683_v3  ;;  %v4812_v6 = vld [vmem:[%s9670_s1 + $0x80] sm:$0xff]  ;;  %vm1381_vm3 = vcmask 1044480   ;;  %vm6878_vm4 = vmmov 0   ;;  %vm4061_vm5 = vcmask 973824  }
   0x2   :  { %v4861_v2 = vld [vmem:[%s9671_s2 + $0x88] sm:$0xff]  ;;  %v5791_v4 = vpack.c.bf16 %v4815_v1, %v4813_v0  ;;  %v4863_v5 = vld [vmem:[%s9671_s2 + $0x98] sm:$0xff]  ;;  %v4814_v7 = vld [vmem:[%s9670_s1 + $0x90] sm:$0xff]  ;;  %vm4732_vm6 = vcmask 261120   ;;  %vm4806_vm7 = vcmask 80896  }
   0x3   :  { %v5823_v8 = vpack.c.bf16 %v4863_v5, %v4861_v2  ;;  %v5793_v9 = vpack.c.bf16 %v4814_v7, %v4812_v6  ;;  %v4860_v10 = vld [vmem:[%s9671_s2 + $0x80] sm:$0xff]  ;;  %v4862_v11 = vld [vmem:[%s9671_s2 + $0x90] sm:$0xff]  ;;  %v4817_v12 = vld [vmem:[%s9670_s1 + $0xa8] sm:$0xff] }
   0x4   :  { %5792 = vmatprep.subr.bf16.mxu0 %v5791_v4  ;;  %v5825_v13 = vpack.c.bf16 %v4862_v11, %v4860_v10  ;;  %v4819_v14 = vld [vmem:[%s9670_s1 + $0xb8] sm:$0xff]  ;;  %v4865_v15 = vld [vmem:[%s9671_s2 + $0xa8] sm:$0xff]  ;;  %v4816_v19 = vld [vmem:[%s9670_s1 + $0xa0] sm:$0xff] }
   0x5   :  { %v4867_v16 = vld [vmem:[%s9671_s2 + $0xb8] sm:$0xff]  ;;  %5824 = vmatprep.subr.bf16.mxu1 %v5823_v8  ;;  %5794 = vmatpush1.bf16.msra.mxu0 %v5793_v9  ;;  %v5795_v17 = vpack.c.bf16 %v4819_v14, %v4817_v12  ;;  %v4818_v20 = vld [vmem:[%s9670_s1 + $0xb0] sm:$0xff]  ;;  %v4864_v21 = vld [vmem:[%s9671_s2 + $0xa0] sm:$0xff] }
   0x6   :  { %v5827_v18 = vpack.c.bf16 %v4867_v16, %v4865_v15  ;;  %5826 = vmatpush1.bf16.msra.mxu1 %v5825_v13  ;;  %v5797_v22 = vpack.c.bf16 %v4818_v20, %v4816_v19  ;;  %v4866_v23 = vld [vmem:[%s9671_s2 + $0xb0] sm:$0xff]  ;;  %v4821_v24 = vld [vmem:[%s9670_s1 + $0xc8] sm:$0xff]  ;;  %v4823_v25 = vld [vmem:[%s9670_s1 + $0xd8] sm:$0xff] }
   0x7   :  { %5796 = vmatprep.subr.bf16.mxu0 %v5795_v17  ;;  %v5829_v26 = vpack.c.bf16 %v4866_v23, %v4864_v21  ;;  %v5799_v27 = vpack.c.bf16 %v4823_v25, %v4821_v24  ;;  %v4869_v28 = vld [vmem:[%s9671_s2 + $0xc8] sm:$0xff]  ;;  %v4871_v29 = vld [vmem:[%s9671_s2 + $0xd8] sm:$0xff]  ;;  %v4820_v30 = vld [vmem:[%s9670_s1 + $0xc0] sm:$0xff] }
   0x8   :  { %5828 = vmatprep.subr.bf16.mxu1 %v5827_v18  ;;  %v5831_v31 = vpack.c.bf16 %v4871_v29, %v4869_v28  ;;  %v4822_v32 = vld [vmem:[%s9670_s1 + $0xd0] sm:$0xff]  ;;  %v4868_v33 = vld [vmem:[%s9671_s2 + $0xc0] sm:$0xff]  ;;  %v4825_v36 = vld [vmem:[%s9670_s1 + $0xe8] sm:$0xff] }
   0x9   :  { %v4870_v34 = vld [vmem:[%s9671_s2 + $0xd0] sm:$0xff]  ;;  %5798 = vmatpush1.bf16.msra.mxu0 %v5797_v22  ;;  %v5801_v35 = vpack.c.bf16 %v4822_v32, %v4820_v30  ;;  %v4827_v37 = vld [vmem:[%s9670_s1 + $0xf8] sm:$0xff]  ;;  %v4873_v38 = vld [vmem:[%s9671_s2 + $0xe8] sm:$0xff] }
   0xa   :  { %5830 = vmatpush1.bf16.msra.mxu1 %v5829_v26  ;;  %5800 = vmatprep.subr.bf16.mxu0 %v5799_v27  ;;  %v5833_v39 = vpack.c.bf16 %v4870_v34, %v4868_v33  ;;  %v5803_v40 = vpack.c.bf16 %v4827_v37, %v4825_v36  ;;  %v4875_v41 = vld [vmem:[%s9671_s2 + $0xf8] sm:$0xff]  ;;  %v4824_v42 = vld [vmem:[%s9670_s1 + $0xe0] sm:$0xff]  ;;  %v4826_v43 = vld [vmem:[%s9670_s1 + $0xf0] sm:$0xff] }
   0xb   :  { %5832 = vmatprep.subr.bf16.mxu1 %v5831_v31  ;;  %v5835_v44 = vpack.c.bf16 %v4875_v41, %v4873_v38  ;;  %v4872_v45 = vld [vmem:[%s9671_s2 + $0xe0] sm:$0xff]  ;;  %v4874_v46 = vld [vmem:[%s9671_s2 + $0xf0] sm:$0xff]  ;;  %v7050_v48 = vld [vmem:[%s9672_s0 + $0x8] sm:$0xff]  ;;  %v5805_v49 = vpack.c.bf16 %v4826_v43, %v4824_v42 }
   0xc   :  { %v7045_v47 = vld [vmem:[%s9672_s0] sm:$0xff]  ;;  %v124_v51 = vrot.slane %v7050_v48, 1  ;;  %v58_v52 = vld [vmem:[%s9670_s1 + $0x8] sm:$0xff]  ;;  %v60_v53 = vld [vmem:[%s9670_s1 + $0x18] sm:$0xff]  ;;  %v5837_v55 = vpack.c.bf16 %v4874_v46, %v4872_v45 }
   0xd   :  { %5802 = vmatpush1.bf16.msra.mxu0 %v5801_v35  ;;  %v123_v50 = vrot.slane %v7045_v47, 1  ;;  %v74_v54 = vld [vmem:[%s9671_s2 + $0x8] sm:$0xff]  ;;  %v7066_v56 = vld [vmem:[%s9672_s0 + $0x10] sm:$0xff]  ;;  %v5807_v57 = vpack.c.bf16 %v60_v53, %v58_v52  ;;  %v76_v58 = vld [vmem:[%s9671_s2 + $0x18] sm:$0xff] }
   0xe   :  { %5834 = vmatpush1.bf16.msra.mxu1 %v5833_v39  ;;  %5804 = vmatprep.subr.bf16.mxu0 %v5803_v40  ;;  %v5839_v59 = vpack.c.bf16 %v76_v58, %v74_v54  ;;  %v57_v60 = vld [vmem:[%s9670_s1] sm:$0xff]  ;;  %v59_v61 = vld [vmem:[%s9670_s1 + $0x10] sm:$0xff]  ;;  %v126_v1 = vrot.slane %v7066_v56, 1  ;;  %v62_v2 = vld [vmem:[%s9670_s1 + $0x28] sm:$0xff] }
   0xf   :  { %5836 = vmatprep.subr.bf16.mxu1 %v5835_v44  ;;  %v73_v62 = vld [vmem:[%s9671_s2] sm:$0xff]  ;;  %v75_v63 = vld [vmem:[%s9671_s2 + $0x10] sm:$0xff]  ;;  %v125_v0 = vsel %vm122_vm0, %v123_v50, %v124_v51  ;;  %v64_v4 = vld [vmem:[%s9670_s1 + $0x38] sm:$0xff]  ;;  %v5809_v7 = vpack.c.bf16 %v59_v61, %v57_v60 }
  0x10   :  { %v78_v5 = vld [vmem:[%s9671_s2 + $0x28] sm:$0xff]  ;;  %v7097_v6 = vld [vmem:[%s9672_s0 + $0x18] sm:$0xff]  ;;  %v5841_v9 = vpack.c.bf16 %v75_v63, %v73_v62  ;;  %v5811_v10 = vpack.c.bf16 %v64_v4, %v62_v2  ;;  %v61_v11 = vld [vmem:[%s9670_s1 + $0x20] sm:$0xff]  ;;  %v127_v16 = vsel %vm122_vm0, %v124_v51, %v126_v1 }
  0x11   :  { %5806 = vmatpush1.bf16.msra.mxu0 %v5805_v49  ;;  %v80_v8 = vld [vmem:[%s9671_s2 + $0x38] sm:$0xff]  ;;  %v63_v12 = vld [vmem:[%s9670_s1 + $0x30] sm:$0xff]  ;;  %v77_v14 = vld [vmem:[%s9671_s2 + $0x20] sm:$0xff]  ;;  %v128_v17 = vrot.slane %v7097_v6, 1 }
  0x12   :  { %5838 = vmatpush1.bf16.msra.mxu1 %v5837_v55  ;;  %5808 = vmatprep.subr.bf16.mxu0 %v5807_v57  ;;  %v5843_v13 = vpack.c.bf16 %v80_v8, %v78_v5  ;;  %v79_v15 = vld [vmem:[%s9671_s2 + $0x30] sm:$0xff]  ;;  %v66_v18 = vld [vmem:[%s9670_s1 + $0x48] sm:$0xff]  ;;  %v68_v19 = vld [vmem:[%s9670_s1 + $0x58] sm:$0xff]  ;;  %v5813_v22 = vpack.c.bf16 %v63_v12, %v61_v11 }
  0x13   :  { %5840 = vmatprep.subr.bf16.mxu1 %v5839_v59  ;;  %v82_v20 = vld [vmem:[%s9671_s2 + $0x48] sm:$0xff]  ;;  %v7132_v21 = vld [vmem:[%s9672_s0 + $0x20] sm:$0xff]  ;;  %v84_v23 = vld [vmem:[%s9671_s2 + $0x58] sm:$0xff]  ;;  %v5845_v24 = vpack.c.bf16 %v79_v15, %v77_v14  ;;  %v5815_v25 = vpack.c.bf16 %v68_v19, %v66_v18  ;;  %v129_v31 = vsel %vm122_vm0, %v126_v1, %v128_v17 }
  0x14   :  { %4828 = vmatmul.mubr.msk.f32.vlgmr.msra.gmra.mrb[0].mxu0 %vm154_vm1, %v125_v0  ;;  %v65_v26 = vld [vmem:[%s9670_s1 + $0x40] sm:$0xff]  ;;  %v67_v27 = vld [vmem:[%s9670_s1 + $0x50] sm:$0xff]  ;;  %v5847_v28 = vpack.c.bf16 %v84_v23, %v82_v20  ;;  %v130_v32 = vrot.slane %v7132_v21, 1  ;;  %v70_v33 = vld [vmem:[%s9670_s1 + $0x68] sm:$0xff] }
  0x15   :  { %4876 = vmatmul.mubr.msk.f32.vlgmr.msra.gmra.mrb[0].mxu1 %vm154_vm1, %v125_v0  ;;  %257 = vmatprep.mubr.f32.mxu0 %v9683_v3  ;;  %v81_v29 = vld [vmem:[%s9671_s2 + $0x40] sm:$0xff]  ;;  %v83_v30 = vld [vmem:[%s9671_s2 + $0x50] sm:$0xff]  ;;  %v72_v34 = vld [vmem:[%s9670_s1 + $0x78] sm:$0xff]  ;;  %v5817_v37 = vpack.c.bf16 %v67_v27, %v65_v26 }
  0x16   :  { %628 = vmatprep.mubr.f32.mxu1 %v9683_v3  ;;  %5810 = vmatpush1.bf16.msra.mxu0 %v5809_v7  ;;  %v86_v35 = vld [vmem:[%s9671_s2 + $0x68] sm:$0xff]  ;;  %v88_v38 = vld [vmem:[%s9671_s2 + $0x78] sm:$0xff]  ;;  %v5849_v39 = vpack.c.bf16 %v83_v30, %v81_v29  ;;  %v5819_v40 = vpack.c.bf16 %v72_v34, %v70_v33  ;;  %v69_v41 = vld [vmem:[%s9670_s1 + $0x60] sm:$0xff]  ;;  %v131_v50 = vsel %vm122_vm0, %v128_v17, %v130_v32 }
  0x17   :  { %5842 = vmatpush1.bf16.msra.mxu1 %v5841_v9  ;;  %5812 = vmatprep.subr.bf16.mxu0 %v5811_v10  ;;  %v7167_v36 = vld [vmem:[%s9672_s0 + $0x28] sm:$0xff]  ;;  %v71_v42 = vld [vmem:[%s9670_s1 + $0x70] sm:$0xff]  ;;  %v85_v43 = vld [vmem:[%s9671_s2 + $0x60] sm:$0xff]  ;;  %v5851_v44 = vpack.c.bf16 %v88_v38, %v86_v35 }
  0x18   :  { %4829 = vmatmul.mubr.msk.f32.gmra.mrb[2].mxu0 %vm154_vm1, %v127_v16  ;;  %5844 = vmatprep.subr.bf16.mxu1 %v5843_v13  ;;  %v87_v45 = vld [vmem:[%s9671_s2 + $0x70] sm:$0xff]  ;;  %v4909_v46 = vld [vmem:[%s9670_s1 + $0x108] sm:$0xff]  ;;  %v4911_v49 = vld [vmem:[%s9670_s1 + $0x118] sm:$0xff]  ;;  %v132_v51 = vrot.slane %v7167_v36, 1  ;;  %v5821_v55 = vpack.c.bf16 %v71_v42, %v69_v41 }
  0x19   :  { %4877 = vmatmul.mubr.msk.f32.gmra.mrb[2].mxu1 %vm154_vm1, %v127_v16  ;;  %263 = vmatprep.mubr.f32.mxu0 %v9683_v3  ;;  %v4941_v52 = vld [vmem:[%s9671_s2 + $0x108] sm:$0xff]  ;;  %v4943_v53 = vld [vmem:[%s9671_s2 + $0x118] sm:$0xff]  ;;  %v7205_v54 = vld [vmem:[%s9672_s0 + $0x30] sm:$0xff]  ;;  %v5853_v57 = vpack.c.bf16 %v87_v45, %v85_v43  ;;  %v5855_v58 = vpack.c.bf16 %v4911_v49, %v4909_v46 }
  0x1a   :  { %634 = vmatprep.mubr.f32.mxu1 %v9683_v3  ;;  %5814 = vmatpush1.bf16.msra.mxu0 %v5813_v22  ;;  %v5871_v59 = vpack.c.bf16 %v4943_v53, %v4941_v52  ;;  %v133_v60 = vsel %vm122_vm0, %v130_v32, %v132_v51  ;;  %v134_v61 = vrot.slane %v7205_v54, 1  ;;  %v7216_v62 = vld [vmem:[%s9672_s0 + $0x38] sm:$0xff]  ;;  %v7227_v1 = vld [vmem:[%s9672_s0 + $0x40] sm:$0xff]  ;;  %v7238_v5 = vld [vmem:[%s9672_s0 + $0x48] sm:$0xff] }
  0x1b   :  { %5846 = vmatpush1.bf16.msra.mxu1 %v5845_v24  ;;  %5816 = vmatprep.subr.bf16.mxu0 %v5815_v25  ;;  %v136_v0 = vrot.slane %v7216_v62, 1  ;;  %v138_v4 = vrot.slane %v7227_v1, 1  ;;  %v140_v8 = vrot.slane %v7238_v5, 1  ;;  %v7249_v9 = vld [vmem:[%s9672_s0 + $0x50] sm:$0xff]  ;;  %v7260_v12 = vld [vmem:[%s9672_s0 + $0x58] sm:$0xff]  ;;  %v7271_v15 = vld [vmem:[%s9672_s0 + $0x60] sm:$0xff] }
  0x1c   :  { %4830 = vmatmul.mubr.msk.f32.gmra.mrb[4].mxu0 %vm154_vm1, %v129_v31  ;;  %5848 = vmatprep.subr.bf16.mxu1 %v5847_v28  ;;  %v135_v63 = vsel %vm122_vm0, %v132_v51, %v134_v61  ;;  %v142_v11 = vrot.slane %v7249_v9, 1  ;;  %v144_v14 = vrot.slane %v7260_v12, 1  ;;  %v146_v17 = vrot.slane %v7271_v15, 1  ;;  %v7282_v18 = vld [vmem:[%s9672_s0 + $0x68] sm:$0xff]  ;;  %v7293_v22 = vld [vmem:[%s9672_s0 + $0x70] sm:$0xff]  ;;  %v7304_v25 = vld [vmem:[%s9672_s0 + $0x78] sm:$0xff] }
  0x1d   :  { %4878 = vmatmul.mubr.msk.f32.gmra.mrb[4].mxu1 %vm154_vm1, %v129_v31  ;;  %269 = vmatprep.mubr.f32.mxu0 %v9683_v3  ;;  %v137_v2 = vsel %vm122_vm0, %v134_v61, %v136_v0  ;;  %v139_v7 = vsel %vm122_vm0, %v136_v0, %v138_v4  ;;  %v141_v10 = vsel %vm122_vm0, %v138_v4, %v140_v8  ;;  %v148_v20 = vrot.slane %v7282_v18, 1  ;;  %v4908_v29 = vld [vmem:[%s9670_s1 + $0x100] sm:$0xff]  ;;  %v4910_v30 = vld [vmem:[%s9670_s1 + $0x110] sm:$0xff]  ;;  %v4913_v33 = vld [vmem:[%s9670_s1 + $0x128] sm:$0xff] }
  0x1e   :  { %640 = vmatprep.mubr.f32.mxu1 %v9683_v3  ;;  %5818 = vmatpush1.bf16.msra.mxu0 %v5817_v37  ;;  %v143_v13 = vsel %vm122_vm0, %v140_v8, %v142_v11  ;;  %v145_v16 = vsel %vm122_vm0, %v142_v11, %v144_v14  ;;  %v147_v19 = vsel %vm122_vm0, %v144_v14, %v146_v17  ;;  %v150_v24 = vrot.slane %v7293_v22, 1  ;;  %v4940_v31 = vld [vmem:[%s9671_s2 + $0x100] sm:$0xff]  ;;  %v4942_v32 = vld [vmem:[%s9671_s2 + $0x110] sm:$0xff]  ;;  %v4915_v34 = vld [vmem:[%s9670_s1 + $0x138] sm:$0xff] }
  0x1f   :  { %5850 = vmatpush1.bf16.msra.mxu1 %v5849_v39  ;;  %5820 = vmatprep.subr.bf16.mxu0 %v5819_v40  ;;  %v149_v23 = vsel %vm122_vm0, %v146_v17, %v148_v20  ;;  %v152_v27 = vrot.slane %v7304_v25, 1  ;;  %v4945_v35 = vld [vmem:[%s9671_s2 + $0x128] sm:$0xff]  ;;  %v4947_v37 = vld [vmem:[%s9671_s2 + $0x138] sm:$0xff]  ;;  %v5857_v38 = vpack.c.bf16 %v4910_v30, %v4908_v29  ;;  %v5873_v39 = vpack.c.bf16 %v4942_v32, %v4940_v31  ;;  %v4912_v41 = vld [vmem:[%s9670_s1 + $0x120] sm:$0xff] }
  0x20   :  { %4831 = vmatmul.mubr.msk.f32.gmra.mrb[6].mxu0 %vm154_vm1, %v131_v50  ;;  %5852 = vmatprep.subr.bf16.mxu1 %v5851_v44  ;;  %v151_v26 = vsel %vm122_vm0, %v148_v20, %v150_v24  ;;  %v5859_v40 = vpack.c.bf16 %v4915_v34, %v4913_v33  ;;  %v4914_v42 = vld [vmem:[%s9670_s1 + $0x130] sm:$0xff]  ;;  %v4944_v43 = vld [vmem:[%s9671_s2 + $0x120] sm:$0xff]  ;;  %v5875_v44 = vpack.c.bf16 %v4947_v37, %v4945_v35  ;;  %v4917_v46 = vld [vmem:[%s9670_s1 + $0x148] sm:$0xff]  ;;  %v898_v30 = vrot.slane %v7045_v47, 2 }
  0x21   :  { %4879 = vmatmul.mubr.msk.f32.gmra.mrb[6].mxu1 %vm154_vm1, %v131_v50  ;;  %275 = vmatprep.mubr.f32.mxu0 %v9683_v3  ;;  %v153_v28 = vsel %vm122_vm0, %v150_v24, %v152_v27  ;;  %v4946_v45 = vld [vmem:[%s9671_s2 + $0x130] sm:$0xff]  ;;  %v4919_v49 = vld [vmem:[%s9670_s1 + $0x158] sm:$0xff]  ;;  %v4949_v50 = vld [vmem:[%s9671_s2 + $0x148] sm:$0xff]  ;;  %v5861_v52 = vpack.c.bf16 %v4914_v42, %v4912_v41  ;;  %v899_v31 = vrot.slane %v7050_v48, 2 }
  0x22   :  { %646 = vmatprep.mubr.f32.mxu1 %v9683_v3  ;;  %5822 = vmatpush1.bf16.msra.mxu0 %v5821_v55  ;;  %v4951_v51 = vld [vmem:[%s9671_s2 + $0x158] sm:$0xff]  ;;  %v5877_v53 = vpack.c.bf16 %v4946_v45, %v4944_v43  ;;  %v5863_v55 = vpack.c.bf16 %v4919_v49, %v4917_v46  ;;  %v4950_v61 = vld [vmem:[%s9671_s2 + $0x150] sm:$0xff]  ;;  %v4920_v11 = vld [vmem:[%s9670_s1 + $0x160] sm:$0xff] }
  0x23   :  { %5854 = vmatpush1.bf16.msra.mxu1 %v5853_v57  ;;  %5856 = vmatprep.subr.bf16.mxu0 %v5855_v58  ;;  %v4916_v57 = vld [vmem:[%s9670_s1 + $0x140] sm:$0xff]  ;;  %v4918_v58 = vld [vmem:[%s9670_s1 + $0x150] sm:$0xff]  ;;  %v4923_v0 = vld [vmem:[%s9670_s1 + $0x178] sm:$0xff] }
  0x24   :  { %4832 = vmatmul.mubr.msk.f32.gmra.mrb[8].mxu0 %vm154_vm1, %v133_v60  ;;  %5872 = vmatprep.subr.bf16.mxu1 %v5871_v59  ;;  %v4948_v59 = vld [vmem:[%s9671_s2 + $0x140] sm:$0xff]  ;;  %v4955_v4 = vld [vmem:[%s9671_s2 + $0x178] sm:$0xff]  ;;  %v4954_v17 = vld [vmem:[%s9671_s2 + $0x170] sm:$0xff] }
  0x25   :  { %4880 = vmatmul.mubr.msk.f32.gmra.mrb[8].mxu1 %vm154_vm1, %v133_v60  ;;  %281 = vmatprep.mubr.f32.mxu0 %v9683_v3  ;;  %v5879_v60 = vpack.c.bf16 %v4951_v51, %v4949_v50  ;;  %v5881_v8 = vpack.c.bf16 %v4950_v61, %v4948_v59  ;;  %v4952_v14 = vld [vmem:[%s9671_s2 + $0x160] sm:$0xff]  ;;  %v4975_v20 = vld [vmem:[%s9670_s1 + $0x198] sm:$0xff]  ;;  %v4974_v33 = vld [vmem:[%s9670_s1 + $0x190] sm:$0xff] }
  0x26   :  { %652 = vmatprep.mubr.f32.mxu1 %v9683_v3  ;;  %v5007_v24 = vld [vmem:[%s9671_s2 + $0x198] sm:$0xff]  ;;  %v4972_v32 = vld [vmem:[%s9670_s1 + $0x180] sm:$0xff]  ;;  %v5006_v35 = vld [vmem:[%s9671_s2 + $0x190] sm:$0xff] }
  0x27   :  { %v5004_v34 = vld [vmem:[%s9671_s2 + $0x180] sm:$0xff]  ;;  %v4977_v37 = vld [vmem:[%s9670_s1 + $0x1a8] sm:$0xff]  ;;  %v5011_v42 = vld [vmem:[%s9671_s2 + $0x1b8] sm:$0xff]  ;;  %v5889_v43 = vpack.c.bf16 %v4974_v33, %v4972_v32  ;;  %v907_v32 = vrot.slane %v7167_v36, 2 }
  0x28   :  { %4833 = vmatmul.mubr.msk.f32.gmra.mrb[10].mxu0 %vm154_vm1, %v135_v63  ;;  %v5009_v41 = vld [vmem:[%s9671_s2 + $0x1a8] sm:$0xff]  ;;  %v4976_v46 = vld [vmem:[%s9670_s1 + $0x1a0] sm:$0xff]  ;;  %v4978_v49 = vld [vmem:[%s9670_s1 + $0x1b0] sm:$0xff] }
  0x29   :  { %4881 = vmatmul.mubr.msk.f32.gmra.mrb[10].mxu1 %vm154_vm1, %v135_v63  ;;  %287 = vmatprep.mubr.f32.mxu0 %v9683_v3  ;;  %v4921_v63 = vld [vmem:[%s9670_s1 + $0x168] sm:$0xff]  ;;  %v5008_v50 = vld [vmem:[%s9671_s2 + $0x1a0] sm:$0xff]  ;;  %v5907_v51 = vpack.c.bf16 %v5011_v42, %v5009_v41  ;;  %v5893_v61 = vpack.c.bf16 %v4978_v49, %v4976_v46  ;;  %v913_v42 = vrot.slane %v7227_v1, 2  ;;  %v917_v46 = vrot.slane %v7249_v9, 2 }
  0x2a   :  { %658 = vmatprep.mubr.f32.mxu1 %v9683_v3  ;;  %v5013_v59 = vld [vmem:[%s9671_s2 + $0x1c8] sm:$0xff] }
  0x2c   :  { %4834 = vmatmul.mubr.msk.f32.gmra.mrb[12].mxu0 %vm154_vm1, %v137_v2 }
  0x2d   :  { %4882 = vmatmul.mubr.msk.f32.gmra.mrb[12].mxu1 %vm154_vm1, %v137_v2  ;;  %293 = vmatprep.mubr.f32.mxu0 %v9683_v3  ;;  %v4953_v2 = vld [vmem:[%s9671_s2 + $0x168] sm:$0xff] }
  0x2e   :  { %664 = vmatprep.mubr.f32.mxu1 %v9683_v3 }
  0x30   :  { %4835 = vmatmul.mubr.msk.f32.gmra.mrb[14].mxu0 %vm154_vm1, %v139_v7 }
  0x31   :  { %4883 = vmatmul.mubr.msk.f32.gmra.mrb[14].mxu1 %vm154_vm1, %v139_v7  ;;  %299 = vmatprep.mubr.f32.mxu0 %v9683_v3  ;;  %v5865_v7 = vpack.c.bf16 %v4918_v58, %v4916_v57  ;;  %v903_v58 = vrot.slane %v7097_v6, 2 }
  0x32   :  { %670 = vmatprep.mubr.f32.mxu1 %v9683_v3 }
  0x34   :  { %4836 = vmatmul.mubr.msk.f32.gmra.mrb[16].mxu0 %vm154_vm1, %v141_v10 }
  0x35   :  { %4884 = vmatmul.mubr.msk.f32.gmra.mrb[16].mxu1 %vm154_vm1, %v141_v10  ;;  %305 = vmatprep.mubr.f32.mxu0 %v9683_v3  ;;  %v5867_v10 = vpack.c.bf16 %v4923_v0, %v4921_v63 }
  0x36   :  { %676 = vmatprep.mubr.f32.mxu1 %v9683_v3 }
  0x38   :  { %4837 = vmatmul.mubr.msk.f32.gmra.mrb[18].mxu0 %vm154_vm1, %v143_v13 }
  0x39   :  { %4885 = vmatmul.mubr.msk.f32.gmra.mrb[18].mxu1 %vm154_vm1, %v143_v13  ;;  %311 = vmatprep.mubr.f32.mxu0 %v9683_v3  ;;  %v4922_v13 = vld [vmem:[%s9670_s1 + $0x170] sm:$0xff] }
  0x3a   :  { %682 = vmatprep.mubr.f32.mxu1 %v9683_v3 }
  0x3c   :  { %4838 = vmatmul.mubr.msk.f32.gmra.mrb[20].mxu0 %vm154_vm1, %v145_v16 }
  0x3d   :  { %4886 = vmatmul.mubr.msk.f32.gmra.mrb[20].mxu1 %vm154_vm1, %v145_v16  ;;  %317 = vmatprep.mubr.f32.mxu0 %v9683_v3  ;;  %v5883_v16 = vpack.c.bf16 %v4955_v4, %v4953_v2  ;;  %v4980_v2 = vld [vmem:[%s9670_s1 + $0x1c0] sm:$0xff]  ;;  %v4982_v4 = vld [vmem:[%s9670_s1 + $0x1d0] sm:$0xff] }
  0x3e   :  { %688 = vmatprep.mubr.f32.mxu1 %v9683_v3 }
  0x40   :  { %4839 = vmatmul.mubr.msk.f32.gmra.mrb[22].mxu0 %vm154_vm1, %v147_v19 }
  0x41   :  { %4887 = vmatmul.mubr.msk.f32.gmra.mrb[22].mxu1 %vm154_vm1, %v147_v19  ;;  %323 = vmatprep.mubr.f32.mxu0 %v9683_v3  ;;  %v4973_v19 = vld [vmem:[%s9670_s1 + $0x188] sm:$0xff] }
  0x42   :  { %694 = vmatprep.mubr.f32.mxu1 %v9683_v3 }
  0x44   :  { %4840 = vmatmul.mubr.msk.f32.gmra.mrb[24].mxu0 %vm154_vm1, %v149_v23 }
  0x45   :  { %4888 = vmatmul.mubr.msk.f32.gmra.mrb[24].mxu1 %vm154_vm1, %v149_v23  ;;  %329 = vmatprep.mubr.f32.mxu0 %v9683_v3  ;;  %v5005_v23 = vld [vmem:[%s9671_s2 + $0x188] sm:$0xff] }
  0x46   :  { %700 = vmatprep.mubr.f32.mxu1 %v9683_v3  ;;  %v5903_v29 = vpack.c.bf16 %v5007_v24, %v5005_v23 }
  0x48   :  { %4841 = vmatmul.mubr.msk.f32.gmra.mrb[26].mxu0 %vm154_vm1, %v151_v26 }
  0x49   :  { %4889 = vmatmul.mubr.msk.f32.gmra.mrb[26].mxu1 %vm154_vm1, %v151_v26  ;;  %335 = vmatprep.mubr.f32.mxu0 %v9683_v3  ;;  %v5869_v26 = vpack.c.bf16 %v4922_v13, %v4920_v11  ;;  %v4985_v11 = vld [vmem:[%s9670_s1 + $0x1e8] sm:$0xff]  ;;  %v4987_v13 = vld [vmem:[%s9670_s1 + $0x1f8] sm:$0xff] }
  0x4a   :  { %706 = vmatprep.mubr.f32.mxu1 %v9683_v3  ;;  %v5899_v24 = vpack.c.bf16 %v4987_v13, %v4985_v11  ;;  %v5038_v13 = vld [vmem:[%s9673_s4 + $0xd0] sm:$0xff] }
  0x4c   :  { %4842 = vmatmul.mubr.msk.f32.gmra.mrb[28].mxu0 %vm154_vm1, %v153_v28 }
  0x4d   :  { %4890 = vmatmul.mubr.msk.f32.gmra.mrb[28].mxu1 %vm154_vm1, %v153_v28  ;;  %341 = vmatprep.mubr.f32.mxu0 %v9683_v3  ;;  %v5887_v28 = vpack.c.bf16 %v4975_v20, %v4973_v19  ;;  %v5019_v19 = vld [vmem:[%s9671_s2 + $0x1f8] sm:$0xff]  ;;  %v5897_v20 = vpack.c.bf16 %v4982_v4, %v4980_v2  ;;  %v5036_v2 = vld [vmem:[%s9673_s4 + $0xc0] sm:$0xff]  ;;  %v5037_v4 = vld [vmem:[%s9673_s4 + $0xc8] sm:$0xff] }
  0x4e   :  { %712 = vmatprep.mubr.f32.mxu1 %v9683_v3 }
  0x50   :  { %4843 = vmatmul.mubr.msk.f32.gmra.mrb[30].mxu0 %vm154_vm1, %v152_v27 }
  0x51   :  { %4891 = vmatmul.mubr.msk.f32.gmra.mrb[30].mxu1 %vm154_vm1, %v152_v27  ;;  %444 = vmatprep.mubr.f32.mxu0 %v9683_v3  ;;  %v5885_v27 = vpack.c.bf16 %v4954_v17, %v4952_v14  ;;  %v5017_v17 = vld [vmem:[%s9671_s2 + $0x1e8] sm:$0xff] }
  0x52   :  { %783 = vmatprep.mubr.f32.mxu1 %v9683_v3 }
  0x54   :  { %4844 = vmatmul.mubr.msk.f32.vlgmr.msra.gmra.mrb[0].mxu0 %vm154_vm1, %v7045_v47 }
  0x55   :  { %4892 = vmatmul.mubr.msk.f32.vlgmr.msra.gmra.mrb[0].mxu1 %vm154_vm1, %v7045_v47  ;;  %450 = vmatprep.mubr.f32.mxu0 %v9683_v3 }
  0x56   :  { %789 = vmatprep.mubr.f32.mxu1 %v9683_v3  ;;  %5858 = vmatpush1.bf16.msra.mxu0 %v5857_v38  ;;  %v4979_v38 = vld [vmem:[%s9670_s1 + $0x1b8] sm:$0xff] }
  0x57   :  { %5874 = vmatpush1.bf16.msra.mxu1 %v5873_v39  ;;  %5860 = vmatprep.subr.bf16.mxu0 %v5859_v40  ;;  %v900_v39 = vsel %vm897_vm2, %v898_v30, %v899_v31  ;;  %v901_v40 = vrot.slane %v7066_v56, 2  ;;  %v5891_v45 = vpack.c.bf16 %v4979_v38, %v4977_v37  ;;  %v5018_v30 = vld [vmem:[%s9671_s2 + $0x1f0] sm:$0xff]  ;;  %v909_v37 = vrot.slane %v7205_v54, 2 }
  0x58   :  { %4845 = vmatmul.mubr.msk.f32.gmra.mrb[2].mxu0 %vm154_vm1, %v7050_v48  ;;  %5876 = vmatprep.subr.bf16.mxu1 %v5875_v44  ;;  %v5905_v44 = vpack.c.bf16 %v5006_v35, %v5004_v34  ;;  %v9685_v38 = vmov 0.0|0.0  }
  0x59   :  { %4893 = vmatmul.mubr.msk.f32.gmra.mrb[2].mxu1 %vm154_vm1, %v7050_v48  ;;  %456 = vmatprep.mubr.f32.mxu0 %v9683_v3  ;;  %v902_v57 = vsel %vm897_vm2, %v899_v31, %v901_v40  ;;  %v904_v14 = vsel %vm897_vm2, %v901_v40, %v903_v58  ;;  %v911_v40 = vrot.slane %v7216_v62, 2 }
  0x5a   :  { %795 = vmatprep.mubr.f32.mxu1 %v9683_v3  ;;  %5862 = vmatpush1.bf16.msra.mxu0 %v5861_v52  ;;  %v5010_v52 = vld [vmem:[%s9671_s2 + $0x1b0] sm:$0xff] }
  0x5b   :  { %5878 = vmatpush1.bf16.msra.mxu1 %v5877_v53  ;;  %5864 = vmatprep.subr.bf16.mxu0 %v5863_v55  ;;  %v4981_v53 = vld [vmem:[%s9670_s1 + $0x1c8] sm:$0xff]  ;;  %v4983_v55 = vld [vmem:[%s9670_s1 + $0x1d8] sm:$0xff]  ;;  %v5909_v63 = vpack.c.bf16 %v5010_v52, %v5008_v50  ;;  %v912_v41 = vsel %vm897_vm2, %v909_v37, %v911_v40  ;;  %v919_v50 = vrot.slane %v7260_v12, 2  ;;  %v921_v52 = vrot.slane %v7271_v15, 2 }
  0x5c   :  { %4846 = vmatmul.mubr.msk.f32.gmra.mrb[4].mxu0 %vm154_vm1, %v7066_v56  ;;  %5880 = vmatprep.subr.bf16.mxu1 %v5879_v60  ;;  %v5015_v60 = vld [vmem:[%s9671_s2 + $0x1d8] sm:$0xff]  ;;  %v5895_v0 = vpack.c.bf16 %v4983_v55, %v4981_v53  ;;  %v923_v55 = vrot.slane %v7282_v18, 2 }
  0x5d   :  { %4894 = vmatmul.mubr.msk.f32.gmra.mrb[4].mxu1 %vm154_vm1, %v7066_v56  ;;  %462 = vmatprep.mubr.f32.mxu0 %v9683_v3  ;;  %v922_v53 = vsel %vm897_vm2, %v919_v50, %v921_v52 }
  0x5e   :  { %801 = vmatprep.mubr.f32.mxu1 %v9683_v3  ;;  %5866 = vmatpush1.bf16.msra.mxu0 %v5865_v7  ;;  %v5012_v7 = vld [vmem:[%s9671_s2 + $0x1c0] sm:$0xff] }
  0x5f   :  { %5882 = vmatpush1.bf16.msra.mxu1 %v5881_v8  ;;  %5868 = vmatprep.subr.bf16.mxu0 %v5867_v10  ;;  %v5911_v8 = vpack.c.bf16 %v5015_v60, %v5013_v59  ;;  %v5014_v10 = vld [vmem:[%s9671_s2 + $0x1d0] sm:$0xff]  ;;  %v927_v60 = vrot.slane %v7304_v25, 2 }
  0x60   :  { %4847 = vmatmul.mubr.msk.f32.gmra.mrb[6].mxu0 %vm154_vm1, %v7097_v6  ;;  %5884 = vmatprep.subr.bf16.mxu1 %v5883_v16  ;;  %v905_v16 = vrot.slane %v7132_v21, 2  ;;  %v5913_v23 = vpack.c.bf16 %v5014_v10, %v5012_v7  ;;  %v5092_v7 = vld [vmem:[%s9674_s5 + $0xc0] sm:$0xff]  ;;  %v5920_v10 = vpack.c.bf16 %v5037_v4, %v5036_v2  ;;  %v5103_v4 = vld [vmem:[%s9674_s5 + $0x118] sm:$0xff] }
  0x61   :  { %4895 = vmatmul.mubr.msk.f32.gmra.mrb[6].mxu1 %vm154_vm1, %v7097_v6  ;;  %468 = vmatprep.mubr.f32.mxu0 %v9683_v3 }
  0x62   :  { %807 = vmatprep.mubr.f32.mxu1 %v9683_v3  ;;  %5870 = vmatpush1.bf16.msra.mxu0 %v5869_v26  ;;  %v4984_v26 = vld [vmem:[%s9670_s1 + $0x1e0] sm:$0xff]  ;;  %v906_v31 = vsel %vm897_vm2, %v903_v58, %v905_v16  ;;  %v908_v35 = vsel %vm897_vm2, %v905_v16, %v907_v32  ;;  %v925_v58 = vrot.slane %v7293_v22, 2  ;;  %v5094_v16 = vld [vmem:[%s9674_s5 + $0xd0] sm:$0xff] }
  0x63   :  { %5886 = vmatpush1.bf16.msra.mxu1 %v5885_v27  ;;  %5888 = vmatprep.subr.bf16.mxu0 %v5887_v28  ;;  %v4986_v27 = vld [vmem:[%s9670_s1 + $0x1f0] sm:$0xff]  ;;  %v5915_v28 = vpack.c.bf16 %v5019_v19, %v5017_v17  ;;  %v1387_v19 = vrot.slane %v7097_v6, 3  ;;  %v5096_v6 = vld [vmem:[%s9674_s5 + $0xe0] sm:$0xff] }
  0x64   :  { %4848 = vmatmul.mubr.msk.f32.gmra.mrb[8].mxu0 %vm154_vm1, %v7132_v21  ;;  %5904 = vmatprep.subr.bf16.mxu1 %v5903_v29  ;;  %v5016_v29 = vld [vmem:[%s9671_s2 + $0x1e0] sm:$0xff]  ;;  %v5901_v33 = vpack.c.bf16 %v4986_v27, %v4984_v26  ;;  %v926_v59 = vsel %vm897_vm2, %v923_v55, %v925_v58  ;;  %v5041_v26 = vld [vmem:[%s9673_s4 + $0xe8] sm:$0xff] }
  0x65   :  { %4896 = vmatmul.mubr.msk.f32.gmra.mrb[8].mxu1 %vm154_vm1, %v7132_v21  ;;  %474 = vmatprep.mubr.f32.mxu0 %v9683_v3  ;;  %v5917_v34 = vpack.c.bf16 %v5018_v30, %v5016_v29  ;;  %v5097_v27 = vld [vmem:[%s9674_s5 + $0xe8] sm:$0xff]  ;;  %v1389_v29 = vrot.slane %v7132_v21, 3  ;;  %v5098_v21 = vld [vmem:[%s9674_s5 + $0xf0] sm:$0xff] }
  0x66   :  { %813 = vmatprep.mubr.f32.mxu1 %v9683_v3 }
  0x68   :  { %4849 = vmatmul.mubr.msk.f32.gmra.mrb[10].mxu0 %vm154_vm1, %v7167_v36 }
  0x69   :  { %4897 = vmatmul.mubr.msk.f32.gmra.mrb[10].mxu1 %vm154_vm1, %v7167_v36  ;;  %480 = vmatprep.mubr.f32.mxu0 %v9683_v3 }
  0x6a   :  { %819 = vmatprep.mubr.f32.mxu1 %v9683_v3 }
  0x6c   :  { %4850 = vmatmul.mubr.msk.f32.gmra.mrb[12].mxu0 %vm154_vm1, %v7205_v54 }
  0x6d   :  { %4898 = vmatmul.mubr.msk.f32.gmra.mrb[12].mxu1 %vm154_vm1, %v7205_v54  ;;  %486 = vmatprep.mubr.f32.mxu0 %v9683_v3 }
  0x6e   :  { %825 = vmatprep.mubr.f32.mxu1 %v9683_v3 }
  0x70   :  { %4851 = vmatmul.mubr.msk.f32.gmra.mrb[14].mxu0 %vm154_vm1, %v7216_v62 }
  0x71   :  { %4899 = vmatmul.mubr.msk.f32.gmra.mrb[14].mxu1 %vm154_vm1, %v7216_v62  ;;  %492 = vmatprep.mubr.f32.mxu0 %v9683_v3 }
  0x72   :  { %831 = vmatprep.mubr.f32.mxu1 %v9683_v3 }
  0x74   :  { %4852 = vmatmul.mubr.msk.f32.gmra.mrb[16].mxu0 %vm154_vm1, %v7227_v1 }
  0x75   :  { %4900 = vmatmul.mubr.msk.f32.gmra.mrb[16].mxu1 %vm154_vm1, %v7227_v1  ;;  %498 = vmatprep.mubr.f32.mxu0 %v9683_v3 }
  0x76   :  { %837 = vmatprep.mubr.f32.mxu1 %v9683_v3 }
  0x78   :  { %4853 = vmatmul.mubr.msk.f32.gmra.mrb[18].mxu0 %vm154_vm1, %v7238_v5 }
  0x79   :  { %4901 = vmatmul.mubr.msk.f32.gmra.mrb[18].mxu1 %vm154_vm1, %v7238_v5  ;;  %504 = vmatprep.mubr.f32.mxu0 %v9683_v3 }
  0x7a   :  { %843 = vmatprep.mubr.f32.mxu1 %v9683_v3 }
  0x7c   :  { %4854 = vmatmul.mubr.msk.f32.gmra.mrb[20].mxu0 %vm154_vm1, %v7249_v9 }
  0x7d   :  { %4902 = vmatmul.mubr.msk.f32.gmra.mrb[20].mxu1 %vm154_vm1, %v7249_v9  ;;  %510 = vmatprep.mubr.f32.mxu0 %v9683_v3 }
  0x7e   :  { %849 = vmatprep.mubr.f32.mxu1 %v9683_v3 }
  0x80   :  { %4855 = vmatmul.mubr.msk.f32.gmra.mrb[22].mxu0 %vm154_vm1, %v7260_v12 }
  0x81   :  { %4903 = vmatmul.mubr.msk.f32.gmra.mrb[22].mxu1 %vm154_vm1, %v7260_v12  ;;  %516 = vmatprep.mubr.f32.mxu0 %v9683_v3 }
  0x82   :  { %855 = vmatprep.mubr.f32.mxu1 %v9683_v3 }
  0x84   :  { %4856 = vmatmul.mubr.msk.f32.gmra.mrb[24].mxu0 %vm154_vm1, %v7271_v15 }
  0x85   :  { %4904 = vmatmul.mubr.msk.f32.gmra.mrb[24].mxu1 %vm154_vm1, %v7271_v15  ;;  %522 = vmatprep.mubr.f32.mxu0 %v9683_v3 }
  0x86   :  { %861 = vmatprep.mubr.f32.mxu1 %v9683_v3 }
  0x88   :  { %4857 = vmatmul.mubr.msk.f32.gmra.mrb[26].mxu0 %vm154_vm1, %v7282_v18 }
  0x89   :  { %4905 = vmatmul.mubr.msk.f32.gmra.mrb[26].mxu1 %vm154_vm1, %v7282_v18  ;;  %528 = vmatprep.mubr.f32.mxu0 %v9683_v3 }
  0x8a   :  { %867 = vmatprep.mubr.f32.mxu1 %v9683_v3 }
  0x8c   :  { %4858 = vmatmul.mubr.msk.f32.gmra.mrb[28].mxu0 %vm154_vm1, %v7293_v22 }
  0x8d   :  { %4906 = vmatmul.mubr.msk.f32.gmra.mrb[28].mxu1 %vm154_vm1, %v7293_v22  ;;  %534 = vmatprep.mubr.f32.mxu0 %v9683_v3 }
  0x8e   :  { %873 = vmatprep.mubr.f32.mxu1 %v9683_v3 }
  0x90   :  { %4859 = vmatmul.mubr.msk.f32.gmra.mrb[30].mxu0 %vm154_vm1, %v7304_v25 }
  0x91   :  { %4907 = vmatmul.mubr.msk.f32.gmra.mrb[30].mxu1 %vm154_vm1, %v7304_v25  ;;  %1025 = vmatprep.mubr.f32.mxu0 %v9683_v3 }
  0x92   :  { %1235 = vmatprep.mubr.f32.mxu1 %v9683_v3 }
  0x94   :  { %4924 = vmatmul.mubr.msk.f32.vlgmr.msra.gmra.mrb[0].mxu0 %vm154_vm1, %v900_v39 }
  0x95   :  { %4956 = vmatmul.mubr.msk.f32.vlgmr.msra.gmra.mrb[0].mxu1 %vm154_vm1, %v900_v39  ;;  %1031 = vmatprep.mubr.f32.mxu0 %v9683_v3  ;;  %v910_v39 = vsel %vm897_vm2, %v907_v32, %v909_v37  ;;  %v5042_v32 = vld [vmem:[%s9673_s4 + $0xf0] sm:$0xff]  ;;  %v1391_v37 = vrot.slane %v7167_v36, 3  ;;  %v1393_v36 = vrot.slane %v7205_v54, 3 }
  0x96   :  { %1241 = vmatprep.mubr.f32.mxu1 %v9683_v3  ;;  %5890 = vmatpush1.bf16.msra.mxu0 %v5889_v43  ;;  %v914_v43 = vsel %vm897_vm2, %v911_v40, %v913_v42 }
  0x97   :  { %5906 = vmatpush1.bf16.msra.mxu1 %v5905_v44  ;;  %5892 = vmatprep.subr.bf16.mxu0 %v5891_v45  ;;  %v915_v44 = vrot.slane %v7238_v5, 2 }
  0x98   :  { %4925 = vmatmul.mubr.msk.f32.gmra.mrb[2].mxu0 %vm154_vm1, %v902_v57  ;;  %5908 = vmatprep.subr.bf16.mxu1 %v5907_v51  ;;  %v920_v51 = vsel %vm897_vm2, %v917_v46, %v919_v50  ;;  %v1405_v50 = vrot.slane %v7271_v15, 3 }
  0x99   :  { %4957 = vmatmul.mubr.msk.f32.gmra.mrb[2].mxu1 %vm154_vm1, %v902_v57  ;;  %1037 = vmatprep.mubr.f32.mxu0 %v9683_v3  ;;  %v916_v45 = vsel %vm897_vm2, %v913_v42, %v915_v44  ;;  %v918_v49 = vsel %vm897_vm2, %v915_v44, %v917_v46  ;;  %v924_v57 = vsel %vm897_vm2, %v921_v52, %v923_v55  ;;  %v1397_v44 = vrot.slane %v7227_v1, 3  ;;  %v5045_v55 = vld [vmem:[%s9673_s4 + $0x108] sm:$0xff] }
  0x9a   :  { %1247 = vmatprep.mubr.f32.mxu1 %v9683_v3  ;;  %5894 = vmatpush1.bf16.msra.mxu0 %v5893_v61  ;;  %v928_v61 = vsel %vm897_vm2, %v925_v58, %v927_v60  ;;  %v1394_v42 = vsel %vm1381_vm3, %v1391_v37, %v1393_v36  ;;  %v1401_v46 = vrot.slane %v7249_v9, 3  ;;  %v1409_v52 = vrot.slane %v7293_v22, 3 }
  0x9b   :  { %5910 = vmatpush1.bf16.msra.mxu1 %v5909_v63  ;;  %5896 = vmatprep.subr.bf16.mxu0 %v5895_v0  ;;  %v1382_v63 = vrot.slane %v7045_v47, 3  ;;  %v1383_v0 = vrot.slane %v7050_v48, 3  ;;  %v5093_v47 = vld [vmem:[%s9674_s5 + $0xc8] sm:$0xff] }
  0x9c   :  { %4926 = vmatmul.mubr.msk.f32.gmra.mrb[4].mxu0 %vm154_vm1, %v904_v14  ;;  %5912 = vmatprep.subr.bf16.mxu1 %v5911_v8  ;;  %v1385_v8 = vrot.slane %v7066_v56, 3  ;;  %v5992_v11 = vpack.c.bf16 %v5093_v47, %v5092_v7  ;;  %v5095_v56 = vld [vmem:[%s9674_s5 + $0xd8] sm:$0xff]  ;;  %v5048_v47 = vld [vmem:[%s9673_s4 + $0x120] sm:$0xff] }
  0x9d   :  { %4958 = vmatmul.mubr.msk.f32.gmra.mrb[4].mxu1 %vm154_vm1, %v904_v14  ;;  %1043 = vmatprep.mubr.f32.mxu0 %v9683_v3  ;;  %v1384_v48 = vsel %vm1381_vm3, %v1382_v63, %v1383_v0  ;;  %v5039_v14 = vld [vmem:[%s9673_s4 + $0xd8] sm:$0xff] }
  0x9e   :  { %1253 = vmatprep.mubr.f32.mxu1 %v9683_v3  ;;  %5898 = vmatpush1.bf16.msra.mxu0 %v5897_v20  ;;  %v1386_v17 = vsel %vm1381_vm3, %v1383_v0, %v1385_v8  ;;  %v5923_v20 = vpack.c.bf16 %v5039_v14, %v5038_v13  ;;  %v5047_v63 = vld [vmem:[%s9673_s4 + $0x118] sm:$0xff]  ;;  %v5102_v0 = vld [vmem:[%s9674_s5 + $0x110] sm:$0xff] }
  0x9f   :  { %5914 = vmatpush1.bf16.msra.mxu1 %v5913_v23  ;;  %5900 = vmatprep.subr.bf16.mxu0 %v5899_v24  ;;  %v5995_v23 = vpack.c.bf16 %v5095_v56, %v5094_v16  ;;  %v5040_v24 = vld [vmem:[%s9673_s4 + $0xe0] sm:$0xff]  ;;  %v6007_v7 = vpack.c.bf16 %v5103_v4, %v5102_v0  ;;  %v5050_v14 = vld [vmem:[%s9673_s4 + $0x130] sm:$0xff]  ;;  %v5051_v16 = vld [vmem:[%s9673_s4 + $0x138] sm:$0xff] }
  0xa0   :  { %4927 = vmatmul.mubr.msk.f32.gmra.mrb[6].mxu0 %vm154_vm1, %v906_v31  ;;  %5916 = vmatprep.subr.bf16.mxu1 %v5915_v28  ;;  %v1388_v28 = vsel %vm1381_vm3, %v1385_v8, %v1387_v19  ;;  %v5926_v30 = vpack.c.bf16 %v5041_v26, %v5040_v24  ;;  %v5104_v8 = vld [vmem:[%s9674_s5 + $0x120] sm:$0xff]  ;;  %v5106_v56 = vld [vmem:[%s9674_s5 + $0x130] sm:$0xff]  ;;  %v5053_v24 = vld [vmem:[%s9673_s4 + $0x148] sm:$0xff] }
  0xa1   :  { %4959 = vmatmul.mubr.msk.f32.gmra.mrb[6].mxu1 %vm154_vm1, %v906_v31  ;;  %1049 = vmatprep.mubr.f32.mxu0 %v9683_v3  ;;  %v5998_v31 = vpack.c.bf16 %v5097_v27, %v5096_v6  ;;  %v5108_v26 = vld [vmem:[%s9674_s5 + $0x140] sm:$0xff]  ;;  %v5109_v27 = vld [vmem:[%s9674_s5 + $0x148] sm:$0xff] }
  0xa2   :  { %1259 = vmatprep.mubr.f32.mxu1 %v9683_v3  ;;  %5902 = vmatpush1.bf16.msra.mxu0 %v5901_v33  ;;  %v5043_v33 = vld [vmem:[%s9673_s4 + $0xf8] sm:$0xff] }
  0xa3   :  { %5918 = vmatpush1.bf16.msra.mxu1 %v5917_v34  ;;  %5919 = vmatprep.subr.bf16.mxu0 %v9685_v38  ;;  %v5099_v34 = vld [vmem:[%s9674_s5 + $0xf8] sm:$0xff] }
  0xa4   :  { %4928 = vmatmul.mubr.msk.f32.gmra.mrb[8].mxu0 %vm154_vm1, %v908_v35  ;;  %5991 = vmatprep.subr.bf16.mxu1 %v9685_v38  ;;  %v6001_v40 = vpack.c.bf16 %v5099_v34, %v5098_v21  ;;  %v5056_v34 = vld [vmem:[%s9673_s4 + $0x160] sm:$0xff] }
  0xa5   :  { %4960 = vmatmul.mubr.msk.f32.gmra.mrb[8].mxu1 %vm154_vm1, %v908_v35  ;;  %1055 = vmatprep.mubr.f32.mxu0 %v9683_v3  ;;  %v1390_v35 = vsel %vm1381_vm3, %v1387_v19, %v1389_v29  ;;  %v5107_v19 = vld [vmem:[%s9674_s5 + $0x138] sm:$0xff] }
  0xa6   :  { %1265 = vmatprep.mubr.f32.mxu1 %v9683_v3 }
  0xa8   :  { %4929 = vmatmul.mubr.msk.f32.gmra.mrb[10].mxu0 %vm154_vm1, %v910_v39 }
  0xa9   :  { %4961 = vmatmul.mubr.msk.f32.gmra.mrb[10].mxu1 %vm154_vm1, %v910_v39  ;;  %1061 = vmatprep.mubr.f32.mxu0 %v9683_v3  ;;  %v5929_v39 = vpack.c.bf16 %v5043_v33, %v5042_v32  ;;  %v5111_v33 = vld [vmem:[%s9674_s5 + $0x158] sm:$0xff] }
  0xaa   :  { %1271 = vmatprep.mubr.f32.mxu1 %v9683_v3 }
  0xac   :  { %4930 = vmatmul.mubr.msk.f32.gmra.mrb[12].mxu0 %vm154_vm1, %v912_v41 }
  0xad   :  { %4962 = vmatmul.mubr.msk.f32.gmra.mrb[12].mxu1 %vm154_vm1, %v912_v41  ;;  %1067 = vmatprep.mubr.f32.mxu0 %v9683_v3  ;;  %v1392_v41 = vsel %vm1381_vm3, %v1389_v29, %v1391_v37  ;;  %v5054_v29 = vld [vmem:[%s9673_s4 + $0x150] sm:$0xff]  ;;  %v5112_v37 = vld [vmem:[%s9674_s5 + $0x160] sm:$0xff] }
  0xae   :  { %1277 = vmatprep.mubr.f32.mxu1 %v9683_v3 }
  0xb0   :  { %4931 = vmatmul.mubr.msk.f32.gmra.mrb[14].mxu0 %vm154_vm1, %v914_v43 }
  0xb1   :  { %4963 = vmatmul.mubr.msk.f32.gmra.mrb[14].mxu1 %vm154_vm1, %v914_v43  ;;  %1073 = vmatprep.mubr.f32.mxu0 %v9683_v3  ;;  %v1395_v43 = vrot.slane %v7216_v62, 3 }
  0xb2   :  { %1283 = vmatprep.mubr.f32.mxu1 %v9683_v3 }
  0xb3   :  { %v1396_v54 = vsel %vm1381_vm3, %v1393_v36, %v1395_v43  ;;  %v1398_v62 = vsel %vm1381_vm3, %v1395_v43, %v1397_v44  ;;  %v5058_v36 = vld [vmem:[%s9673_s4 + $0x170] sm:$0xff] }
  0xb4   :  { %4932 = vmatmul.mubr.msk.f32.gmra.mrb[16].mxu0 %vm154_vm1, %v916_v45  ;;  %v5114_v43 = vld [vmem:[%s9674_s5 + $0x170] sm:$0xff] }
  0xb5   :  { %4964 = vmatmul.mubr.msk.f32.gmra.mrb[16].mxu1 %vm154_vm1, %v916_v45  ;;  %1079 = vmatprep.mubr.f32.mxu0 %v9683_v3  ;;  %v1399_v45 = vrot.slane %v7238_v5, 3 }
  0xb6   :  { %1289 = vmatprep.mubr.f32.mxu1 %v9683_v3 }
  0xb7   :  { %v1400_v1 = vsel %vm1381_vm3, %v1397_v44, %v1399_v45  ;;  %v1402_v5 = vsel %vm1381_vm3, %v1399_v45, %v1401_v46  ;;  %v5115_v44 = vld [vmem:[%s9674_s5 + $0x178] sm:$0xff]  ;;  %v2040_v45 = vlaneseq }
  0xb8   :  { %4933 = vmatmul.mubr.msk.f32.gmra.mrb[18].mxu0 %vm154_vm1, %v918_v49 }
  0xb9   :  { %4965 = vmatmul.mubr.msk.f32.gmra.mrb[18].mxu1 %vm154_vm1, %v918_v49  ;;  %1085 = vmatprep.mubr.f32.mxu0 %v9683_v3  ;;  %v1403_v49 = vrot.slane %v7260_v12, 3 }
  0xba   :  { %1295 = vmatprep.mubr.f32.mxu1 %v9683_v3 }
  0xbb   :  { %v1404_v9 = vsel %vm1381_vm3, %v1401_v46, %v1403_v49  ;;  %v1406_v12 = vsel %vm1381_vm3, %v1403_v49, %v1405_v50  ;;  %v2041_v49 = vshrl.u32 %v2040_v45, 7  ;;  %v8059_v45 = vld [vmem:[%s9673_s4 + $0x38] sm:$0xff] }
  0xbc   :  { %4934 = vmatmul.mubr.msk.f32.gmra.mrb[20].mxu0 %vm154_vm1, %v920_v51 }
  0xbd   :  { %4966 = vmatmul.mubr.msk.f32.gmra.mrb[20].mxu1 %vm154_vm1, %v920_v51  ;;  %1091 = vmatprep.mubr.f32.mxu0 %v9683_v3  ;;  %v1407_v51 = vrot.slane %v7282_v18, 3 }
  0xbe   :  { %1301 = vmatprep.mubr.f32.mxu1 %v9683_v3 }
  0xbf   :  { %v1408_v15 = vsel %vm1381_vm3, %v1405_v50, %v1407_v51  ;;  %v1410_v18 = vsel %vm1381_vm3, %v1407_v51, %v1409_v52 }
  0xc0   :  { %4935 = vmatmul.mubr.msk.f32.gmra.mrb[22].mxu0 %vm154_vm1, %v922_v53 }
  0xc1   :  { %4967 = vmatmul.mubr.msk.f32.gmra.mrb[22].mxu1 %vm154_vm1, %v922_v53  ;;  %1097 = vmatprep.mubr.f32.mxu0 %v9683_v3  ;;  %v1411_v53 = vrot.slane %v7304_v25, 3  ;;  %v5044_v25 = vld [vmem:[%s9673_s4 + $0x100] sm:$0xff] }
  0xc2   :  { %1307 = vmatprep.mubr.f32.mxu1 %v9683_v3  ;;  %v5932_v58 = vpack.c.bf16 %v5045_v55, %v5044_v25  ;;  %v2046_v55 = vsub.s32 1, %v2041_v49 }
  0xc3   :  { %v1412_v22 = vsel %vm1381_vm3, %v1409_v52, %v1411_v53  ;;  %v2042_v52 = vsub.s32 0, %v2041_v49  ;;  %v8240_v49 = vld [vmem:[%s9673_s4 + $0x88] sm:$0xff] }
  0xc4   :  { %4936 = vmatmul.mubr.msk.f32.gmra.mrb[24].mxu0 %vm154_vm1, %v924_v57 }
  0xc5   :  { %4968 = vmatmul.mubr.msk.f32.gmra.mrb[24].mxu1 %vm154_vm1, %v924_v57  ;;  %1103 = vmatprep.mubr.f32.mxu0 %v9683_v3  ;;  %v5100_v57 = vld [vmem:[%s9674_s5 + $0x100] sm:$0xff] }
  0xc6   :  { %1313 = vmatprep.mubr.f32.mxu1 %v9683_v3 }
  0xc8   :  { %4937 = vmatmul.mubr.msk.f32.gmra.mrb[26].mxu0 %vm154_vm1, %v926_v59 }
  0xc9   :  { %4969 = vmatmul.mubr.msk.f32.gmra.mrb[26].mxu1 %vm154_vm1, %v926_v59  ;;  %1109 = vmatprep.mubr.f32.mxu0 %v9683_v3  ;;  %v5101_v59 = vld [vmem:[%s9674_s5 + $0x108] sm:$0xff] }
  0xca   :  { %1319 = vmatprep.mubr.f32.mxu1 %v9683_v3 }
  0xcc   :  { %4938 = vmatmul.mubr.msk.f32.gmra.mrb[28].mxu0 %vm154_vm1, %v928_v61 }
  0xcd   :  { %4970 = vmatmul.mubr.msk.f32.gmra.mrb[28].mxu1 %vm154_vm1, %v928_v61  ;;  %1115 = vmatprep.mubr.f32.mxu0 %v9683_v3  ;;  %v5046_v61 = vld [vmem:[%s9673_s4 + $0x110] sm:$0xff] }
  0xce   :  { %1325 = vmatprep.mubr.f32.mxu1 %v9683_v3  ;;  %v5935_v2 = vpack.c.bf16 %v5047_v63, %v5046_v61 }
  0xd0   :  { %4939 = vmatmul.mubr.msk.f32.gmra.mrb[30].mxu0 %vm154_vm1, %v927_v60 }
  0xd1   :  { %4971 = vmatmul.mubr.msk.f32.gmra.mrb[30].mxu1 %vm154_vm1, %v927_v60  ;;  %1509 = vmatprep.mubr.f32.mxu0 %v9683_v3  ;;  %v6004_v60 = vpack.c.bf16 %v5101_v59, %v5100_v57 }
  0xd2   :  { %1719 = vmatprep.mubr.f32.mxu1 %v9683_v3 }
  0xd4   :  { %4988 = vmatmul.mubr.msk.f32.vlgmr.msra.gmra.mrb[0].mxu0 %vm154_vm1, %v1384_v48 }
  0xd5   :  { %5020 = vmatmul.mubr.msk.f32.vlgmr.msra.gmra.mrb[0].mxu1 %vm154_vm1, %v1384_v48  ;;  %1515 = vmatprep.mubr.f32.mxu0 %v9683_v3  ;;  %v5049_v48 = vld [vmem:[%s9673_s4 + $0x128] sm:$0xff] }
  0xd6   :  { %1725 = vmatprep.mubr.f32.mxu1 %v9683_v3  ;;  %5921 = vmatpush1.bf16.msra.mxu0 %v5920_v10  ;;  %v5938_v10 = vpack.c.bf16 %v5049_v48, %v5048_v47 }
  0xd7   :  { %5993 = vmatpush1.bf16.msra.mxu1 %v5992_v11  ;;  %5922 = vmatprep.subr.bf16.mxu0 %v9685_v38  ;;  %v5105_v11 = vld [vmem:[%s9674_s5 + $0x128] sm:$0xff] }
  0xd8   :  { %4989 = vmatmul.mubr.msk.f32.gmra.mrb[2].mxu0 %vm154_vm1, %v1386_v17  ;;  %5994 = vmatprep.subr.bf16.mxu1 %v9685_v38  ;;  %v6010_v13 = vpack.c.bf16 %v5105_v11, %v5104_v8  ;;  %v7980_v11 = vld [vmem:[%s9673_s4 + $0x8] sm:$0xff] }
  0xd9   :  { %5021 = vmatmul.mubr.msk.f32.gmra.mrb[2].mxu1 %vm154_vm1, %v1386_v17  ;;  %1521 = vmatprep.mubr.f32.mxu0 %v9683_v3  ;;  %v5941_v17 = vpack.c.bf16 %v5051_v16, %v5050_v14  ;;  %v7990_v14 = vld [vmem:[%s9674_s5 + $0x8] sm:$0xff] }
  0xda   :  { %1731 = vmatprep.mubr.f32.mxu1 %v9683_v3  ;;  %5924 = vmatpush1.bf16.msra.mxu0 %v5923_v20  ;;  %v6013_v20 = vpack.c.bf16 %v5107_v19, %v5106_v56  ;;  %v7998_v19 = vld [vmem:[%s9673_s4 + $0x10] sm:$0xff] }
  0xdb   :  { %5996 = vmatpush1.bf16.msra.mxu1 %v5995_v23  ;;  %5925 = vmatprep.subr.bf16.mxu0 %v9685_v38  ;;  %v5052_v23 = vld [vmem:[%s9673_s4 + $0x140] sm:$0xff] }
  0xdc   :  { %4990 = vmatmul.mubr.msk.f32.gmra.mrb[4].mxu0 %vm154_vm1, %v1388_v28  ;;  %5997 = vmatprep.subr.bf16.mxu1 %v9685_v38  ;;  %v5944_v6 = vpack.c.bf16 %v5053_v24, %v5052_v23 }
  0xdd   :  { %5022 = vmatmul.mubr.msk.f32.gmra.mrb[4].mxu1 %vm154_vm1, %v1388_v28  ;;  %1527 = vmatprep.mubr.f32.mxu0 %v9683_v3  ;;  %v6016_v28 = vpack.c.bf16 %v5109_v27, %v5108_v26 }
  0xde   :  { %1737 = vmatprep.mubr.f32.mxu1 %v9683_v3  ;;  %5927 = vmatpush1.bf16.msra.mxu0 %v5926_v30  ;;  %v5055_v30 = vld [vmem:[%s9673_s4 + $0x158] sm:$0xff] }
  0xdf   :  { %5999 = vmatpush1.bf16.msra.mxu1 %v5998_v31  ;;  %5928 = vmatprep.subr.bf16.mxu0 %v9685_v38  ;;  %v5110_v31 = vld [vmem:[%s9674_s5 + $0x150] sm:$0xff]  ;;  %v5947_v32 = vpack.c.bf16 %v5055_v30, %v5054_v29 }
  0xe0   :  { %4991 = vmatmul.mubr.msk.f32.gmra.mrb[6].mxu0 %vm154_vm1, %v1390_v35  ;;  %6000 = vmatprep.subr.bf16.mxu1 %v9685_v38  ;;  %v6019_v21 = vpack.c.bf16 %v5111_v33, %v5110_v31  ;;  %v8020_v33 = vld [vmem:[%s9674_s5 + $0x18] sm:$0xff] }
  0xe1   :  { %5023 = vmatmul.mubr.msk.f32.gmra.mrb[6].mxu1 %vm154_vm1, %v1390_v35  ;;  %1533 = vmatprep.mubr.f32.mxu0 %v9683_v3  ;;  %v5057_v35 = vld [vmem:[%s9673_s4 + $0x168] sm:$0xff] }
  0xe2   :  { %1743 = vmatprep.mubr.f32.mxu1 %v9683_v3  ;;  %5930 = vmatpush1.bf16.msra.mxu0 %v5929_v39  ;;  %v5950_v39 = vpack.c.bf16 %v5057_v35, %v5056_v34 }
  0xe3   :  { %6002 = vmatpush1.bf16.msra.mxu1 %v6001_v40  ;;  %5931 = vmatprep.subr.bf16.mxu0 %v9685_v38  ;;  %v5113_v40 = vld [vmem:[%s9674_s5 + $0x168] sm:$0xff] }
  0xe4   :  { %4992 = vmatmul.mubr.msk.f32.gmra.mrb[8].mxu0 %vm154_vm1, %v1392_v41  ;;  %6003 = vmatprep.subr.bf16.mxu1 %v9685_v38 }
  0xe5   :  { %5024 = vmatmul.mubr.msk.f32.gmra.mrb[8].mxu1 %vm154_vm1, %v1392_v41  ;;  %1539 = vmatprep.mubr.f32.mxu0 %v9683_v3  ;;  %v6022_v41 = vpack.c.bf16 %v5113_v40, %v5112_v37 }
  0xe6   :  { %1749 = vmatprep.mubr.f32.mxu1 %v9683_v3  ;;  %5933 = vmatpush1.bf16.msra.mxu0 %v5932_v58 }
  0xe7   :  { %6005 = vmatpush1.bf16.msra.mxu1 %v6004_v60  ;;  %5934 = vmatprep.subr.bf16.mxu0 %v9685_v38 }
  0xe8   :  { %4993 = vmatmul.mubr.msk.f32.gmra.mrb[10].mxu0 %vm154_vm1, %v1394_v42  ;;  %6006 = vmatprep.subr.bf16.mxu1 %v9685_v38 }
  0xe9   :  { %5025 = vmatmul.mubr.msk.f32.gmra.mrb[10].mxu1 %vm154_vm1, %v1394_v42  ;;  %1545 = vmatprep.mubr.f32.mxu0 %v9683_v3  ;;  %v5059_v42 = vld [vmem:[%s9673_s4 + $0x178] sm:$0xff] }
  0xea   :  { %1755 = vmatprep.mubr.f32.mxu1 %v9683_v3  ;;  %5936 = vmatpush1.bf16.msra.mxu0 %v5935_v2 }
  0xeb   :  { %6008 = vmatpush1.bf16.msra.mxu1 %v6007_v7  ;;  %5937 = vmatprep.subr.bf16.mxu0 %v9685_v38  ;;  %v7970_v7 = vld [vmem:[%s9673_s4] sm:$0xff] }
  0xec   :  { %4994 = vmatmul.mubr.msk.f32.gmra.mrb[12].mxu0 %vm154_vm1, %v1396_v54  ;;  %6009 = vmatprep.subr.bf16.mxu1 %v9685_v38 }
  0xed   :  { %5026 = vmatmul.mubr.msk.f32.gmra.mrb[12].mxu1 %vm154_vm1, %v1396_v54  ;;  %1551 = vmatprep.mubr.f32.mxu0 %v9683_v3  ;;  %v5953_v54 = vpack.c.bf16 %v5059_v42, %v5058_v36  ;;  %v8041_v36 = vld [vmem:[%s9674_s5 + $0x20] sm:$0xff]  ;;  %v8046_v42 = vld [vmem:[%s9674_s5 + $0x28] sm:$0xff] }
  0xee   :  { %1761 = vmatprep.mubr.f32.mxu1 %v9683_v3  ;;  %5939 = vmatpush1.bf16.msra.mxu0 %v5938_v10 }
  0xef   :  { %6011 = vmatpush1.bf16.msra.mxu1 %v6010_v13  ;;  %5940 = vmatprep.subr.bf16.mxu0 %v9685_v38  ;;  %v7985_v13 = vld [vmem:[%s9674_s5] sm:$0xff] }
  0xf0   :  { %4995 = vmatmul.mubr.msk.f32.gmra.mrb[14].mxu0 %vm154_vm1, %v1398_v62  ;;  %6012 = vmatprep.subr.bf16.mxu1 %v9685_v38 }
  0xf1   :  { %5027 = vmatmul.mubr.msk.f32.gmra.mrb[14].mxu1 %vm154_vm1, %v1398_v62  ;;  %1557 = vmatprep.mubr.f32.mxu0 %v9683_v3  ;;  %v6025_v62 = vpack.c.bf16 %v5115_v44, %v5114_v43 }
  0xf2   :  { %1767 = vmatprep.mubr.f32.mxu1 %v9683_v3  ;;  %5942 = vmatpush1.bf16.msra.mxu0 %v5941_v17 }
  0xf3   :  { %6014 = vmatpush1.bf16.msra.mxu1 %v6013_v20  ;;  %5943 = vmatprep.subr.bf16.mxu0 %v9685_v38  ;;  %v8003_v20 = vld [vmem:[%s9673_s4 + $0x18] sm:$0xff] }
  0xf4   :  { %4996 = vmatmul.mubr.msk.f32.gmra.mrb[16].mxu0 %vm154_vm1, %v1400_v1  ;;  %6015 = vmatprep.subr.bf16.mxu1 %v9685_v38 }
  0xf5   :  { %5028 = vmatmul.mubr.msk.f32.gmra.mrb[16].mxu1 %vm154_vm1, %v1400_v1  ;;  %1563 = vmatprep.mubr.f32.mxu0 %v9683_v3 }
  0xf6   :  { %1773 = vmatprep.mubr.f32.mxu1 %v9683_v3  ;;  %5945 = vmatpush1.bf16.msra.mxu0 %v5944_v6 }
  0xf7   :  { %6017 = vmatpush1.bf16.msra.mxu1 %v6016_v28  ;;  %5946 = vmatprep.subr.bf16.mxu0 %v9685_v38 }
  0xf8   :  { %4997 = vmatmul.mubr.msk.f32.gmra.mrb[18].mxu0 %vm154_vm1, %v1402_v5  ;;  %6018 = vmatprep.subr.bf16.mxu1 %v9685_v38 }
  0xf9   :  { %5029 = vmatmul.mubr.msk.f32.gmra.mrb[18].mxu1 %vm154_vm1, %v1402_v5  ;;  %1569 = vmatprep.mubr.f32.mxu0 %v9683_v3 }
  0xfa   :  { %1779 = vmatprep.mubr.f32.mxu1 %v9683_v3  ;;  %5948 = vmatpush1.bf16.msra.mxu0 %v5947_v32  ;;  %v8015_v32 = vld [vmem:[%s9674_s5 + $0x10] sm:$0xff] }
  0xfb   :  { %6020 = vmatpush1.bf16.msra.mxu1 %v6019_v21  ;;  %5949 = vmatprep.subr.bf16.mxu0 %v9685_v38  ;;  %v8025_v21 = vld [vmem:[%s9673_s4 + $0x20] sm:$0xff] }
  0xfc   :  { %4998 = vmatmul.mubr.msk.f32.gmra.mrb[20].mxu0 %vm154_vm1, %v1404_v9  ;;  %6021 = vmatprep.subr.bf16.mxu1 %v9685_v38 }
  0xfd   :  { %5030 = vmatmul.mubr.msk.f32.gmra.mrb[20].mxu1 %vm154_vm1, %v1404_v9  ;;  %1575 = vmatprep.mubr.f32.mxu0 %v9683_v3 }
  0xfe   :  { %1785 = vmatprep.mubr.f32.mxu1 %v9683_v3  ;;  %5951 = vmatpush1.bf16.msra.mxu0 %v5950_v39 }
  0xff   :  { %6023 = vmatpush1.bf16.msra.mxu1 %v6022_v41  ;;  %5952 = vmatprep.subr.bf16.mxu0 %v9685_v38  ;;  %v8036_v41 = vld [vmem:[%s9673_s4 + $0x28] sm:$0xff] }
 0x100   :  { %4999 = vmatmul.mubr.msk.f32.gmra.mrb[22].mxu0 %vm154_vm1, %v1406_v12  ;;  %6024 = vmatprep.subr.bf16.mxu1 %v9685_v38 }
 0x101   :  { %5031 = vmatmul.mubr.msk.f32.gmra.mrb[22].mxu1 %vm154_vm1, %v1406_v12  ;;  %1581 = vmatprep.mubr.f32.mxu0 %v9683_v3 }
 0x102   :  { %1791 = vmatprep.mubr.f32.mxu1 %v9683_v3  ;;  %5954 = vmatpush1.bf16.msra.mxu0 %v5953_v54 }
 0x103   :  { %6026 = vmatpush1.bf16.msra.mxu1 %v6025_v62  ;;  %5955 = vmatprep.subr.bf16.mxu0 %v9685_v38  ;;  %v8054_v62 = vld [vmem:[%s9673_s4 + $0x30] sm:$0xff] }
 0x104   :  { %5000 = vmatmul.mubr.msk.f32.gmra.mrb[24].mxu0 %vm154_vm1, %v1408_v15  ;;  %6027 = vmatprep.subr.bf16.mxu1 %v9685_v38 }
 0x105   :  { %5032 = vmatmul.mubr.msk.f32.gmra.mrb[24].mxu1 %vm154_vm1, %v1408_v15  ;;  %1587 = vmatprep.mubr.f32.mxu0 %v9683_v3 }
 0x106   :  { %1797 = vmatprep.mubr.f32.mxu1 %v9683_v3 }
 0x108   :  { %5001 = vmatmul.mubr.msk.f32.gmra.mrb[26].mxu0 %vm154_vm1, %v1410_v18 }
 0x109   :  { %5033 = vmatmul.mubr.msk.f32.gmra.mrb[26].mxu1 %vm154_vm1, %v1410_v18  ;;  %1593 = vmatprep.mubr.f32.mxu0 %v9683_v3 }
 0x10a   :  { %1803 = vmatprep.mubr.f32.mxu1 %v9683_v3 }
 0x10c   :  { %5002 = vmatmul.mubr.msk.f32.gmra.mrb[28].mxu0 %vm154_vm1, %v1412_v22 }
 0x10d   :  { %5034 = vmatmul.mubr.msk.f32.gmra.mrb[28].mxu1 %vm154_vm1, %v1412_v22  ;;  %1599 = vmatprep.mubr.f32.mxu0 %v9683_v3  ;;  %v2038_v22 = vld [vmem:[%s9675_s3] sm:$0x3] }
 0x10e   :  { %1809 = vmatprep.mubr.f32.mxu1 %v9683_v3  ;;  %v7964_v63 = vrot.slane %v2038_v22, %v2042_v52  ;;  %v7973_v48 = vrot.slane %v2038_v22, %v2046_v55  ;;  %v8084_v22 = vld [vmem:[%s9673_s4 + $0x40] sm:$0xff] }
 0x110   :  { %5003 = vmatmul.mubr.msk.f32.gmra.mrb[30].mxu0 %vm154_vm1, %v1411_v53 }
 0x111   :  { %5035 = vmatmul.mubr.msk.f32.gmra.mrb[30].mxu1 %vm154_vm1, %v1411_v53 }
 0x1a7   :  { %v1511_v1 = vpop.f32.mrb[0].mxu0 }
 0x1a8   :  { %v1721_v46 = vpop.f32.mrb[0].mxu1  ;;  %v1513_v5 = vpop.f32.mrb[1].mxu0 }
 0x1a9   :  { %v1848_v9 = vmax.f32 %v1511_v1, %v1721_v46  ;;  %v1723_v50 = vpop.f32.mrb[1].mxu1 }
 0x1aa   :  { %v1849_v12 = vmax.f32 %v1513_v5, %v1723_v50 }
 0x1ab   :  { %v1517_v51 = vpop.f32.mrb[2].mxu0  ;;  %v1912_v58 = vrot.slane %v1848_v9, 1 }
 0x1ac   :  { %v1727_v15 = vpop.f32.mrb[2].mxu1  ;;  %v1519_v18 = vpop.f32.mrb[3].mxu0  ;;  %v1915_v61 = vrot.slane %v1849_v12, 1 }
 0x1ad   :  { %v1850_v53 = vmax.f32 %v1517_v51, %v1727_v15  ;;  %v1729_v25 = vpop.f32.mrb[3].mxu1 }
 0x1ae   :  { %v7962_v57 = vmax.f32 %v1519_v18, %v1729_v25  ;;  %v8074_v18 = vld [vmem:[%s9674_s5 + $0x30] sm:$0xff] }
 0x1af   :  { %v1913_v59 = vrot.slane %v1850_v53, 1  ;;  %v1523_v60 = vpop.f32.mrb[4].mxu0 }
 0x1b0   :  { %v1916_v0 = vrot.slane %v7962_v57, 1  ;;  %v1733_v2 = vpop.f32.mrb[4].mxu1  ;;  %v1525_v4 = vpop.f32.mrb[5].mxu0 }
 0x1b1   :  { %v1914_v47 = vsel %vm122_vm0, %v1912_v58, %v1913_v59  ;;  %v7975_v8 = vmax.f32 %v1523_v60, %v1733_v2  ;;  %v1735_v10 = vpop.f32.mrb[5].mxu1  ;;  %v8095_v60 = vld [vmem:[%s9673_s4 + $0x48] sm:$0xff] }
 0x1b2   :  { %v2006_v16 = vmax.f32 %v1848_v9, %v1914_v47  ;;  %v1917_v56 = vsel %vm122_vm0, %v1915_v61, %v1916_v0  ;;  %v7993_v17 = vmax.f32 %v1525_v4, %v1735_v10  ;;  %v8100_v61 = vld [vmem:[%s9674_s5 + $0x40] sm:$0xff]  ;;  %v8114_v10 = vld [vmem:[%s9673_s4 + $0x50] sm:$0xff] }
 0x1b3   :  { %v2007_v23 = vmax.f32 %v1849_v12, %v1917_v56  ;;  %v1918_v24 = vrot.slane %v7975_v8, 1  ;;  %v1529_v26 = vpop.f32.mrb[6].mxu0 }
 0x1b4   :  { %v2050_v6 = vadd.f32 %v7964_v63, %v2006_v16  ;;  %v1920_v27 = vrot.slane %v7993_v17, 1  ;;  %v1739_v28 = vpop.f32.mrb[6].mxu1  ;;  %v1531_v29 = vpop.f32.mrb[7].mxu0  ;;  %v8119_v16 = vld [vmem:[%s9673_s4 + $0x58] sm:$0xff] }
 0x1b5   :  { %v2051_v34 = vadd.f32 %v7973_v48, %v2007_v23  ;;  %v1919_v35 = vsel %vm122_vm0, %v1913_v59, %v1918_v24  ;;  %v8029_v37 = vmax.f32 %v1529_v26, %v1739_v28  ;;  %v1741_v39 = vpop.f32.mrb[7].mxu1 }
 0x1b6   :  { %6780 = vtanh.f32 %v2050_v6  ;;  %v2008_v43 = vmax.f32 %v1850_v53, %v1919_v35  ;;  %v1921_v54 = vsel %vm122_vm0, %v1916_v0, %v1920_v27  ;;  %v8049_v44 = vmax.f32 %v1531_v29, %v1741_v39  ;;  %v8079_v53 = vld [vmem:[%s9674_s5 + $0x38] sm:$0xff]  ;;  %v8105_v0 = vld [vmem:[%s9674_s5 + $0x48] sm:$0xff]  ;;  %v8144_v39 = vld [vmem:[%s9673_s4 + $0x60] sm:$0xff] }
 0x1b7   :  { %6782 = vtanh.f32 %v2051_v34  ;;  %v2009_v1 = vmax.f32 %v7962_v57, %v1921_v54  ;;  %v1922_v46 = vrot.slane %v8029_v37, 1  ;;  %v1535_v5 = vpop.f32.mrb[8].mxu0  ;;  %v8139_v35 = vld [vmem:[%s9674_s5 + $0x58] sm:$0xff] }
 0x1b8   :  { %v2052_v9 = vadd.f32 %v7964_v63, %v2008_v43  ;;  %v1924_v50 = vrot.slane %v8049_v44, 1  ;;  %v1745_v12 = vpop.f32.mrb[8].mxu1  ;;  %v1537_v51 = vpop.f32.mrb[9].mxu0 }
 0x1b9   :  { %v2053_v25 = vadd.f32 %v7973_v48, %v2009_v1  ;;  %v1923_v55 = vsel %vm122_vm0, %v1918_v24, %v1922_v46  ;;  %v8088_v57 = vmax.f32 %v1535_v5, %v1745_v12  ;;  %v1747_v58 = vpop.f32.mrb[9].mxu1  ;;  %v8155_v12 = vld [vmem:[%s9673_s4 + $0x68] sm:$0xff] }
 0x1ba   :  { %6784 = vtanh.f32 %v2052_v9  ;;  %v2010_v2 = vmax.f32 %v7975_v8, %v1923_v55  ;;  %v1925_v4 = vsel %vm122_vm0, %v1920_v27, %v1924_v50  ;;  %v8109_v47 = vmax.f32 %v1537_v51, %v1747_v58  ;;  %v8160_v51 = vld [vmem:[%s9674_s5 + $0x60] sm:$0xff] }
 0x1bb   :  { %6786 = vtanh.f32 %v2053_v25  ;;  %v2011_v56 = vmax.f32 %v7993_v17, %v1925_v4  ;;  %v1926_v23 = vrot.slane %v8088_v57, 1  ;;  %v1541_v8 = vpop.f32.mrb[10].mxu0  ;;  %v8134_v17 = vld [vmem:[%s9674_s5 + $0x50] sm:$0xff]  ;;  %v8179_v4 = vld [vmem:[%s9673_s4 + $0x78] sm:$0xff] }
 0x1bc   :  { %v2054_v26 = vadd.f32 %v7964_v63, %v2010_v2  ;;  %v1928_v6 = vrot.slane %v8109_v47, 1  ;;  %v1751_v27 = vpop.f32.mrb[10].mxu1  ;;  %v1543_v28 = vpop.f32.mrb[11].mxu0  ;;  %v8174_v2 = vld [vmem:[%s9673_s4 + $0x70] sm:$0xff] }
 0x1bd   :  { %v2055_v43 = vadd.f32 %v7973_v48, %v2011_v56  ;;  %v1927_v54 = vsel %vm122_vm0, %v1922_v46, %v1926_v23  ;;  %v8148_v1 = vmax.f32 %v1541_v8, %v1751_v27  ;;  %v1753_v5 = vpop.f32.mrb[11].mxu1  ;;  %v8165_v46 = vld [vmem:[%s9674_s5 + $0x68] sm:$0xff] }
 0x1be   :  { %6788 = vtanh.f32 %v2054_v26  ;;  %v2012_v25 = vmax.f32 %v8029_v37, %v1927_v54  ;;  %v1929_v55 = vsel %vm122_vm0, %v1924_v50, %v1928_v6  ;;  %v8169_v58 = vmax.f32 %v1543_v28, %v1753_v5 }
 0x1bf   :  { %6790 = vtanh.f32 %v2055_v43  ;;  %v2013_v56 = vmax.f32 %v8049_v44, %v1929_v55  ;;  %v1930_v8 = vrot.slane %v8148_v1, 1  ;;  %v1547_v37 = vpop.f32.mrb[12].mxu0  ;;  %v8196_v43 = vld [vmem:[%s9674_s5 + $0x70] sm:$0xff]  ;;  %v8201_v55 = vld [vmem:[%s9674_s5 + $0x78] sm:$0xff] }
 0x1c0   :  { %v8185_v26 = vpop.eup %6780  ;;  %v2056_v27 = vadd.f32 %v7964_v63, %v2012_v25  ;;  %v1932_v28 = vrot.slane %v8169_v58, 1  ;;  %v1757_v54 = vpop.f32.mrb[12].mxu1 }
 0x1c1   :  { %9700 = vst [vmem:[#allocation2_spill] sm:$0xff] %v8185_v26  ;;  %v1549_v5 = vpop.f32.mrb[13].mxu0  ;;  %v8203_v25 = vpop.eup %6782  ;;  %v2057_v50 = vadd.f32 %v7973_v48, %v2013_v56  ;;  %v1931_v9 = vsel %vm122_vm0, %v1926_v23, %v1930_v8  ;;  %v8207_v3 = vmax.f32 %v1547_v37, %v1757_v54 }
 0x1c2   :  { %9701 = vst [vmem:[#allocation3_spill] sm:$0xff] %v8203_v25  ;;  %v1759_v34 = vpop.f32.mrb[13].mxu1  ;;  %6792 = vtanh.f32 %v2056_v27  ;;  %v2014_v29 = vmax.f32 %v8088_v57, %v1931_v9  ;;  %v1933_v24 = vsel %vm122_vm0, %v1928_v6, %v1932_v28  ;;  %v2222_v6 = vrot.slane %v8203_v25, 1  ;;  %v8268_v25 = vld [vmem:[%s9674_s5 + $0x80] sm:$0xff] }
 0x1c3   :  { %v8213_v59 = vmax.f32 %v1549_v5, %v1759_v34  ;;  %6794 = vtanh.f32 %v2057_v50  ;;  %v2015_v52 = vmax.f32 %v8109_v47, %v1933_v24  ;;  %v1934_v56 = vrot.slane %v8207_v3, 1  ;;  %v1553_v15 = vpop.f32.mrb[14].mxu0 }
 0x1c4   :  { %v8219_v37 = vpop.eup %6784  ;;  %v2058_v54 = vadd.f32 %v7964_v63, %v2014_v29  ;;  %v1763_v57 = vpop.f32.mrb[14].mxu1  ;;  %v2219_v34 = vrot.slane %v8185_v26, 1  ;;  %v8235_v29 = vld [vmem:[%s9673_s4 + $0x80] sm:$0xff] }
 0x1c5   :  { %v1936_v27 = vrot.slane %v8213_v59, 1  ;;  %v1555_v9 = vpop.f32.mrb[15].mxu0  ;;  %v8225_v50 = vpop.eup %6786  ;;  %v2059_v47 = vadd.f32 %v7973_v48, %v2015_v52  ;;  %v1935_v24 = vsel %vm122_vm0, %v1930_v8, %v1934_v56  ;;  %v8229_v5 = vmax.f32 %v1553_v15, %v1763_v57  ;;  %9703 = vst [vmem:[#allocation5_spill] sm:$0xff] %v8235_v29 }
 0x1c6   :  { %9702 = vst [vmem:[#allocation4_spill] sm:$0xff] %v8225_v50  ;;  %v1765_v23 = vpop.f32.mrb[15].mxu1  ;;  %6796 = vtanh.f32 %v2058_v54  ;;  %v2016_v52 = vmax.f32 %v8148_v1, %v1935_v24  ;;  %v2223_v31 = vrot.slane %v8225_v50, 1 }
 0x1c7   :  { %v1937_v8 = vsel %vm122_vm0, %v1932_v28, %v1936_v27  ;;  %v8244_v15 = vmax.f32 %v1555_v9, %v1765_v23  ;;  %6798 = vtanh.f32 %v2059_v47  ;;  %v1938_v40 = vrot.slane %v8229_v5, 1  ;;  %v1559_v38 = vpop.f32.mrb[16].mxu0 }
 0x1c8   :  { %v2017_v57 = vmax.f32 %v8169_v58, %v1937_v8  ;;  %v8249_v30 = vpop.eup %6788  ;;  %v2060_v44 = vadd.f32 %v7964_v63, %v2016_v52  ;;  %v1769_v26 = vpop.f32.mrb[16].mxu1  ;;  %v9705_v28 = vrot.slane %v8219_v37, 1  ;;  %v2224_v50 = vsel %vm122_vm0, %v2222_v6, %v2223_v31 }
 0x1c9   :  { %9704 = vst [vmem:[#allocation6_spill] sm:$0xff] %v8249_v30  ;;  %v1940_v54 = vrot.slane %v8244_v15, 1  ;;  %v1561_v1 = vpop.f32.mrb[17].mxu0  ;;  %v8258_v9 = vpop.eup %6790  ;;  %v1939_v24 = vsel %vm122_vm0, %v1934_v56, %v1938_v40  ;;  %v8262_v8 = vmax.f32 %v1559_v38, %v1769_v26  ;;  %5060 = vmatprep.mubr.msk.f32.mxu0 %vm154_vm1, %v2224_v50  ;;  %5116 = vmatprep.mubr.msk.f32.mxu1 %vm154_vm1, %v2224_v50  ;;  %v2225_v50 = vrot.slane %v8249_v30, 1 }
 0x1ca   :  { %v2221_v23 = vsel %vm122_vm0, %v2219_v34, %v9705_v28  ;;  %9706 = vst [vmem:[#allocation7_spill] sm:$0xff] %v8258_v9  ;;  %v2061_v47 = vadd.f32 %v7973_v48, %v2017_v57  ;;  %v1771_v52 = vpop.f32.mrb[17].mxu1  ;;  %v8273_v34 = vld [vmem:[%s9674_s5 + $0x88] sm:$0xff]  ;;  %6800 = vtanh.f32 %v2060_v44  ;;  %v2018_v57 = vmax.f32 %v8207_v3, %v1939_v24 }
 0x1cb   :  { %v1941_v56 = vsel %vm122_vm0, %v1936_v27, %v1940_v54  ;;  %v8277_v38 = vmax.f32 %v1561_v1, %v1771_v52  ;;  %v1942_v6 = vrot.slane %v8262_v8, 1  ;;  %2394 = vmatmul.mubr.f32.vlgmr.msra.gmra.mrb[32].mxu0 %v2221_v23  ;;  %2741 = vmatmul.mubr.f32.vlgmr.msra.gmra.mrb[32].mxu1 %v2221_v23  ;;  %v1565_v28 = vpop.f32.mrb[18].mxu0  ;;  %v2227_v44 = vrot.slane %v8258_v9, 1 }
 0x1cc   :  { %6802 = vtanh.f32 %v2061_v47  ;;  %v2019_v26 = vmax.f32 %v8213_v59, %v1941_v56  ;;  %v8284_v58 = vpop.eup %6792  ;;  %v2062_v3 = vadd.f32 %v7964_v63, %v2018_v57  ;;  %v1775_v1 = vpop.f32.mrb[18].mxu1  ;;  %v9708_v59 = vpack.c.bf16 %v7980_v11, %v7970_v7 }
 0x1cd   :  { %9707 = vst [vmem:[#allocation8_spill] sm:$0xff] %v8284_v58  ;;  %v1944_v27 = vrot.slane %v8277_v38, 1  ;;  %v1567_v24 = vpop.f32.mrb[19].mxu0  ;;  %v9709_v23 = vpack.c.bf16 %v7990_v14, %v7985_v13  ;;  %v8297_v52 = vpop.eup %6794  ;;  %v1943_v56 = vsel %vm122_vm0, %v1938_v40, %v1942_v6  ;;  %v8301_v9 = vmax.f32 %v1565_v28, %v1775_v1 }
 0x1ce   :  { %5957 = vmatpush1.bf16.msra.mxu0 %v9708_v59  ;;  %v2063_v57 = vadd.f32 %v7973_v48, %v2019_v26  ;;  %v1777_v30 = vpop.f32.mrb[19].mxu1  ;;  %v2228_v29 = vsel %vm122_vm0, %v2223_v31, %v2227_v44  ;;  %v9710_v7 = vmov 0.0|0.0   ;;  %6804 = vtanh.f32 %v2062_v3 }
 0x1cf   :  { %6029 = vmatpush1.bf16.msra.mxu1 %v9709_v23  ;;  %5958 = vmatprep.subr.bf16.mxu0 %v9710_v7  ;;  %v2020_v11 = vmax.f32 %v8229_v5, %v1943_v56  ;;  %v1945_v13 = vsel %vm122_vm0, %v1940_v54, %v1944_v27  ;;  %v8307_v14 = vmax.f32 %v1567_v24, %v1777_v30  ;;  %v1946_v26 = vrot.slane %v8301_v9, 1  ;;  %v1571_v3 = vpop.f32.mrb[20].mxu0 }
 0x1d0   :  { %5061 = vmatprep.mubr.msk.f32.mxu0 %vm154_vm1, %v2228_v29  ;;  %5117 = vmatprep.mubr.msk.f32.mxu1 %vm154_vm1, %v2228_v29  ;;  %6806 = vtanh.f32 %v2063_v57  ;;  %v2021_v40 = vmax.f32 %v8244_v15, %v1945_v13  ;;  %v9711_v31 = vrot.slane %v8219_v37, 1  ;;  %v8317_v5 = vpop.eup %6796  ;;  %v1781_v29 = vpop.f32.mrb[20].mxu1  ;;  %v2231_v15 = vrot.slane %v8297_v52, 1 }
 0x1d1   :  { %6030 = vmatprep.subr.bf16.mxu1 %v9710_v7  ;;  %v2064_v30 = vadd.f32 %v7964_v63, %v2020_v11  ;;  %v1948_v54 = vrot.slane %v8307_v14, 1  ;;  %v1573_v1 = vpop.f32.mrb[21].mxu0  ;;  %v2229_v24 = vrot.slane %v8284_v58, 1  ;;  %v8323_v59 = vpop.eup %6798  ;;  %v1947_v57 = vsel %vm122_vm0, %v1942_v6, %v1946_v26 }
 0x1d2   :  { %v2226_v28 = vsel %vm122_vm0, %v9711_v31, %v2225_v50  ;;  %v2065_v23 = vadd.f32 %v7973_v48, %v2021_v40  ;;  %v8327_v56 = vmax.f32 %v1571_v3, %v1781_v29  ;;  %v1783_v13 = vpop.f32.mrb[21].mxu1  ;;  %v2233_v11 = vrot.slane %v8317_v5, 1 }
 0x1d3   :  { %2399 = vmatmul.mubr.f32.gmra.mrb[34].mxu0 %v2226_v28  ;;  %2746 = vmatmul.mubr.f32.gmra.mrb[34].mxu1 %v2226_v28  ;;  %v9712_v31 = vpack.c.bf16 %v8003_v20, %v7998_v19  ;;  %v9713_v28 = vpack.c.bf16 %v8020_v33, %v8015_v32  ;;  %6808 = vtanh.f32 %v2064_v30  ;;  %v2022_v47 = vmax.f32 %v8262_v8, %v1947_v57  ;;  %v1577_v32 = vpop.f32.mrb[22].mxu0 }
 0x1d4   :  { %v1949_v40 = vsel %vm122_vm0, %v1944_v27, %v1948_v54  ;;  %v8338_v58 = vmax.f32 %v1573_v1, %v1783_v13  ;;  %6810 = vtanh.f32 %v2065_v23  ;;  %v1950_v19 = vrot.slane %v8327_v56, 1  ;;  %v8345_v33 = vpop.eup %6800  ;;  %v1787_v30 = vpop.f32.mrb[22].mxu1 }
 0x1d5   :  { %5960 = vmatpush1.bf16.msra.mxu0 %v9712_v31  ;;  %6032 = vmatpush1.bf16.msra.mxu1 %v9713_v28  ;;  %v2023_v6 = vmax.f32 %v8277_v38, %v1949_v40  ;;  %v2232_v20 = vsel %vm122_vm0, %v2227_v44, %v2231_v15  ;;  %v2066_v8 = vadd.f32 %v7964_v63, %v2022_v47  ;;  %v1579_v29 = vpop.f32.mrb[23].mxu0  ;;  %v2235_v38 = vrot.slane %v8323_v59, 1  ;;  %v1789_v57 = vpop.f32.mrb[23].mxu1 }
 0x1d6   :  { %5961 = vmatprep.subr.bf16.mxu0 %v9710_v7  ;;  %6033 = vmatprep.subr.bf16.mxu1 %v9710_v7  ;;  %v1952_v27 = vrot.slane %v8338_v58, 1  ;;  %v2230_v3 = vsel %vm122_vm0, %v2225_v50, %v2229_v24  ;;  %v8353_v1 = vpop.eup %6802  ;;  %v1951_v23 = vsel %vm122_vm0, %v1946_v26, %v1950_v19  ;;  %v8357_v47 = vmax.f32 %v1577_v32, %v1787_v30 }
 0x1d7   :  { %5062 = vmatprep.mubr.msk.f32.mxu0 %vm154_vm1, %v2232_v20  ;;  %5118 = vmatprep.mubr.msk.f32.mxu1 %vm154_vm1, %v2232_v20  ;;  %v2067_v44 = vadd.f32 %v7973_v48, %v2023_v6  ;;  %v2237_v13 = vrot.slane %v8345_v33, 1  ;;  %6812 = vtanh.f32 %v2066_v8  ;;  %v2024_v50 = vmax.f32 %v8301_v9, %v1951_v23  ;;  %v1583_v9 = vpop.f32.mrb[24].mxu0 }
 0x1d8   :  { %2404 = vmatmul.mubr.f32.gmra.mrb[36].mxu0 %v2230_v3  ;;  %2751 = vmatmul.mubr.f32.gmra.mrb[36].mxu1 %v2230_v3  ;;  %v1953_v31 = vsel %vm122_vm0, %v1948_v54, %v1952_v27  ;;  %v8362_v28 = vmax.f32 %v1579_v29, %v1789_v57  ;;  %v9714_v40 = vpack.c.bf16 %v8036_v41, %v8025_v21  ;;  %v1954_v20 = vrot.slane %v8357_v47, 1  ;;  %v8375_v54 = vpop.eup %6804 }
 0x1d9   :  { %v9715_v26 = vpack.c.bf16 %v8046_v42, %v8041_v36  ;;  %6814 = vtanh.f32 %v2067_v44  ;;  %v2025_v6 = vmax.f32 %v8307_v14, %v1953_v31  ;;  %v2236_v32 = vsel %vm122_vm0, %v2231_v15, %v2235_v38  ;;  %v1793_v42 = vpop.f32.mrb[24].mxu1  ;;  %v1585_v14 = vpop.f32.mrb[25].mxu0 }
 0x1da   :  { %5963 = vmatpush1.bf16.msra.mxu0 %v9714_v40  ;;  %v2068_v21 = vadd.f32 %v7964_v63, %v2024_v50  ;;  %v1956_v41 = vrot.slane %v8362_v28, 1  ;;  %5063 = vmatprep.mubr.msk.f32.mxu0 %vm154_vm1, %v2236_v32  ;;  %v2234_v36 = vsel %vm122_vm0, %v2229_v24, %v2233_v11  ;;  %v2239_v15 = vrot.slane %v8353_v1, 1  ;;  %v8385_v8 = vpop.eup %6806  ;;  %v1795_v44 = vpop.f32.mrb[25].mxu1 }
 0x1db   :  { %6035 = vmatpush1.bf16.msra.mxu1 %v9715_v26  ;;  %5964 = vmatprep.subr.bf16.mxu0 %v9710_v7  ;;  %v2069_v3 = vadd.f32 %v7973_v48, %v2025_v6  ;;  %v1955_v30 = vsel %vm122_vm0, %v1950_v19, %v1954_v20  ;;  %v8389_v29 = vmax.f32 %v1583_v9, %v1793_v42  ;;  %v2241_v23 = vrot.slane %v8375_v54, 1 }
 0x1dc   :  { %6036 = vmatprep.subr.bf16.mxu1 %v9710_v7  ;;  %5119 = vmatprep.mubr.msk.f32.mxu1 %vm154_vm1, %v2236_v32  ;;  %6816 = vtanh.f32 %v2068_v21  ;;  %v2026_v24 = vmax.f32 %v8327_v56, %v1955_v30  ;;  %v1957_v57 = vsel %vm122_vm0, %v1952_v27, %v1956_v41  ;;  %v8394_v50 = vmax.f32 %v1585_v14, %v1795_v44  ;;  %v1589_v56 = vpop.f32.mrb[26].mxu0 }
 0x1dd   :  { %2409 = vmatmul.mubr.f32.gmra.mrb[38].mxu0 %v2234_v36  ;;  %2756 = vmatmul.mubr.f32.gmra.mrb[38].mxu1 %v2234_v36  ;;  %v9716_v31 = vpack.c.bf16 %v8059_v45, %v8054_v62  ;;  %v9717_v19 = vpack.c.bf16 %v8079_v53, %v8074_v18  ;;  %6818 = vtanh.f32 %v2069_v3  ;;  %v2027_v40 = vmax.f32 %v8338_v58, %v1957_v57  ;;  %v8407_v27 = vpop.eup %6808  ;;  %v1799_v53 = vpop.f32.mrb[26].mxu1 }
 0x1de   :  { %v1958_v26 = vrot.slane %v8389_v29, 1  ;;  %v2240_v6 = vsel %vm122_vm0, %v2235_v38, %v2239_v15  ;;  %v2070_v62 = vadd.f32 %v7964_v63, %v2026_v24  ;;  %v1960_v45 = vrot.slane %v8394_v50, 1  ;;  %v1591_v58 = vpop.f32.mrb[27].mxu0  ;;  %v8419_v32 = vpop.eup %6810 }
 0x1df   :  { %5966 = vmatpush1.bf16.msra.mxu0 %v9716_v31  ;;  %6038 = vmatpush1.bf16.msra.mxu1 %v9717_v19  ;;  %v2238_v18 = vsel %vm122_vm0, %v2233_v11, %v2237_v13  ;;  %v2243_v38 = vrot.slane %v8385_v8, 1  ;;  %v2071_v9 = vadd.f32 %v7973_v48, %v2027_v40  ;;  %v8423_v36 = vmax.f32 %v1589_v56, %v1799_v53  ;;  %v1801_v42 = vpop.f32.mrb[27].mxu1 }
 0x1e0   :  { %5967 = vmatprep.subr.bf16.mxu0 %v9710_v7  ;;  %6039 = vmatprep.subr.bf16.mxu1 %v9710_v7  ;;  %v1959_v21 = vsel %vm122_vm0, %v1954_v20, %v1958_v26  ;;  %v2245_v14 = vrot.slane %v8407_v27, 1  ;;  %6820 = vtanh.f32 %v2070_v62  ;;  %v1961_v3 = vsel %vm122_vm0, %v1956_v41, %v1960_v45 }
 0x1e1   :  { %5064 = vmatprep.mubr.msk.f32.mxu0 %vm154_vm1, %v2240_v6  ;;  %5120 = vmatprep.mubr.msk.f32.mxu1 %vm154_vm1, %v2240_v6  ;;  %v2028_v11 = vmax.f32 %v8357_v47, %v1959_v21  ;;  %v8428_v30 = vmax.f32 %v1591_v58, %v1801_v42  ;;  %v9718_v44 = vpack.c.bf16 %v8095_v60, %v8084_v22  ;;  %6822 = vtanh.f32 %v2071_v9  ;;  %v1595_v47 = vpop.f32.mrb[28].mxu0  ;;  %v8441_v41 = vpop.eup %6812 }
 0x1e2   :  { %2414 = vmatmul.mubr.f32.gmra.mrb[40].mxu0 %v2238_v18  ;;  %2761 = vmatmul.mubr.f32.gmra.mrb[40].mxu1 %v2238_v18  ;;  %v9719_v20 = vpack.c.bf16 %v8105_v0, %v8100_v61  ;;  %v2029_v24 = vmax.f32 %v8362_v28, %v1961_v3  ;;  %v1962_v57 = vrot.slane %v8423_v36, 1  ;;  %v2244_v31 = vsel %vm122_vm0, %v2239_v15, %v2243_v38  ;;  %v1805_v0 = vpop.f32.mrb[28].mxu1  ;;  %v1597_v28 = vpop.f32.mrb[29].mxu0 }
 0x1e3   :  { %5969 = vmatpush1.bf16.msra.mxu0 %v9718_v44  ;;  %v2072_v22 = vadd.f32 %v7964_v63, %v2028_v11  ;;  %v1964_v60 = vrot.slane %v8428_v30, 1  ;;  %5065 = vmatprep.mubr.msk.f32.mxu0 %vm154_vm1, %v2244_v31  ;;  %v2242_v61 = vsel %vm122_vm0, %v2237_v13, %v2241_v23  ;;  %v2247_v15 = vrot.slane %v8419_v32, 1  ;;  %v8453_v19 = vpop.eup %6814  ;;  %v1807_v62 = vpop.f32.mrb[29].mxu1 }
 0x1e4   :  { %6041 = vmatpush1.bf16.msra.mxu1 %v9719_v20  ;;  %5970 = vmatprep.subr.bf16.mxu0 %v9710_v7  ;;  %v2073_v40 = vadd.f32 %v7973_v48, %v2029_v24  ;;  %v1963_v6 = vsel %vm122_vm0, %v1958_v26, %v1962_v57  ;;  %v8457_v56 = vmax.f32 %v1595_v47, %v1805_v0  ;;  %v2249_v18 = vrot.slane %v8441_v41, 1 }
 0x1e5   :  { %6042 = vmatprep.subr.bf16.mxu1 %v9710_v7  ;;  %5121 = vmatprep.mubr.msk.f32.mxu1 %vm154_vm1, %v2244_v31  ;;  %6824 = vtanh.f32 %v2072_v22  ;;  %v2030_v13 = vmax.f32 %v8389_v29, %v1963_v6  ;;  %v1965_v53 = vsel %vm122_vm0, %v1960_v45, %v1964_v60  ;;  %v8462_v58 = vmax.f32 %v1597_v28, %v1807_v62  ;;  %v1601_v29 = vpop.f32.mrb[30].mxu0 }
 0x1e6   :  { %2419 = vmatmul.mubr.f32.gmra.mrb[42].mxu0 %v2242_v61  ;;  %2766 = vmatmul.mubr.f32.gmra.mrb[42].mxu1 %v2242_v61  ;;  %v9720_v9 = vpack.c.bf16 %v8119_v16, %v8114_v10  ;;  %v9721_v26 = vpack.c.bf16 %v8139_v35, %v8134_v17  ;;  %6826 = vtanh.f32 %v2073_v40  ;;  %v2031_v21 = vmax.f32 %v8394_v50, %v1965_v53  ;;  %v8475_v45 = vpop.eup %6816  ;;  %v1811_v35 = vpop.f32.mrb[30].mxu1 }
 0x1e7   :  { %v1966_v42 = vrot.slane %v8457_v56, 1  ;;  %v2248_v11 = vsel %vm122_vm0, %v2243_v38, %v2247_v15  ;;  %v2074_v10 = vadd.f32 %v7964_v63, %v2030_v13  ;;  %v1968_v16 = vrot.slane %v8462_v58, 1  ;;  %v1603_v50 = vpop.f32.mrb[31].mxu0  ;;  %v8487_v3 = vpop.eup %6818 }
 0x1e8   :  { %5972 = vmatpush1.bf16.msra.mxu0 %v9720_v9  ;;  %6044 = vmatpush1.bf16.msra.mxu1 %v9721_v26  ;;  %v2246_v17 = vsel %vm122_vm0, %v2241_v23, %v2245_v14  ;;  %v2251_v38 = vrot.slane %v8453_v19, 1  ;;  %v2075_v44 = vadd.f32 %v7973_v48, %v2031_v21  ;;  %v1878_v24 = vmax.f32 %v1601_v29, %v1811_v35  ;;  %v1813_v31 = vpop.f32.mrb[31].mxu1  ;;  %v2133_v29 = vld [vmem:[%s9673_s4 + $0x98] sm:$0xff] }
 0x1e9   :  { %5973 = vmatprep.subr.bf16.mxu0 %v9710_v7  ;;  %6045 = vmatprep.subr.bf16.mxu1 %v9710_v7  ;;  %v1967_v20 = vsel %vm122_vm0, %v1962_v57, %v1966_v42  ;;  %v2253_v47 = vrot.slane %v8475_v45, 1  ;;  %6828 = vtanh.f32 %v2074_v10  ;;  %v1969_v23 = vsel %vm122_vm0, %v1964_v60, %v1968_v16  ;;  %v2156_v10 = vld [vmem:[%s9674_s5 + $0x90] sm:$0xff] }
 0x1ea   :  { %5066 = vmatprep.mubr.msk.f32.mxu0 %vm154_vm1, %v2248_v11  ;;  %5122 = vmatprep.mubr.msk.f32.mxu1 %vm154_vm1, %v2248_v11  ;;  %v2032_v22 = vmax.f32 %v8423_v36, %v1967_v20  ;;  %v1879_v61 = vmax.f32 %v1603_v50, %v1813_v31  ;;  %v9722_v0 = vpack.c.bf16 %v8155_v12, %v8144_v39  ;;  %6830 = vtanh.f32 %v2075_v44  ;;  %v8504_v36 = vpop.eup %6820 }
 0x1eb   :  { %2424 = vmatmul.mubr.f32.gmra.mrb[44].mxu0 %v2246_v17  ;;  %2771 = vmatmul.mubr.f32.gmra.mrb[44].mxu1 %v2246_v17  ;;  %v9723_v28 = vpack.c.bf16 %v8165_v46, %v8160_v51  ;;  %v2033_v57 = vmax.f32 %v8428_v30, %v1969_v23  ;;  %v1970_v40 = vrot.slane %v1878_v24, 1  ;;  %v2252_v6 = vsel %vm122_vm0, %v2247_v15, %v2251_v38  ;;  %v8515_v46 = vpop.eup %6822 }
 0x1ec   :  { %5975 = vmatpush1.bf16.msra.mxu0 %v9722_v0  ;;  %v2076_v60 = vadd.f32 %v7964_v63, %v2032_v22  ;;  %v1972_v39 = vrot.slane %v1879_v61, 1  ;;  %5067 = vmatprep.mubr.msk.f32.mxu0 %vm154_vm1, %v2252_v6  ;;  %v2250_v12 = vsel %vm122_vm0, %v2245_v14, %v2249_v18  ;;  %v2255_v51 = vrot.slane %v8487_v3, 1  ;;  %v2134_v22 = vld [vmem:[%s9673_s4 + $0xa0] sm:$0xff] }
 0x1ed   :  { %6047 = vmatpush1.bf16.msra.mxu1 %v9723_v28  ;;  %5976 = vmatprep.subr.bf16.mxu0 %v9710_v7  ;;  %v2077_v30 = vadd.f32 %v7973_v48, %v2033_v57  ;;  %v1971_v15 = vsel %vm122_vm0, %v1966_v42, %v1970_v40  ;;  %v2036_v62 = vmax.f32 %v1878_v24, %v1970_v40  ;;  %v2257_v11 = vrot.slane %v8504_v36, 1 }
 0x1ee   :  { %6048 = vmatprep.subr.bf16.mxu1 %v9710_v7  ;;  %5123 = vmatprep.mubr.msk.f32.mxu1 %vm154_vm1, %v2252_v6  ;;  %6832 = vtanh.f32 %v2076_v60  ;;  %v2034_v13 = vmax.f32 %v8457_v56, %v1971_v15  ;;  %v1973_v53 = vsel %vm122_vm0, %v1968_v16, %v1972_v39  ;;  %v2037_v9 = vmax.f32 %v1879_v61, %v1972_v39  ;;  %v2157_v16 = vld [vmem:[%s9674_s5 + $0x98] sm:$0xff]  ;;  %v2158_v61 = vld [vmem:[%s9674_s5 + $0xa0] sm:$0xff]  ;;  %v2136_v6 = vld [vmem:[%s9673_s4 + $0xb0] sm:$0xff] }
 0x1ef   :  { %2429 = vmatmul.mubr.f32.gmra.mrb[46].mxu0 %v2250_v12  ;;  %2776 = vmatmul.mubr.f32.gmra.mrb[46].mxu1 %v2250_v12  ;;  %v9724_v14 = vpack.c.bf16 %v8179_v4, %v8174_v2  ;;  %v9725_v26 = vpack.c.bf16 %v8201_v55, %v8196_v43  ;;  %6834 = vtanh.f32 %v2077_v30  ;;  %v2035_v21 = vmax.f32 %v8462_v58, %v1973_v53  ;;  %v2132_v2 = vld [vmem:[%s9673_s4 + $0x90] sm:$0xff]  ;;  %v8535_v4 = vpop.eup %6824  ;;  %v2137_v30 = vld [vmem:[%s9673_s4 + $0xb8] sm:$0xff] }
 0x1f0   :  { %v2256_v42 = vsel %vm122_vm0, %v2251_v38, %v2255_v51  ;;  %v2078_v43 = vadd.f32 %v7964_v63, %v2034_v13  ;;  %v2081_v55 = vadd.f32 %v7973_v48, %v2037_v9  ;;  %v2254_v56 = vsel %vm122_vm0, %v2249_v18, %v2253_v47  ;;  %v8556_v17 = vpop.eup %6826  ;;  %v9726_v38 = vld [vmem:[#allocation5_spill] sm:$0xff]  ;;  %v2160_v15 = vld [vmem:[%s9674_s5 + $0xb0] sm:$0xff] }
 0x1f1   :  { %5978 = vmatpush1.bf16.msra.mxu0 %v9724_v14  ;;  %6050 = vmatpush1.bf16.msra.mxu1 %v9725_v26  ;;  %v2259_v58 = vrot.slane %v8515_v46, 1  ;;  %v2079_v35 = vadd.f32 %v7973_v48, %v2035_v21  ;;  %v2263_v50 = vrot.slane %v8556_v17, 1  ;;  %v9727_v44 = vpack.c.bf16 %v8240_v49, %v9726_v38 }
 0x1f2   :  { %5979 = vmatprep.subr.bf16.mxu0 %v9710_v7  ;;  %6051 = vmatprep.subr.bf16.mxu1 %v9710_v7  ;;  %6836 = vtanh.f32 %v2078_v43  ;;  %v9728_v20 = vpack.c.bf16 %v8273_v34, %v8268_v25  ;;  %v2080_v24 = vadd.f32 %v7964_v63, %v2036_v62  ;;  %v5983_v48 = vpack.c.bf16 %v2133_v29, %v2132_v2  ;;  %v2135_v34 = vld [vmem:[%s9673_s4 + $0xa8] sm:$0xff]  ;;  %v2161_v62 = vld [vmem:[%s9674_s5 + $0xb8] sm:$0xff] }
 0x1f3   :  { %5068 = vmatprep.mubr.msk.f32.mxu0 %vm154_vm1, %v2256_v42  ;;  %5124 = vmatprep.mubr.msk.f32.mxu1 %vm154_vm1, %v2256_v42  ;;  %v2260_v18 = vsel %vm122_vm0, %v2255_v51, %v2259_v58  ;;  %6838 = vtanh.f32 %v2079_v35  ;;  %v6055_v31 = vpack.c.bf16 %v2157_v16, %v2156_v10  ;;  %v8573_v23 = vpop.eup %6828  ;;  %v2258_v49 = vsel %vm122_vm0, %v2253_v47, %v2257_v11  ;;  %v2159_v47 = vld [vmem:[%s9674_s5 + $0xa8] sm:$0xff] }
 0x1f4   :  { %2434 = vmatmul.mubr.f32.gmra.mrb[48].mxu0 %v2254_v56  ;;  %2781 = vmatmul.mubr.f32.gmra.mrb[48].mxu1 %v2254_v56  ;;  %6840 = vtanh.f32 %v2081_v55  ;;  %v2264_v63 = vsel %vm122_vm0, %v2259_v58, %v2263_v50  ;;  %v2261_v25 = vrot.slane %v8535_v4, 1  ;;  %v8591_v0 = vpop.eup %6830  ;;  %v5986_v57 = vpack.c.bf16 %v2135_v34, %v2134_v22  ;;  %v5190_v34 = vld [vmem:[%s9674_s5 + $0x190] sm:$0xff] }
 0x1f5   :  { %5981 = vmatpush1.bf16.msra.mxu0 %v9727_v44  ;;  %6053 = vmatpush1.bf16.msra.mxu1 %v9728_v20  ;;  %v2267_v28 = vrot.slane %v8591_v0, 1  ;;  %6842 = vtanh.f32 %v2080_v24  ;;  %v6058_v40 = vpack.c.bf16 %v2159_v47, %v2158_v61  ;;  %v2265_v51 = vrot.slane %v8573_v23, 1  ;;  %v5148_v44 = vld [vmem:[%s9673_s4 + $0x180] sm:$0xff]  ;;  %v5149_v20 = vld [vmem:[%s9673_s4 + $0x188] sm:$0xff]  ;;  %v5191_v61 = vld [vmem:[%s9674_s5 + $0x198] sm:$0xff] }
 0x1f6   :  { %5069 = vmatprep.mubr.msk.f32.mxu0 %vm154_vm1, %v2260_v18  ;;  %5125 = vmatprep.mubr.msk.f32.mxu1 %vm154_vm1, %v2260_v18  ;;  %v2262_v39 = vsel %vm122_vm0, %v2257_v11, %v2261_v25  ;;  %v5989_v9 = vpack.c.bf16 %v2137_v30, %v2136_v6  ;;  %v6061_v14 = vpack.c.bf16 %v2161_v62, %v2160_v15  ;;  %v5188_v24 = vld [vmem:[%s9674_s5 + $0x180] sm:$0xff]  ;;  %v9732_v30 = vld [vmem:[#allocation7_spill] sm:$0xff] }
 0x1f7   :  { %5982 = vmatprep.subr.bf16.mxu0 %v9710_v7  ;;  %6054 = vmatprep.subr.bf16.mxu1 %v9710_v7  ;;  %v2268_v12 = vsel %vm122_vm0, %v2263_v50, %v2267_v28  ;;  %v2266_v21 = vsel %vm122_vm0, %v2261_v25, %v2265_v51  ;;  %v6064_v22 = vpack.c.bf16 %v5149_v20, %v5148_v44  ;;  %v5151_v25 = vld [vmem:[%s9673_s4 + $0x198] sm:$0xff]  ;;  %v9730_v47 = vld [vmem:[#allocation2_spill] sm:$0xff]  ;;  %v5198_v20 = vld [vmem:[%s9674_s5 + $0x1d0] sm:$0xff] }
 0x1f8   :  { %2439 = vmatmul.mubr.f32.gmra.mrb[50].mxu0 %v2258_v49  ;;  %2786 = vmatmul.mubr.f32.gmra.mrb[50].mxu1 %v2258_v49  ;;  %v8599_v60 = vpop.eup %6832  ;;  %v5152_v6 = vld [vmem:[%s9673_s4 + $0x1a0] sm:$0xff]  ;;  %v5159_v44 = vld [vmem:[%s9673_s4 + $0x1d8] sm:$0xff] }
 0x1f9   :  { %5070 = vmatprep.mubr.msk.f32.mxu0 %vm154_vm1, %v2264_v63  ;;  %5126 = vmatprep.mubr.msk.f32.mxu1 %vm154_vm1, %v2264_v63  ;;  %v8615_v13 = vpop.eup %6834  ;;  %v2269_v11 = vrot.slane %v8599_v60, 1  ;;  %v5150_v63 = vld [vmem:[%s9673_s4 + $0x190] sm:$0xff] }
 0x1fa   :  { %5984 = vmatpush1.bf16.msra.mxu0 %v5983_v48  ;;  %6056 = vmatpush1.bf16.msra.mxu1 %v6055_v31  ;;  %v2271_v53 = vrot.slane %v8615_v13, 1  ;;  %v5189_v48 = vld [vmem:[%s9674_s5 + $0x188] sm:$0xff] }
 0x1fb   :  { %5985 = vmatprep.subr.bf16.mxu0 %v9710_v7  ;;  %6057 = vmatprep.subr.bf16.mxu1 %v9710_v7  ;;  %v2270_v56 = vsel %vm122_vm0, %v2265_v51, %v2269_v11  ;;  %v9729_v31 = vld [vmem:[#allocation3_spill] sm:$0xff]  ;;  %v6100_v49 = vpack.c.bf16 %v5189_v48, %v5188_v24  ;;  %v5199_v24 = vld [vmem:[%s9674_s5 + $0x1d8] sm:$0xff] }
 0x1fc   :  { %2444 = vmatmul.mubr.f32.gmra.mrb[52].mxu0 %v2262_v39  ;;  %2791 = vmatmul.mubr.f32.gmra.mrb[52].mxu1 %v2262_v39  ;;  %v8620_v26 = vpop.eup %6836  ;;  %v2272_v42 = vsel %vm122_vm0, %v2267_v28, %v2271_v53  ;;  %v9731_v28 = vld [vmem:[#allocation4_spill] sm:$0xff]  ;;  %v5153_v39 = vld [vmem:[%s9673_s4 + $0x1a8] sm:$0xff] }
 0x1fd   :  { %5071 = vmatprep.mubr.msk.f32.mxu0 %vm154_vm1, %v2268_v12  ;;  %5127 = vmatprep.mubr.msk.f32.mxu1 %vm154_vm1, %v2268_v12  ;;  %v8627_v2 = vpop.eup %6838  ;;  %v2273_v29 = vrot.slane %v8620_v26, 1  ;;  %v5192_v12 = vld [vmem:[%s9674_s5 + $0x1a0] sm:$0xff]  ;;  %v5193_v51 = vld [vmem:[%s9674_s5 + $0x1a8] sm:$0xff]  ;;  %v6070_v15 = vpack.c.bf16 %v5153_v39, %v5152_v6  ;;  %v5163_v6 = vld [vmem:[%s9673_s4 + $0x1f8] sm:$0xff] }
 0x1fe   :  { %5987 = vmatpush1.bf16.msra.mxu0 %v5986_v57  ;;  %6059 = vmatpush1.bf16.msra.mxu1 %v6058_v40  ;;  %v8629_v43 = vpop.eup %6840  ;;  %v2275_v55 = vrot.slane %v8627_v2, 1  ;;  %v6067_v57 = vpack.c.bf16 %v5151_v25, %v5150_v63  ;;  %v6103_v40 = vpack.c.bf16 %v5191_v61, %v5190_v34  ;;  %v6106_v62 = vpack.c.bf16 %v5193_v51, %v5192_v12  ;;  %v5161_v63 = vld [vmem:[%s9673_s4 + $0x1e8] sm:$0xff]  ;;  %v5200_v25 = vld [vmem:[%s9674_s5 + $0x1e0] sm:$0xff]  ;;  %v5202_v39 = vld [vmem:[%s9674_s5 + $0x1f0] sm:$0xff] }
 0x1ff   :  { %5988 = vmatprep.subr.bf16.mxu0 %v9710_v7  ;;  %6060 = vmatprep.subr.bf16.mxu1 %v9710_v7  ;;  %v8639_v10 = vpop.eup %6842  ;;  %v2279_v16 = vrot.slane %v8629_v43, 1  ;;  %v2274_v35 = vsel %vm122_vm0, %v2269_v11, %v2273_v29  ;;  %v5201_v34 = vld [vmem:[%s9674_s5 + $0x1e8] sm:$0xff]  ;;  %v5203_v12 = vld [vmem:[%s9674_s5 + $0x1f8] sm:$0xff] }
 0x200   :  { %2449 = vmatmul.mubr.f32.gmra.mrb[54].mxu0 %v2266_v21  ;;  %2796 = vmatmul.mubr.f32.gmra.mrb[54].mxu1 %v2266_v21  ;;  %v2276_v58 = vsel %vm122_vm0, %v2271_v53, %v2275_v55  ;;  %v2277_v18 = vrot.slane %v8639_v10, 1  ;;  %v5154_v53 = vld [vmem:[%s9673_s4 + $0x1b0] sm:$0xff]  ;;  %v5195_v21 = vld [vmem:[%s9674_s5 + $0x1b8] sm:$0xff] }
 0x201   :  { %5072 = vmatprep.mubr.msk.f32.mxu0 %vm154_vm1, %v2272_v42  ;;  %5128 = vmatprep.mubr.msk.f32.mxu1 %vm154_vm1, %v2272_v42  ;;  %v2280_v50 = vsel %vm122_vm0, %v2275_v55, %v2279_v16  ;;  %v9733_v42 = vld [vmem:[#allocation6_spill] sm:$0xff] }
 0x202   :  { %5990 = vmatpush1.bf16.msra.mxu0 %v5989_v9  ;;  %6062 = vmatpush1.bf16.msra.mxu1 %v6061_v14  ;;  %v2278_v38 = vsel %vm122_vm0, %v2273_v29, %v2277_v18  ;;  %v5155_v9 = vld [vmem:[%s9673_s4 + $0x1b8] sm:$0xff]  ;;  %v5194_v14 = vld [vmem:[%s9674_s5 + $0x1b0] sm:$0xff]  ;;  %v5196_v29 = vld [vmem:[%s9674_s5 + $0x1c0] sm:$0xff] }
 0x203   :  { %6063 = vmatprep.subr.bf16.mxu0 %v9710_v7  ;;  %6099 = vmatprep.subr.bf16.mxu1 %v9710_v7  ;;  %v6073_v11 = vpack.c.bf16 %v5155_v9, %v5154_v53  ;;  %v6109_v55 = vpack.c.bf16 %v5195_v21, %v5194_v14  ;;  %v5165_v53 = vld [vmem:[%s9673_s4 + $0x208] sm:$0xff]  ;;  %v5204_v9 = vld [vmem:[%s9674_s5 + $0x200] sm:$0xff] }
 0x204   :  { %2454 = vmatmul.mubr.f32.gmra.mrb[56].mxu0 %v2270_v56  ;;  %2801 = vmatmul.mubr.f32.gmra.mrb[56].mxu1 %v2270_v56  ;;  %v5156_v56 = vld [vmem:[%s9673_s4 + $0x1c0] sm:$0xff]  ;;  %v5205_v14 = vld [vmem:[%s9674_s5 + $0x208] sm:$0xff] }
 0x205   :  { %5073 = vmatprep.mubr.msk.f32.mxu0 %vm154_vm1, %v2276_v58  ;;  %5129 = vmatprep.mubr.msk.f32.mxu1 %vm154_vm1, %v2276_v58  ;;  %v5157_v58 = vld [vmem:[%s9673_s4 + $0x1c8] sm:$0xff] }
 0x208   :  { %2459 = vmatmul.mubr.f32.gmra.mrb[58].mxu0 %v2274_v35  ;;  %2806 = vmatmul.mubr.f32.gmra.mrb[58].mxu1 %v2274_v35  ;;  %v9734_v35 = vld [vmem:[#allocation8_spill] sm:$0xff] }
 0x209   :  { %5074 = vmatprep.mubr.msk.f32.mxu0 %vm154_vm1, %v2280_v50  ;;  %5130 = vmatprep.mubr.msk.f32.mxu1 %vm154_vm1, %v2280_v50 }
 0x20c   :  { %2464 = vmatmul.mubr.f32.gmra.mrb[60].mxu0 %v2278_v38  ;;  %2811 = vmatmul.mubr.f32.gmra.mrb[60].mxu1 %v2278_v38  ;;  %v5158_v38 = vld [vmem:[%s9673_s4 + $0x1d0] sm:$0xff] }
 0x20d   :  { %5075 = vmatprep.mubr.msk.f32.mxu0 %vm154_vm1, %v2279_v16  ;;  %5131 = vmatprep.mubr.msk.f32.mxu1 %vm154_vm1, %v2279_v16  ;;  %v5197_v16 = vld [vmem:[%s9674_s5 + $0x1c8] sm:$0xff]  ;;  %v6079_v48 = vpack.c.bf16 %v5159_v44, %v5158_v38  ;;  %v5208_v44 = vld [vmem:[%s9674_s5 + $0x220] sm:$0xff] }
 0x20e   :  { %v6112_v50 = vpack.c.bf16 %v5197_v16, %v5196_v29  ;;  %v5207_v29 = vld [vmem:[%s9674_s5 + $0x218] sm:$0xff]  ;;  %v5169_v38 = vld [vmem:[%s9673_s4 + $0x228] sm:$0xff] }
 0x210   :  { %2469 = vmatmul.mubr.f32.gmra.mrb[62].mxu0 %v2277_v18  ;;  %2816 = vmatmul.mubr.f32.gmra.mrb[62].mxu1 %v2277_v18  ;;  %v6076_v18 = vpack.c.bf16 %v5157_v58, %v5156_v56  ;;  %v5167_v56 = vld [vmem:[%s9673_s4 + $0x218] sm:$0xff]  ;;  %v5206_v58 = vld [vmem:[%s9674_s5 + $0x210] sm:$0xff] }
 0x211   :  { %5076 = vmatprep.mubr.msk.f32.mxu0 %vm154_vm1, %v9729_v31  ;;  %5132 = vmatprep.mubr.msk.f32.mxu1 %vm154_vm1, %v9729_v31 }
 0x214   :  { %2571 = vmatmul.mubr.f32.vlgmr.msra.gmra.mrb[32].mxu0 %v9730_v47  ;;  %2886 = vmatmul.mubr.f32.vlgmr.msra.gmra.mrb[32].mxu1 %v9730_v47 }
 0x215   :  { %5077 = vmatprep.mubr.msk.f32.mxu0 %vm154_vm1, %v9731_v28  ;;  %5133 = vmatprep.mubr.msk.f32.mxu1 %vm154_vm1, %v9731_v28 }
 0x216   :  { %6065 = vmatpush1.bf16.msra.mxu0 %v6064_v22  ;;  %6101 = vmatpush1.bf16.msra.mxu1 %v6100_v49  ;;  %v6115_v22 = vpack.c.bf16 %v5199_v24, %v5198_v20  ;;  %v5160_v49 = vld [vmem:[%s9673_s4 + $0x1e0] sm:$0xff]  ;;  %v5209_v20 = vld [vmem:[%s9674_s5 + $0x228] sm:$0xff] }
 0x217   :  { %6066 = vmatprep.subr.bf16.mxu0 %v9710_v7  ;;  %6102 = vmatprep.subr.bf16.mxu1 %v9710_v7  ;;  %v6082_v61 = vpack.c.bf16 %v5161_v63, %v5160_v49  ;;  %v5171_v49 = vld [vmem:[%s9673_s4 + $0x238] sm:$0xff]  ;;  %v5210_v63 = vld [vmem:[%s9674_s5 + $0x230] sm:$0xff] }
 0x218   :  { %2576 = vmatmul.mubr.f32.gmra.mrb[34].mxu0 %v8219_v37  ;;  %2891 = vmatmul.mubr.f32.gmra.mrb[34].mxu1 %v8219_v37 }
 0x219   :  { %5078 = vmatprep.mubr.msk.f32.mxu0 %vm154_vm1, %v9732_v30  ;;  %5134 = vmatprep.mubr.msk.f32.mxu1 %vm154_vm1, %v9732_v30 }
 0x21a   :  { %6068 = vmatpush1.bf16.msra.mxu0 %v6067_v57  ;;  %6104 = vmatpush1.bf16.msra.mxu1 %v6103_v40  ;;  %v6118_v57 = vpack.c.bf16 %v5201_v34, %v5200_v25  ;;  %v5162_v40 = vld [vmem:[%s9673_s4 + $0x1f0] sm:$0xff]  ;;  %v5211_v25 = vld [vmem:[%s9674_s5 + $0x238] sm:$0xff] }
 0x21b   :  { %6069 = vmatprep.subr.bf16.mxu0 %v9710_v7  ;;  %6105 = vmatprep.subr.bf16.mxu1 %v9710_v7  ;;  %v6085_v51 = vpack.c.bf16 %v5163_v6, %v5162_v40  ;;  %v2994_v40 = vrot.slane %v9729_v31, 2  ;;  %v5228_v6 = vld [vmem:[%s9673_s4 + $0x240] sm:$0xff] }
 0x21c   :  { %2581 = vmatmul.mubr.f32.gmra.mrb[36].mxu0 %v9733_v42  ;;  %2896 = vmatmul.mubr.f32.gmra.mrb[36].mxu1 %v9733_v42 }
 0x21d   :  { %5079 = vmatprep.mubr.msk.f32.mxu0 %vm154_vm1, %v8297_v52  ;;  %5135 = vmatprep.mubr.msk.f32.mxu1 %vm154_vm1, %v8297_v52 }
 0x21e   :  { %6071 = vmatpush1.bf16.msra.mxu0 %v6070_v15  ;;  %6107 = vmatpush1.bf16.msra.mxu1 %v6106_v62  ;;  %v6121_v15 = vpack.c.bf16 %v5203_v12, %v5202_v39  ;;  %v5164_v62 = vld [vmem:[%s9673_s4 + $0x200] sm:$0xff]  ;;  %v2992_v39 = vrot.slane %v8219_v37, 2  ;;  %v5229_v12 = vld [vmem:[%s9673_s4 + $0x248] sm:$0xff] }
 0x21f   :  { %6072 = vmatprep.subr.bf16.mxu0 %v9710_v7  ;;  %6108 = vmatprep.subr.bf16.mxu1 %v9710_v7  ;;  %v6088_v21 = vpack.c.bf16 %v5165_v53, %v5164_v62  ;;  %v2999_v53 = vrot.slane %v9732_v30, 2 }
 0x220   :  { %2586 = vmatmul.mubr.f32.gmra.mrb[38].mxu0 %v9734_v35  ;;  %2901 = vmatmul.mubr.f32.gmra.mrb[38].mxu1 %v9734_v35 }
 0x221   :  { %5080 = vmatprep.mubr.msk.f32.mxu0 %vm154_vm1, %v8323_v59  ;;  %5136 = vmatprep.mubr.msk.f32.mxu1 %vm154_vm1, %v8323_v59 }
 0x222   :  { %6074 = vmatpush1.bf16.msra.mxu0 %v6073_v11  ;;  %6110 = vmatpush1.bf16.msra.mxu1 %v6109_v55  ;;  %v6124_v11 = vpack.c.bf16 %v5205_v14, %v5204_v9  ;;  %v5166_v55 = vld [vmem:[%s9673_s4 + $0x210] sm:$0xff]  ;;  %v2991_v9 = vrot.slane %v9730_v47, 2  ;;  %v6136_v14 = vpack.c.bf16 %v5229_v12, %v5228_v6  ;;  %v5235_v12 = vld [vmem:[%s9673_s4 + $0x278] sm:$0xff] }
 0x223   :  { %6075 = vmatprep.subr.bf16.mxu0 %v9710_v7  ;;  %6111 = vmatprep.subr.bf16.mxu1 %v9710_v7  ;;  %v6091_v16 = vpack.c.bf16 %v5167_v56, %v5166_v55  ;;  %v2997_v56 = vrot.slane %v9733_v42, 2 }
 0x224   :  { %2591 = vmatmul.mubr.f32.gmra.mrb[40].mxu0 %v8317_v5  ;;  %2906 = vmatmul.mubr.f32.gmra.mrb[40].mxu1 %v8317_v5  ;;  %v2993_v55 = vsel %vm897_vm2, %v2991_v9, %v2992_v39 }
 0x225   :  { %5081 = vmatprep.mubr.msk.f32.mxu0 %vm154_vm1, %v8353_v1  ;;  %5137 = vmatprep.mubr.msk.f32.mxu1 %vm154_vm1, %v8353_v1 }
 0x226   :  { %6077 = vmatpush1.bf16.msra.mxu0 %v6076_v18  ;;  %6113 = vmatpush1.bf16.msra.mxu1 %v6112_v50  ;;  %v6127_v18 = vpack.c.bf16 %v5207_v29, %v5206_v58  ;;  %v5168_v50 = vld [vmem:[%s9673_s4 + $0x220] sm:$0xff]  ;;  %v5231_v58 = vld [vmem:[%s9673_s4 + $0x258] sm:$0xff]  ;;  %v5270_v29 = vld [vmem:[%s9674_s5 + $0x250] sm:$0xff] }
 0x227   :  { %6078 = vmatprep.subr.bf16.mxu0 %v9710_v7  ;;  %6114 = vmatprep.subr.bf16.mxu1 %v9710_v7  ;;  %v6094_v24 = vpack.c.bf16 %v5169_v38, %v5168_v50  ;;  %v3003_v50 = vrot.slane %v8297_v52, 2 }
 0x228   :  { %2596 = vmatmul.mubr.f32.gmra.mrb[42].mxu0 %v8345_v33  ;;  %2911 = vmatmul.mubr.f32.gmra.mrb[42].mxu1 %v8345_v33 }
 0x229   :  { %5082 = vmatprep.mubr.msk.f32.mxu0 %vm154_vm1, %v8385_v8  ;;  %5138 = vmatprep.mubr.msk.f32.mxu1 %vm154_vm1, %v8385_v8 }
 0x22a   :  { %6080 = vmatpush1.bf16.msra.mxu0 %v6079_v48  ;;  %6116 = vmatpush1.bf16.msra.mxu1 %v6115_v22  ;;  %v6130_v48 = vpack.c.bf16 %v5209_v20, %v5208_v44  ;;  %v5170_v22 = vld [vmem:[%s9673_s4 + $0x230] sm:$0xff]  ;;  %v5232_v20 = vld [vmem:[%s9673_s4 + $0x260] sm:$0xff] }
 0x22b   :  { %6081 = vmatprep.subr.bf16.mxu0 %v9710_v7  ;;  %6117 = vmatprep.subr.bf16.mxu1 %v9710_v7  ;;  %v6097_v34 = vpack.c.bf16 %v5171_v49, %v5170_v22  ;;  %v5233_v22 = vld [vmem:[%s9673_s4 + $0x268] sm:$0xff]  ;;  %v5272_v49 = vld [vmem:[%s9674_s5 + $0x260] sm:$0xff] }
 0x22c   :  { %2601 = vmatmul.mubr.f32.gmra.mrb[44].mxu0 %v8375_v54  ;;  %2916 = vmatmul.mubr.f32.gmra.mrb[44].mxu1 %v8375_v54 }
 0x22d   :  { %5083 = vmatprep.mubr.msk.f32.mxu0 %vm154_vm1, %v8419_v32  ;;  %5139 = vmatprep.mubr.msk.f32.mxu1 %vm154_vm1, %v8419_v32 }
 0x22e   :  { %6083 = vmatpush1.bf16.msra.mxu0 %v6082_v61  ;;  %6119 = vmatpush1.bf16.msra.mxu1 %v6118_v57  ;;  %v6133_v61 = vpack.c.bf16 %v5211_v25, %v5210_v63  ;;  %v2995_v57 = vrot.slane %v9731_v28, 2  ;;  %v5273_v63 = vld [vmem:[%s9674_s5 + $0x268] sm:$0xff]  ;;  %v3004_v25 = vsel %vm897_vm2, %v2999_v53, %v3003_v50 }
 0x22f   :  { %6084 = vmatprep.subr.bf16.mxu0 %v9710_v7  ;;  %6120 = vmatprep.subr.bf16.mxu1 %v9710_v7 }
 0x230   :  { %2606 = vmatmul.mubr.f32.gmra.mrb[46].mxu0 %v8407_v27  ;;  %2921 = vmatmul.mubr.f32.gmra.mrb[46].mxu1 %v8407_v27  ;;  %v2996_v62 = vsel %vm897_vm2, %v2994_v40, %v2995_v57  ;;  %v5234_v40 = vld [vmem:[%s9673_s4 + $0x270] sm:$0xff] }
 0x231   :  { %5084 = vmatprep.mubr.msk.f32.mxu0 %vm154_vm1, %v8453_v19  ;;  %5140 = vmatprep.mubr.msk.f32.mxu1 %vm154_vm1, %v8453_v19  ;;  %v6145_v9 = vpack.c.bf16 %v5235_v12, %v5234_v40  ;;  %v5280_v12 = vld [vmem:[%s9674_s5 + $0x2a0] sm:$0xff] }
 0x232   :  { %6086 = vmatpush1.bf16.msra.mxu0 %v6085_v51  ;;  %6122 = vmatpush1.bf16.msra.mxu1 %v6121_v15  ;;  %v5268_v51 = vld [vmem:[%s9674_s5 + $0x240] sm:$0xff]  ;;  %v5269_v15 = vld [vmem:[%s9674_s5 + $0x248] sm:$0xff] }
 0x233   :  { %6087 = vmatprep.subr.bf16.mxu0 %v9710_v7  ;;  %6123 = vmatprep.subr.bf16.mxu1 %v9710_v7 }
 0x234   :  { %2611 = vmatmul.mubr.f32.gmra.mrb[48].mxu0 %v8441_v41  ;;  %2926 = vmatmul.mubr.f32.gmra.mrb[48].mxu1 %v8441_v41 }
 0x235   :  { %5085 = vmatprep.mubr.msk.f32.mxu0 %vm154_vm1, %v8487_v3  ;;  %5141 = vmatprep.mubr.msk.f32.mxu1 %vm154_vm1, %v8487_v3 }
 0x236   :  { %6089 = vmatpush1.bf16.msra.mxu0 %v6088_v21  ;;  %6125 = vmatpush1.bf16.msra.mxu1 %v6124_v11  ;;  %v6172_v21 = vpack.c.bf16 %v5269_v15, %v5268_v51  ;;  %v5230_v11 = vld [vmem:[%s9673_s4 + $0x250] sm:$0xff]  ;;  %v5275_v15 = vld [vmem:[%s9674_s5 + $0x278] sm:$0xff] }
 0x237   :  { %6090 = vmatprep.subr.bf16.mxu0 %v9710_v7  ;;  %6126 = vmatprep.subr.bf16.mxu1 %v9710_v7  ;;  %v6139_v38 = vpack.c.bf16 %v5231_v58, %v5230_v11  ;;  %v5274_v51 = vld [vmem:[%s9674_s5 + $0x270] sm:$0xff]  ;;  %v5276_v58 = vld [vmem:[%s9674_s5 + $0x280] sm:$0xff] }
 0x238   :  { %2616 = vmatmul.mubr.f32.gmra.mrb[50].mxu0 %v8475_v45  ;;  %2931 = vmatmul.mubr.f32.gmra.mrb[50].mxu1 %v8475_v45 }
 0x239   :  { %5086 = vmatprep.mubr.msk.f32.mxu0 %vm154_vm1, %v8515_v46  ;;  %5142 = vmatprep.mubr.msk.f32.mxu1 %vm154_vm1, %v8515_v46 }
 0x23a   :  { %6092 = vmatpush1.bf16.msra.mxu0 %v6091_v16  ;;  %6128 = vmatpush1.bf16.msra.mxu1 %v6127_v18  ;;  %v5271_v16 = vld [vmem:[%s9674_s5 + $0x258] sm:$0xff]  ;;  %v3000_v18 = vsel %vm897_vm2, %v2995_v57, %v2999_v53  ;;  %v6178_v57 = vpack.c.bf16 %v5273_v63, %v5272_v49  ;;  %v3011_v53 = vrot.slane %v8353_v1, 2 }
 0x23b   :  { %6093 = vmatprep.subr.bf16.mxu0 %v9710_v7  ;;  %6129 = vmatprep.subr.bf16.mxu1 %v9710_v7  ;;  %v6175_v44 = vpack.c.bf16 %v5271_v16, %v5270_v29  ;;  %v5277_v29 = vld [vmem:[%s9674_s5 + $0x288] sm:$0xff]  ;;  %v5279_v49 = vld [vmem:[%s9674_s5 + $0x298] sm:$0xff] }
 0x23c   :  { %2621 = vmatmul.mubr.f32.gmra.mrb[52].mxu0 %v8504_v36  ;;  %2936 = vmatmul.mubr.f32.gmra.mrb[52].mxu1 %v8504_v36 }
 0x23d   :  { %5087 = vmatprep.mubr.msk.f32.mxu0 %vm154_vm1, %v8556_v17  ;;  %5143 = vmatprep.mubr.msk.f32.mxu1 %vm154_vm1, %v8556_v17 }
 0x23e   :  { %6095 = vmatpush1.bf16.msra.mxu0 %v6094_v24  ;;  %6131 = vmatpush1.bf16.msra.mxu1 %v6130_v48  ;;  %v2998_v24 = vsel %vm897_vm2, %v2992_v39, %v2997_v56  ;;  %v3001_v48 = vrot.slane %v9734_v35, 2  ;;  %v3005_v39 = vrot.slane %v8317_v5, 2 }
 0x23f   :  { %6096 = vmatprep.subr.bf16.mxu0 %v9710_v7  ;;  %6132 = vmatprep.subr.bf16.mxu1 %v9710_v7 }
 0x240   :  { %2626 = vmatmul.mubr.f32.gmra.mrb[54].mxu0 %v8535_v4  ;;  %2941 = vmatmul.mubr.f32.gmra.mrb[54].mxu1 %v8535_v4  ;;  %v3002_v6 = vsel %vm897_vm2, %v2997_v56, %v3001_v48  ;;  %v3006_v11 = vsel %vm897_vm2, %v3001_v48, %v3005_v39  ;;  %v5237_v56 = vld [vmem:[%s9673_s4 + $0x288] sm:$0xff]  ;;  %v5239_v48 = vld [vmem:[%s9673_s4 + $0x298] sm:$0xff] }
 0x241   :  { %5088 = vmatprep.mubr.msk.f32.mxu0 %vm154_vm1, %v8591_v0  ;;  %5144 = vmatprep.mubr.msk.f32.mxu1 %vm154_vm1, %v8591_v0 }
 0x242   :  { %6098 = vmatpush1.bf16.msra.mxu0 %v6097_v34  ;;  %6134 = vmatpush1.bf16.msra.mxu1 %v6133_v61  ;;  %v3007_v34 = vrot.slane %v8323_v59, 2  ;;  %v6142_v61 = vpack.c.bf16 %v5233_v22, %v5232_v20  ;;  %v5278_v22 = vld [vmem:[%s9674_s5 + $0x290] sm:$0xff] }
 0x243   :  { %6135 = vmatprep.subr.bf16.mxu0 %v9710_v7  ;;  %6171 = vmatprep.subr.bf16.mxu1 %v9710_v7 }
 0x244   :  { %2631 = vmatmul.mubr.f32.gmra.mrb[56].mxu0 %v8573_v23  ;;  %2946 = vmatmul.mubr.f32.gmra.mrb[56].mxu1 %v8573_v23  ;;  %v3012_v16 = vsel %vm897_vm2, %v3007_v34, %v3011_v53 }
 0x245   :  { %5089 = vmatprep.mubr.msk.f32.mxu0 %vm154_vm1, %v8615_v13  ;;  %5145 = vmatprep.mubr.msk.f32.mxu1 %vm154_vm1, %v8615_v13 }
 0x248   :  { %2636 = vmatmul.mubr.f32.gmra.mrb[58].mxu0 %v8599_v60  ;;  %2951 = vmatmul.mubr.f32.gmra.mrb[58].mxu1 %v8599_v60 }
 0x249   :  { %5090 = vmatprep.mubr.msk.f32.mxu0 %vm154_vm1, %v8627_v2  ;;  %5146 = vmatprep.mubr.msk.f32.mxu1 %vm154_vm1, %v8627_v2 }
 0x24c   :  { %2641 = vmatmul.mubr.f32.gmra.mrb[60].mxu0 %v8620_v26  ;;  %2956 = vmatmul.mubr.f32.gmra.mrb[60].mxu1 %v8620_v26 }
 0x24d   :  { %5091 = vmatprep.mubr.msk.f32.mxu0 %vm154_vm1, %v8629_v43  ;;  %5147 = vmatprep.mubr.msk.f32.mxu1 %vm154_vm1, %v8629_v43 }
 0x250   :  { %2646 = vmatmul.mubr.f32.gmra.mrb[62].mxu0 %v8639_v10  ;;  %2961 = vmatmul.mubr.f32.gmra.mrb[62].mxu1 %v8639_v10 }
 0x251   :  { %5172 = vmatprep.mubr.msk.f32.mxu0 %vm154_vm1, %v2996_v62  ;;  %5212 = vmatprep.mubr.msk.f32.mxu1 %vm154_vm1, %v2996_v62  ;;  %v3008_v62 = vsel %vm897_vm2, %v3003_v50, %v3007_v34 }
 0x254   :  { %3166 = vmatmul.mubr.f32.vlgmr.msra.gmra.mrb[32].mxu0 %v2993_v55  ;;  %3352 = vmatmul.mubr.f32.vlgmr.msra.gmra.mrb[32].mxu1 %v2993_v55  ;;  %v3009_v55 = vrot.slane %v8345_v33, 2 }
 0x255   :  { %5173 = vmatprep.mubr.msk.f32.mxu0 %vm154_vm1, %v3000_v18  ;;  %5213 = vmatprep.mubr.msk.f32.mxu1 %vm154_vm1, %v3000_v18  ;;  %v3015_v18 = vrot.slane %v8385_v8, 2 }
 0x256   :  { %6137 = vmatpush1.bf16.msra.mxu0 %v6136_v14  ;;  %6173 = vmatpush1.bf16.msra.mxu1 %v6172_v21  ;;  %v6181_v14 = vpack.c.bf16 %v5275_v15, %v5274_v51  ;;  %v5236_v21 = vld [vmem:[%s9673_s4 + $0x280] sm:$0xff]  ;;  %v3010_v20 = vsel %vm897_vm2, %v3005_v39, %v3009_v55  ;;  %v5241_v39 = vld [vmem:[%s9673_s4 + $0x2a8] sm:$0xff] }
 0x257   :  { %6138 = vmatprep.subr.bf16.mxu0 %v9710_v7  ;;  %6174 = vmatprep.subr.bf16.mxu1 %v9710_v7  ;;  %v6148_v50 = vpack.c.bf16 %v5237_v56, %v5236_v21  ;;  %v3016_v63 = vsel %vm897_vm2, %v3011_v53, %v3015_v18  ;;  %v5281_v51 = vld [vmem:[%s9674_s5 + $0x2a8] sm:$0xff]  ;;  %v5282_v56 = vld [vmem:[%s9674_s5 + $0x2b0] sm:$0xff] }
 0x258   :  { %3171 = vmatmul.mubr.f32.gmra.mrb[34].mxu0 %v2998_v24  ;;  %3357 = vmatmul.mubr.f32.gmra.mrb[34].mxu1 %v2998_v24  ;;  %v3013_v24 = vrot.slane %v8375_v54, 2 }
 0x259   :  { %5174 = vmatprep.mubr.msk.f32.mxu0 %vm154_vm1, %v3004_v25  ;;  %5214 = vmatprep.mubr.msk.f32.mxu1 %vm154_vm1, %v3004_v25  ;;  %v3019_v25 = vrot.slane %v8419_v32, 2 }
 0x25a   :  { %6140 = vmatpush1.bf16.msra.mxu0 %v6139_v38  ;;  %6176 = vmatpush1.bf16.msra.mxu1 %v6175_v44  ;;  %v6184_v38 = vpack.c.bf16 %v5277_v29, %v5276_v58  ;;  %v5238_v44 = vld [vmem:[%s9673_s4 + $0x290] sm:$0xff]  ;;  %v3014_v40 = vsel %vm897_vm2, %v3009_v55, %v3013_v24  ;;  %v5243_v55 = vld [vmem:[%s9673_s4 + $0x2b8] sm:$0xff] }
 0x25b   :  { %6141 = vmatprep.subr.bf16.mxu0 %v9710_v7  ;;  %6177 = vmatprep.subr.bf16.mxu1 %v9710_v7  ;;  %v6151_v34 = vpack.c.bf16 %v5239_v48, %v5238_v44  ;;  %v3020_v15 = vsel %vm897_vm2, %v3015_v18, %v3019_v25  ;;  %v5283_v58 = vld [vmem:[%s9674_s5 + $0x2b8] sm:$0xff]  ;;  %v5284_v48 = vld [vmem:[%s9674_s5 + $0x2c0] sm:$0xff] }
 0x25c   :  { %3176 = vmatmul.mubr.f32.gmra.mrb[36].mxu0 %v3002_v6  ;;  %3362 = vmatmul.mubr.f32.gmra.mrb[36].mxu1 %v3002_v6  ;;  %v3017_v6 = vrot.slane %v8407_v27, 2 }
 0x25d   :  { %5175 = vmatprep.mubr.msk.f32.mxu0 %vm154_vm1, %v3008_v62  ;;  %5215 = vmatprep.mubr.msk.f32.mxu1 %vm154_vm1, %v3008_v62  ;;  %v3023_v62 = vrot.slane %v8453_v19, 2 }
 0x25e   :  { %6143 = vmatpush1.bf16.msra.mxu0 %v6142_v61  ;;  %6179 = vmatpush1.bf16.msra.mxu1 %v6178_v57  ;;  %v6187_v61 = vpack.c.bf16 %v5279_v49, %v5278_v22  ;;  %v5240_v57 = vld [vmem:[%s9673_s4 + $0x2a0] sm:$0xff]  ;;  %v3018_v21 = vsel %vm897_vm2, %v3013_v24, %v3017_v6  ;;  %v5245_v24 = vld [vmem:[%s9673_s4 + $0x2c8] sm:$0xff] }
 0x25f   :  { %6144 = vmatprep.subr.bf16.mxu0 %v9710_v7  ;;  %6180 = vmatprep.subr.bf16.mxu1 %v9710_v7  ;;  %v6154_v53 = vpack.c.bf16 %v5241_v39, %v5240_v57  ;;  %v3024_v29 = vsel %vm897_vm2, %v3019_v25, %v3023_v62  ;;  %v5285_v22 = vld [vmem:[%s9674_s5 + $0x2c8] sm:$0xff]  ;;  %v5286_v39 = vld [vmem:[%s9674_s5 + $0x2d0] sm:$0xff] }
 0x260   :  { %3181 = vmatmul.mubr.f32.gmra.mrb[38].mxu0 %v3006_v11  ;;  %3367 = vmatmul.mubr.f32.gmra.mrb[38].mxu1 %v3006_v11  ;;  %v3021_v11 = vrot.slane %v8441_v41, 2 }
 0x261   :  { %5176 = vmatprep.mubr.msk.f32.mxu0 %vm154_vm1, %v3012_v16  ;;  %5216 = vmatprep.mubr.msk.f32.mxu1 %vm154_vm1, %v3012_v16  ;;  %v3027_v16 = vrot.slane %v8487_v3, 2 }
 0x262   :  { %6146 = vmatpush1.bf16.msra.mxu0 %v6145_v9  ;;  %6182 = vmatpush1.bf16.msra.mxu1 %v6181_v14  ;;  %v6190_v9 = vpack.c.bf16 %v5281_v51, %v5280_v12  ;;  %v5242_v14 = vld [vmem:[%s9673_s4 + $0x2b0] sm:$0xff]  ;;  %v3022_v44 = vsel %vm897_vm2, %v3017_v6, %v3021_v11  ;;  %v5247_v6 = vld [vmem:[%s9673_s4 + $0x2d8] sm:$0xff] }
 0x263   :  { %6147 = vmatprep.subr.bf16.mxu0 %v9710_v7  ;;  %6183 = vmatprep.subr.bf16.mxu1 %v9710_v7  ;;  %v6157_v18 = vpack.c.bf16 %v5243_v55, %v5242_v14  ;;  %v3028_v49 = vsel %vm897_vm2, %v3023_v62, %v3027_v16  ;;  %v5287_v12 = vld [vmem:[%s9674_s5 + $0x2d8] sm:$0xff]  ;;  %v5288_v55 = vld [vmem:[%s9674_s5 + $0x2e0] sm:$0xff] }
 0x264   :  { %3186 = vmatmul.mubr.f32.gmra.mrb[40].mxu0 %v3010_v20  ;;  %3372 = vmatmul.mubr.f32.gmra.mrb[40].mxu1 %v3010_v20  ;;  %v3025_v20 = vrot.slane %v8475_v45, 2 }
 0x265   :  { %5177 = vmatprep.mubr.msk.f32.mxu0 %vm154_vm1, %v3016_v63  ;;  %5217 = vmatprep.mubr.msk.f32.mxu1 %vm154_vm1, %v3016_v63  ;;  %v3031_v63 = vrot.slane %v8515_v46, 2 }
 0x266   :  { %6149 = vmatpush1.bf16.msra.mxu0 %v6148_v50  ;;  %6185 = vmatpush1.bf16.msra.mxu1 %v6184_v38  ;;  %v6193_v50 = vpack.c.bf16 %v5283_v58, %v5282_v56  ;;  %v5244_v38 = vld [vmem:[%s9673_s4 + $0x2c0] sm:$0xff]  ;;  %v3026_v57 = vsel %vm897_vm2, %v3021_v11, %v3025_v20  ;;  %v5249_v11 = vld [vmem:[%s9673_s4 + $0x2e8] sm:$0xff] }
 0x267   :  { %6150 = vmatprep.subr.bf16.mxu0 %v9710_v7  ;;  %6186 = vmatprep.subr.bf16.mxu1 %v9710_v7  ;;  %v6160_v25 = vpack.c.bf16 %v5245_v24, %v5244_v38  ;;  %v3032_v51 = vsel %vm897_vm2, %v3027_v16, %v3031_v63  ;;  %v5289_v56 = vld [vmem:[%s9674_s5 + $0x2e8] sm:$0xff]  ;;  %v5290_v24 = vld [vmem:[%s9674_s5 + $0x2f0] sm:$0xff] }
 0x268   :  { %3191 = vmatmul.mubr.f32.gmra.mrb[42].mxu0 %v3014_v40  ;;  %3377 = vmatmul.mubr.f32.gmra.mrb[42].mxu1 %v3014_v40  ;;  %v3029_v40 = vrot.slane %v8504_v36, 2 }
 0x269   :  { %5178 = vmatprep.mubr.msk.f32.mxu0 %vm154_vm1, %v3020_v15  ;;  %5218 = vmatprep.mubr.msk.f32.mxu1 %vm154_vm1, %v3020_v15  ;;  %v3035_v15 = vrot.slane %v8556_v17, 2 }
 0x26a   :  { %6152 = vmatpush1.bf16.msra.mxu0 %v6151_v34  ;;  %6188 = vmatpush1.bf16.msra.mxu1 %v6187_v61  ;;  %v6196_v34 = vpack.c.bf16 %v5285_v22, %v5284_v48  ;;  %v5246_v61 = vld [vmem:[%s9673_s4 + $0x2d0] sm:$0xff]  ;;  %v3030_v14 = vsel %vm897_vm2, %v3025_v20, %v3029_v40  ;;  %v5251_v20 = vld [vmem:[%s9673_s4 + $0x2f8] sm:$0xff] }
 0x26b   :  { %6153 = vmatprep.subr.bf16.mxu0 %v9710_v7  ;;  %6189 = vmatprep.subr.bf16.mxu1 %v9710_v7  ;;  %v6163_v62 = vpack.c.bf16 %v5247_v6, %v5246_v61  ;;  %v3036_v58 = vsel %vm897_vm2, %v3031_v63, %v3035_v15  ;;  %v5291_v48 = vld [vmem:[%s9674_s5 + $0x2f8] sm:$0xff]  ;;  %v3041_v61 = vrot.slane %v8599_v60, 2 }
 0x26c   :  { %3196 = vmatmul.mubr.f32.gmra.mrb[44].mxu0 %v3018_v21  ;;  %3382 = vmatmul.mubr.f32.gmra.mrb[44].mxu1 %v3018_v21  ;;  %v3033_v21 = vrot.slane %v8535_v4, 2 }
 0x26d   :  { %5179 = vmatprep.mubr.msk.f32.mxu0 %vm154_vm1, %v3024_v29  ;;  %5219 = vmatprep.mubr.msk.f32.mxu1 %vm154_vm1, %v3024_v29  ;;  %v3039_v29 = vrot.slane %v8591_v0, 2 }
 0x26e   :  { %6155 = vmatpush1.bf16.msra.mxu0 %v6154_v53  ;;  %6191 = vmatpush1.bf16.msra.mxu1 %v6190_v9  ;;  %v6199_v53 = vpack.c.bf16 %v5287_v12, %v5286_v39  ;;  %v5248_v9 = vld [vmem:[%s9673_s4 + $0x2e0] sm:$0xff]  ;;  %v3034_v38 = vsel %vm897_vm2, %v3029_v40, %v3033_v21  ;;  %v3047_v40 = vrot.slane %v8627_v2, 2  ;;  %v3045_v39 = vrot.slane %v8620_v26, 2 }
 0x26f   :  { %6156 = vmatprep.subr.bf16.mxu0 %v9710_v7  ;;  %6192 = vmatprep.subr.bf16.mxu1 %v9710_v7  ;;  %v6166_v16 = vpack.c.bf16 %v5249_v11, %v5248_v9  ;;  %v3040_v22 = vsel %vm897_vm2, %v3035_v15, %v3039_v29  ;;  %v3474_v11 = vrot.slane %v8219_v37, 3 }
 0x270   :  { %3201 = vmatmul.mubr.f32.gmra.mrb[46].mxu0 %v3022_v44  ;;  %3387 = vmatmul.mubr.f32.gmra.mrb[46].mxu1 %v3022_v44  ;;  %v3037_v44 = vrot.slane %v8573_v23, 2  ;;  %v3046_v15 = vsel %vm897_vm2, %v3041_v61, %v3045_v39 }
 0x271   :  { %5180 = vmatprep.mubr.msk.f32.mxu0 %vm154_vm1, %v3028_v49  ;;  %5220 = vmatprep.mubr.msk.f32.mxu1 %vm154_vm1, %v3028_v49  ;;  %v3043_v49 = vrot.slane %v8615_v13, 2 }
 0x272   :  { %6158 = vmatpush1.bf16.msra.mxu0 %v6157_v18  ;;  %6194 = vmatpush1.bf16.msra.mxu1 %v6193_v50  ;;  %v6202_v18 = vpack.c.bf16 %v5289_v56, %v5288_v55  ;;  %v5250_v50 = vld [vmem:[%s9673_s4 + $0x2f0] sm:$0xff]  ;;  %v3042_v6 = vsel %vm897_vm2, %v3037_v44, %v3041_v61  ;;  %v3481_v56 = vrot.slane %v9732_v30, 3  ;;  %v3511_v61 = vrot.slane %v8504_v36, 3 }
 0x273   :  { %6159 = vmatprep.subr.bf16.mxu0 %v9710_v7  ;;  %6195 = vmatprep.subr.bf16.mxu1 %v9710_v7  ;;  %v6169_v63 = vpack.c.bf16 %v5251_v20, %v5250_v50  ;;  %v3048_v12 = vsel %vm897_vm2, %v3043_v49, %v3047_v40  ;;  %v3495_v20 = vrot.slane %v8375_v54, 3  ;;  %v3505_v54 = vrot.slane %v8453_v19, 3 }
 0x274   :  { %3206 = vmatmul.mubr.f32.gmra.mrb[48].mxu0 %v3026_v57  ;;  %3392 = vmatmul.mubr.f32.gmra.mrb[48].mxu1 %v3026_v57  ;;  %v3044_v57 = vsel %vm897_vm2, %v3039_v29, %v3043_v49  ;;  %v3479_v29 = vrot.slane %v9733_v42, 3  ;;  %v3489_v42 = vrot.slane %v8323_v59, 3  ;;  %v3503_v49 = vrot.slane %v8441_v41, 3 }
 0x275   :  { %5181 = vmatprep.mubr.msk.f32.mxu0 %vm154_vm1, %v3032_v51  ;;  %5221 = vmatprep.mubr.msk.f32.mxu1 %vm154_vm1, %v3032_v51  ;;  %v3051_v51 = vrot.slane %v8629_v43, 2  ;;  %v3513_v41 = vrot.slane %v8515_v46, 3  ;;  %v3521_v36 = vrot.slane %v8591_v0, 3 }
 0x276   :  { %6161 = vmatpush1.bf16.msra.mxu0 %v6160_v25  ;;  %6197 = vmatpush1.bf16.msra.mxu1 %v6196_v34  ;;  %v6205_v25 = vpack.c.bf16 %v5291_v48, %v5290_v24  ;;  %v3038_v34 = vsel %vm897_vm2, %v3033_v21, %v3037_v44  ;;  %v3476_v21 = vrot.slane %v9729_v31, 3  ;;  %v3485_v31 = vrot.slane %v8297_v52, 3 }
 0x277   :  { %6162 = vmatprep.subr.bf16.mxu0 %v9710_v7  ;;  %6198 = vmatprep.subr.bf16.mxu1 %v9710_v7  ;;  %v3480_v30 = vsel %vm1381_vm3, %v3474_v11, %v3479_v29  ;;  %v3499_v48 = vrot.slane %v8407_v27, 3  ;;  %v3509_v27 = vrot.slane %v8487_v3, 3 }
 0x278   :  { %3211 = vmatmul.mubr.f32.gmra.mrb[50].mxu0 %v3030_v14  ;;  %3397 = vmatmul.mubr.f32.gmra.mrb[50].mxu1 %v3030_v14  ;;  %v3477_v14 = vrot.slane %v9731_v28, 3  ;;  %v3473_v28 = vrot.slane %v9730_v47, 3  ;;  %v3486_v47 = vsel %vm1381_vm3, %v3481_v56, %v3485_v31  ;;  %v3490_v50 = vsel %vm1381_vm3, %v3485_v31, %v3489_v42 }
 0x279   :  { %5182 = vmatprep.mubr.msk.f32.mxu0 %vm154_vm1, %v3036_v58  ;;  %5222 = vmatprep.mubr.msk.f32.mxu1 %vm154_vm1, %v3036_v58  ;;  %v3504_v19 = vsel %vm1381_vm3, %v3499_v48, %v3503_v49 }
 0x27a   :  { %6164 = vmatpush1.bf16.msra.mxu0 %v6163_v62  ;;  %6200 = vmatpush1.bf16.msra.mxu1 %v6199_v53  ;;  %v3049_v62 = vrot.slane %v8639_v10, 2  ;;  %v3052_v53 = vsel %vm897_vm2, %v3047_v40, %v3051_v51  ;;  %v3478_v55 = vsel %vm1381_vm3, %v3476_v21, %v3477_v14  ;;  %v3475_v58 = vsel %vm1381_vm3, %v3473_v28, %v3474_v11 }
 0x27b   :  { %6165 = vmatprep.subr.bf16.mxu0 %v9710_v7  ;;  %6201 = vmatprep.subr.bf16.mxu1 %v9710_v7  ;;  %v3482_v37 = vsel %vm1381_vm3, %v3477_v14, %v3481_v56  ;;  %v3515_v40 = vrot.slane %v8535_v4, 3  ;;  %v3525_v4 = vrot.slane %v8615_v13, 3 }
 0x27c   :  { %3216 = vmatmul.mubr.f32.gmra.mrb[52].mxu0 %v3034_v38  ;;  %3402 = vmatmul.mubr.f32.gmra.mrb[52].mxu1 %v3034_v38  ;;  %v3050_v9 = vsel %vm897_vm2, %v3045_v39, %v3049_v62  ;;  %v3491_v38 = vrot.slane %v8345_v33, 3  ;;  %v3501_v33 = vrot.slane %v8419_v32, 3  ;;  %v3500_v32 = vsel %vm1381_vm3, %v3495_v20, %v3499_v48 }
 0x27d   :  { %5183 = vmatprep.mubr.msk.f32.mxu0 %vm154_vm1, %v3040_v22  ;;  %5223 = vmatprep.mubr.msk.f32.mxu1 %vm154_vm1, %v3040_v22  ;;  %v3519_v39 = vrot.slane %v8573_v23, 3  ;;  %v3529_v23 = vrot.slane %v8627_v2, 3 }
 0x27e   :  { %6167 = vmatpush1.bf16.msra.mxu0 %v6166_v16  ;;  %6203 = vmatpush1.bf16.msra.mxu1 %v6202_v18  ;;  %v3483_v16 = vrot.slane %v9734_v35, 3  ;;  %v3487_v18 = vrot.slane %v8317_v5, 3  ;;  %v3493_v35 = vrot.slane %v8353_v1, 3  ;;  %v3497_v5 = vrot.slane %v8385_v8, 3 }
 0x27f   :  { %6168 = vmatprep.subr.bf16.mxu0 %v9710_v7  ;;  %6204 = vmatprep.subr.bf16.mxu1 %v9710_v7  ;;  %v3496_v8 = vsel %vm1381_vm3, %v3491_v38, %v3495_v20  ;;  %v3520_v0 = vsel %vm1381_vm3, %v3515_v40, %v3519_v39 }
 0x280   :  { %3221 = vmatmul.mubr.f32.gmra.mrb[54].mxu0 %v3038_v34  ;;  %3407 = vmatmul.mubr.f32.gmra.mrb[54].mxu1 %v3038_v34  ;;  %v3484_v52 = vsel %vm1381_vm3, %v3479_v29, %v3483_v16  ;;  %v3488_v59 = vsel %vm1381_vm3, %v3483_v16, %v3487_v18  ;;  %v3494_v44 = vsel %vm1381_vm3, %v3489_v42, %v3493_v35 }
 0x281   :  { %5184 = vmatprep.mubr.msk.f32.mxu0 %vm154_vm1, %v3044_v57  ;;  %5224 = vmatprep.mubr.msk.f32.mxu1 %vm154_vm1, %v3044_v57  ;;  %v3492_v1 = vsel %vm1381_vm3, %v3487_v18, %v3491_v38  ;;  %v3498_v24 = vsel %vm1381_vm3, %v3493_v35, %v3497_v5  ;;  %v3502_v22 = vsel %vm1381_vm3, %v3497_v5, %v3501_v33  ;;  %v9280_v38 = vld [vmem:[%s9676_s6] ss:$0 sm:$0xff] }
 0x282   :  { %6170 = vmatpush1.bf16.msra.mxu0 %v6169_v63  ;;  %6206 = vmatpush1.bf16.msra.mxu1 %v6205_v25  ;;  %v3506_v63 = vsel %vm1381_vm3, %v3501_v33, %v3505_v54  ;;  %v3507_v25 = vrot.slane %v8475_v45, 3  ;;  %v3510_v34 = vsel %vm1381_vm3, %v3505_v54, %v3509_v27  ;;  %v3514_v57 = vsel %vm1381_vm3, %v3509_v27, %v3513_v41 }
 0x283   :  { %6207 = vmatprep.subr.bf16.mxu0 %v9710_v7  ;;  %6228 = vmatprep.subr.bf16.mxu1 %v9710_v7  ;;  %v3517_v45 = vrot.slane %v8556_v17, 3  ;;  %v3516_v17 = vsel %vm1381_vm3, %v3511_v61, %v3515_v40 }
 0x284   :  { %3226 = vmatmul.mubr.f32.gmra.mrb[56].mxu0 %v3042_v6  ;;  %3412 = vmatmul.mubr.f32.gmra.mrb[56].mxu1 %v3042_v6  ;;  %v3508_v3 = vsel %vm1381_vm3, %v3503_v49, %v3507_v25  ;;  %v3512_v46 = vsel %vm1381_vm3, %v3507_v25, %v3511_v61 }
 0x285   :  { %5185 = vmatprep.mubr.msk.f32.mxu0 %vm154_vm1, %v3048_v12  ;;  %5225 = vmatprep.mubr.msk.f32.mxu1 %vm154_vm1, %v3048_v12  ;;  %v3518_v6 = vsel %vm1381_vm3, %v3513_v41, %v3517_v45  ;;  %v3522_v12 = vsel %vm1381_vm3, %v3517_v45, %v3521_v36 }
 0x288   :  { %3231 = vmatmul.mubr.f32.gmra.mrb[58].mxu0 %v3046_v15  ;;  %3417 = vmatmul.mubr.f32.gmra.mrb[58].mxu1 %v3046_v15  ;;  %v3526_v15 = vsel %vm1381_vm3, %v3521_v36, %v3525_v4 }
 0x289   :  { %5186 = vmatprep.mubr.msk.f32.mxu0 %vm154_vm1, %v3052_v53  ;;  %5226 = vmatprep.mubr.msk.f32.mxu1 %vm154_vm1, %v3052_v53  ;;  %v3530_v53 = vsel %vm1381_vm3, %v3525_v4, %v3529_v23 }
 0x28c   :  { %3236 = vmatmul.mubr.f32.gmra.mrb[60].mxu0 %v3050_v9  ;;  %3422 = vmatmul.mubr.f32.gmra.mrb[60].mxu1 %v3050_v9  ;;  %v3531_v9 = vrot.slane %v8639_v10, 3 }
 0x28d   :  { %5187 = vmatprep.mubr.msk.f32.mxu0 %vm154_vm1, %v3051_v51  ;;  %5227 = vmatprep.mubr.msk.f32.mxu1 %vm154_vm1, %v3051_v51  ;;  %v3523_v51 = vrot.slane %v8599_v60, 3  ;;  %v3533_v60 = vrot.slane %v8629_v43, 3  ;;  %v9735_v43 = vmov 0.0  }
 0x28f   :  { %v3524_v13 = vsel %vm1381_vm3, %v3519_v39, %v3523_v51  ;;  %v3534_v14 = vsel %vm1381_vm3, %v3529_v23, %v3533_v60 }
 0x290   :  { %3241 = vmatmul.mubr.f32.gmra.mrb[62].mxu0 %v3049_v62  ;;  %3427 = vmatmul.mubr.f32.gmra.mrb[62].mxu1 %v3049_v62  ;;  %v3527_v62 = vrot.slane %v8620_v26, 3 }
 0x291   :  { %5252 = vmatprep.mubr.msk.f32.mxu0 %vm154_vm1, %v3478_v55  ;;  %5292 = vmatprep.mubr.msk.f32.mxu1 %vm154_vm1, %v3478_v55 }
 0x292   :  { %v3528_v2 = vsel %vm1381_vm3, %v3523_v51, %v3527_v62  ;;  %v3532_v26 = vsel %vm1381_vm3, %v3527_v62, %v3531_v9 }
 0x294   :  { %3648 = vmatmul.mubr.f32.vlgmr.msra.gmra.mrb[32].mxu0 %v3475_v58  ;;  %3834 = vmatmul.mubr.f32.vlgmr.msra.gmra.mrb[32].mxu1 %v3475_v58 }
 0x295   :  { %5253 = vmatprep.mubr.msk.f32.mxu0 %vm154_vm1, %v3482_v37  ;;  %5293 = vmatprep.mubr.msk.f32.mxu1 %vm154_vm1, %v3482_v37 }
 0x298   :  { %3653 = vmatmul.mubr.f32.gmra.mrb[34].mxu0 %v3480_v30  ;;  %3839 = vmatmul.mubr.f32.gmra.mrb[34].mxu1 %v3480_v30 }
 0x299   :  { %5254 = vmatprep.mubr.msk.f32.mxu0 %vm154_vm1, %v3486_v47  ;;  %5294 = vmatprep.mubr.msk.f32.mxu1 %vm154_vm1, %v3486_v47 }
 0x29c   :  { %3658 = vmatmul.mubr.f32.gmra.mrb[36].mxu0 %v3484_v52  ;;  %3844 = vmatmul.mubr.f32.gmra.mrb[36].mxu1 %v3484_v52 }
 0x29d   :  { %5255 = vmatprep.mubr.msk.f32.mxu0 %vm154_vm1, %v3490_v50  ;;  %5295 = vmatprep.mubr.msk.f32.mxu1 %vm154_vm1, %v3490_v50 }
 0x2a0   :  { %3663 = vmatmul.mubr.f32.gmra.mrb[38].mxu0 %v3488_v59  ;;  %3849 = vmatmul.mubr.f32.gmra.mrb[38].mxu1 %v3488_v59 }
 0x2a1   :  { %5256 = vmatprep.mubr.msk.f32.mxu0 %vm154_vm1, %v3494_v44  ;;  %5296 = vmatprep.mubr.msk.f32.mxu1 %vm154_vm1, %v3494_v44 }
 0x2a4   :  { %3668 = vmatmul.mubr.f32.gmra.mrb[40].mxu0 %v3492_v1  ;;  %3854 = vmatmul.mubr.f32.gmra.mrb[40].mxu1 %v3492_v1 }
 0x2a5   :  { %5257 = vmatprep.mubr.msk.f32.mxu0 %vm154_vm1, %v3498_v24  ;;  %5297 = vmatprep.mubr.msk.f32.mxu1 %vm154_vm1, %v3498_v24 }
 0x2a8   :  { %3673 = vmatmul.mubr.f32.gmra.mrb[42].mxu0 %v3496_v8  ;;  %3859 = vmatmul.mubr.f32.gmra.mrb[42].mxu1 %v3496_v8 }
 0x2a9   :  { %5258 = vmatprep.mubr.msk.f32.mxu0 %vm154_vm1, %v3502_v22  ;;  %5298 = vmatprep.mubr.msk.f32.mxu1 %vm154_vm1, %v3502_v22 }
 0x2ac   :  { %3678 = vmatmul.mubr.f32.gmra.mrb[44].mxu0 %v3500_v32  ;;  %3864 = vmatmul.mubr.f32.gmra.mrb[44].mxu1 %v3500_v32 }
 0x2ad   :  { %5259 = vmatprep.mubr.msk.f32.mxu0 %vm154_vm1, %v3506_v63  ;;  %5299 = vmatprep.mubr.msk.f32.mxu1 %vm154_vm1, %v3506_v63 }
 0x2b0   :  { %3683 = vmatmul.mubr.f32.gmra.mrb[46].mxu0 %v3504_v19  ;;  %3869 = vmatmul.mubr.f32.gmra.mrb[46].mxu1 %v3504_v19 }
 0x2b1   :  { %5260 = vmatprep.mubr.msk.f32.mxu0 %vm154_vm1, %v3510_v34  ;;  %5300 = vmatprep.mubr.msk.f32.mxu1 %vm154_vm1, %v3510_v34 }
 0x2b4   :  { %3688 = vmatmul.mubr.f32.gmra.mrb[48].mxu0 %v3508_v3  ;;  %3874 = vmatmul.mubr.f32.gmra.mrb[48].mxu1 %v3508_v3 }
 0x2b5   :  { %5261 = vmatprep.mubr.msk.f32.mxu0 %vm154_vm1, %v3514_v57  ;;  %5301 = vmatprep.mubr.msk.f32.mxu1 %vm154_vm1, %v3514_v57 }
 0x2b8   :  { %3693 = vmatmul.mubr.f32.gmra.mrb[50].mxu0 %v3512_v46  ;;  %3879 = vmatmul.mubr.f32.gmra.mrb[50].mxu1 %v3512_v46 }
 0x2b9   :  { %5262 = vmatprep.mubr.msk.f32.mxu0 %vm154_vm1, %v3518_v6  ;;  %5302 = vmatprep.mubr.msk.f32.mxu1 %vm154_vm1, %v3518_v6 }
 0x2bc   :  { %3698 = vmatmul.mubr.f32.gmra.mrb[52].mxu0 %v3516_v17  ;;  %3884 = vmatmul.mubr.f32.gmra.mrb[52].mxu1 %v3516_v17 }
 0x2bd   :  { %5263 = vmatprep.mubr.msk.f32.mxu0 %vm154_vm1, %v3522_v12  ;;  %5303 = vmatprep.mubr.msk.f32.mxu1 %vm154_vm1, %v3522_v12 }
 0x2c0   :  { %3703 = vmatmul.mubr.f32.gmra.mrb[54].mxu0 %v3520_v0  ;;  %3889 = vmatmul.mubr.f32.gmra.mrb[54].mxu1 %v3520_v0 }
 0x2c1   :  { %5264 = vmatprep.mubr.msk.f32.mxu0 %vm154_vm1, %v3526_v15  ;;  %5304 = vmatprep.mubr.msk.f32.mxu1 %vm154_vm1, %v3526_v15 }
 0x2c4   :  { %3708 = vmatmul.mubr.f32.gmra.mrb[56].mxu0 %v3524_v13  ;;  %3894 = vmatmul.mubr.f32.gmra.mrb[56].mxu1 %v3524_v13 }
 0x2c5   :  { %5265 = vmatprep.mubr.msk.f32.mxu0 %vm154_vm1, %v3530_v53  ;;  %5305 = vmatprep.mubr.msk.f32.mxu1 %vm154_vm1, %v3530_v53 }
 0x2c8   :  { %3713 = vmatmul.mubr.f32.gmra.mrb[58].mxu0 %v3528_v2  ;;  %3899 = vmatmul.mubr.f32.gmra.mrb[58].mxu1 %v3528_v2 }
 0x2c9   :  { %5266 = vmatprep.mubr.msk.f32.mxu0 %vm154_vm1, %v3534_v14  ;;  %5306 = vmatprep.mubr.msk.f32.mxu1 %vm154_vm1, %v3534_v14 }
 0x2cc   :  { %3718 = vmatmul.mubr.f32.gmra.mrb[60].mxu0 %v3532_v26  ;;  %3904 = vmatmul.mubr.f32.gmra.mrb[60].mxu1 %v3532_v26 }
 0x2cd   :  { %5267 = vmatprep.mubr.msk.f32.mxu0 %vm154_vm1, %v3533_v60  ;;  %5307 = vmatprep.mubr.msk.f32.mxu1 %vm154_vm1, %v3533_v60 }
 0x2d0   :  { %3723 = vmatmul.mubr.f32.gmra.mrb[62].mxu0 %v3531_v9  ;;  %3909 = vmatmul.mubr.f32.gmra.mrb[62].mxu1 %v3531_v9 }
 0x2d1   :  { %5571 = vmatprep.mubr.msk.f32.mxu1 %vm6878_vm4, %v9735_v43  ;;  %5538 = vmatprep.mubr.msk.f32.mxu0 %vm6878_vm4, %v9735_v43 }
 0x367   :  { %v3649_v10 = vpop.f32.mrb[32].mxu0  ;;  %v3835_v21 = vpop.f32.mrb[32].mxu1 }
 0x368   :  { %v3930_v11 = vmax.f32 %v3649_v10, %v3835_v21  ;;  %v3651_v55 = vpop.f32.mrb[33].mxu0  ;;  %v3837_v56 = vpop.f32.mrb[33].mxu1 }
 0x36a   :  { %v3962_v30 = vrot.slane %v3930_v11, 2 }
 0x36b   :  { %v3654_v28 = vpop.f32.mrb[34].mxu0  ;;  %v3840_v58 = vpop.f32.mrb[34].mxu1 }
 0x36c   :  { %v3931_v29 = vmax.f32 %v3654_v28, %v3840_v58  ;;  %v3656_v37 = vpop.f32.mrb[35].mxu0  ;;  %v3842_v31 = vpop.f32.mrb[35].mxu1 }
 0x36e   :  { %v3963_v16 = vrot.slane %v3931_v29, 2 }
 0x36f   :  { %v3659_v47 = vpop.f32.mrb[36].mxu0  ;;  %v3845_v42 = vpop.f32.mrb[36].mxu1 }
 0x370   :  { %v3964_v52 = vsel %vm897_vm2, %v3962_v30, %v3963_v16  ;;  %v3932_v18 = vmax.f32 %v3659_v47, %v3845_v42  ;;  %v3661_v50 = vpop.f32.mrb[37].mxu0  ;;  %v3847_v35 = vpop.f32.mrb[37].mxu1 }
 0x371   :  { %v4008_v59 = vmax.f32 %v3930_v11, %v3964_v52 }
 0x372   :  { %v3965_v44 = vrot.slane %v3932_v18, 2 }
 0x373   :  { %v3664_v5 = vpop.f32.mrb[38].mxu0  ;;  %v3850_v1 = vpop.f32.mrb[38].mxu1  ;;  %v4030_v20 = vadd.f32 %v9280_v38, %v4008_v59 }
 0x374   :  { %v3966_v24 = vsel %vm897_vm2, %v3963_v16, %v3965_v44  ;;  %v3933_v33 = vmax.f32 %v3664_v5, %v3850_v1  ;;  %v3666_v8 = vpop.f32.mrb[39].mxu0  ;;  %v3852_v48 = vpop.f32.mrb[39].mxu1 }
 0x375   :  { %v4009_v22 = vmax.f32 %v3931_v29, %v3966_v24  ;;  %6844 = vtanh.f32 %v4030_v20 }
 0x376   :  { %v3967_v54 = vrot.slane %v3933_v33, 2 }
 0x377   :  { %v4031_v32 = vadd.f32 %v9280_v38, %v4009_v22  ;;  %v3669_v49 = vpop.f32.mrb[40].mxu0  ;;  %v3855_v63 = vpop.f32.mrb[40].mxu1 }
 0x378   :  { %v3968_v27 = vsel %vm897_vm2, %v3965_v44, %v3967_v54  ;;  %v3934_v19 = vmax.f32 %v3669_v49, %v3855_v63  ;;  %v3671_v25 = vpop.f32.mrb[41].mxu0  ;;  %v3857_v34 = vpop.f32.mrb[41].mxu1 }
 0x379   :  { %6846 = vtanh.f32 %v4031_v32  ;;  %v4010_v41 = vmax.f32 %v3932_v18, %v3968_v27 }
 0x37a   :  { %v3969_v3 = vrot.slane %v3934_v19, 2 }
 0x37b   :  { %v3674_v61 = vpop.f32.mrb[42].mxu0  ;;  %v3860_v57 = vpop.f32.mrb[42].mxu1  ;;  %v4032_v45 = vadd.f32 %v9280_v38, %v4010_v41 }
 0x37c   :  { %v3970_v46 = vsel %vm897_vm2, %v3967_v54, %v3969_v3  ;;  %v3935_v40 = vmax.f32 %v3674_v61, %v3860_v57  ;;  %v3676_v6 = vpop.f32.mrb[43].mxu0  ;;  %v3862_v36 = vpop.f32.mrb[43].mxu1 }
 0x37d   :  { %v4011_v17 = vmax.f32 %v3933_v33, %v3970_v46  ;;  %6848 = vtanh.f32 %v4032_v45 }
 0x37e   :  { %v3971_v39 = vrot.slane %v3935_v40, 2 }
 0x37f   :  { %v4033_v12 = vadd.f32 %v9280_v38, %v4011_v17  ;;  %v3679_v4 = vpop.f32.mrb[44].mxu0  ;;  %v3865_v0 = vpop.f32.mrb[44].mxu1 }
 0x380   :  { %v3972_v51 = vsel %vm897_vm2, %v3969_v3, %v3971_v39  ;;  %v3936_v15 = vmax.f32 %v3679_v4, %v3865_v0  ;;  %v3681_v23 = vpop.f32.mrb[45].mxu0  ;;  %v3867_v13 = vpop.f32.mrb[45].mxu1 }
 0x381   :  { %6850 = vtanh.f32 %v4033_v12  ;;  %v4012_v62 = vmax.f32 %v3934_v19, %v3972_v51  ;;  %v6845_v53 = vpop.eup %6844 }
 0x382   :  { %v3973_v60 = vrot.slane %v3936_v15, 2 }
 0x383   :  { %v6847_v2 = vpop.eup %6846  ;;  %v3684_v9 = vpop.f32.mrb[46].mxu0  ;;  %v4034_v26 = vadd.f32 %v9280_v38, %v4012_v62 }
 0x384   :  { %v3870_v14 = vpop.f32.mrb[46].mxu1  ;;  %v3974_v10 = vsel %vm897_vm2, %v3971_v39, %v3973_v60  ;;  %v3686_v11 = vpop.f32.mrb[47].mxu0  ;;  %v9292_v56 = vpack.c.bf16 %v6847_v2, %v6845_v53 }
 0x385   :  { %v3937_v21 = vmax.f32 %v3684_v9, %v3870_v14  ;;  %v3872_v55 = vpop.f32.mrb[47].mxu1  ;;  %v4013_v28 = vmax.f32 %v3935_v40, %v3974_v10  ;;  %6852 = vtanh.f32 %v4034_v26 }
 0x386   :  { %6209 = vmatpush3.bf16.msra.mxu0 %v9292_v56  ;;  %6230 = vmatpush3.bf16.msra.mxu1 %v9292_v56 }
 0x387   :  { %v3975_v58 = vrot.slane %v3937_v21, 2  ;;  %v4035_v29 = vadd.f32 %v9280_v38, %v4013_v28  ;;  %v3689_v37 = vpop.f32.mrb[48].mxu0  ;;  %v3875_v31 = vpop.f32.mrb[48].mxu1  ;;  %6210 = vmatprep.subr.bf16.mxu0 %v9710_v7  ;;  %6231 = vmatprep.subr.bf16.mxu1 %v9710_v7 }
 0x388   :  { %v3938_v16 = vmax.f32 %v3689_v37, %v3875_v31  ;;  %v3691_v47 = vpop.f32.mrb[49].mxu0  ;;  %v3877_v42 = vpop.f32.mrb[49].mxu1 }
 0x389   :  { %v3976_v30 = vsel %vm897_vm2, %v3973_v60, %v3975_v58  ;;  %6854 = vtanh.f32 %v4035_v29  ;;  %v6849_v18 = vpop.eup %6848 }
 0x38a   :  { %v4014_v52 = vmax.f32 %v3936_v15, %v3976_v30  ;;  %v3977_v50 = vrot.slane %v3938_v16, 2 }
 0x38b   :  { %v6851_v35 = vpop.eup %6850  ;;  %v3694_v59 = vpop.f32.mrb[50].mxu0 }
 0x38c   :  { %v3880_v44 = vpop.f32.mrb[50].mxu1  ;;  %v4036_v5 = vadd.f32 %v9280_v38, %v4014_v52  ;;  %v3978_v1 = vsel %vm897_vm2, %v3975_v58, %v3977_v50  ;;  %v3696_v24 = vpop.f32.mrb[51].mxu0  ;;  %v9302_v8 = vpack.c.bf16 %v6851_v35, %v6849_v18 }
 0x38d   :  { %v3939_v20 = vmax.f32 %v3694_v59, %v3880_v44  ;;  %v3882_v33 = vpop.f32.mrb[51].mxu1  ;;  %v4015_v48 = vmax.f32 %v3937_v21, %v3978_v1 }
 0x38e   :  { %6212 = vmatpush3.bf16.msra.mxu0 %v9302_v8  ;;  %6233 = vmatpush3.bf16.msra.mxu1 %v9302_v8  ;;  %6856 = vtanh.f32 %v4036_v5 }
 0x38f   :  { %v3979_v22 = vrot.slane %v3939_v20, 2  ;;  %v4037_v54 = vadd.f32 %v9280_v38, %v4015_v48  ;;  %v3699_v32 = vpop.f32.mrb[52].mxu0  ;;  %v3885_v49 = vpop.f32.mrb[52].mxu1  ;;  %6213 = vmatprep.subr.bf16.mxu0 %v9710_v7  ;;  %6234 = vmatprep.subr.bf16.mxu1 %v9710_v7 }
 0x390   :  { %v3940_v27 = vmax.f32 %v3699_v32, %v3885_v49  ;;  %v3701_v19 = vpop.f32.mrb[53].mxu0  ;;  %v3887_v25 = vpop.f32.mrb[53].mxu1 }
 0x391   :  { %v3980_v63 = vsel %vm897_vm2, %v3977_v50, %v3979_v22  ;;  %6858 = vtanh.f32 %v4037_v54  ;;  %v6853_v41 = vpop.eup %6852 }
 0x392   :  { %v4016_v34 = vmax.f32 %v3938_v16, %v3980_v63  ;;  %v3981_v3 = vrot.slane %v3940_v27, 2 }
 0x393   :  { %v6855_v61 = vpop.eup %6854  ;;  %v3704_v57 = vpop.f32.mrb[54].mxu0 }
 0x394   :  { %v3890_v45 = vpop.f32.mrb[54].mxu1  ;;  %v4038_v46 = vadd.f32 %v9280_v38, %v4016_v34  ;;  %v3982_v40 = vsel %vm897_vm2, %v3979_v22, %v3981_v3  ;;  %v3706_v36 = vpop.f32.mrb[55].mxu0  ;;  %v9312_v39 = vpack.c.bf16 %v6855_v61, %v6853_v41 }
 0x395   :  { %v3941_v6 = vmax.f32 %v3704_v57, %v3890_v45  ;;  %v3892_v17 = vpop.f32.mrb[55].mxu1  ;;  %v4017_v12 = vmax.f32 %v3939_v20, %v3982_v40  ;;  %v5314_v40 = vld [vmem:[%s9677_s8 + $0x80] sm:$0xff]  ;;  %v4139_v36 = vld [vmem:[%s9677_s8 + $0x8] sm:$0xff] }
 0x396   :  { %6215 = vmatpush3.bf16.msra.mxu0 %v9312_v39  ;;  %6236 = vmatpush3.bf16.msra.mxu1 %v9312_v39  ;;  %6860 = vtanh.f32 %v4038_v46  ;;  %v5311_v17 = vld [vmem:[%s9678_s7 + $0x8] sm:$0xff] }
 0x397   :  { %v3983_v4 = vrot.slane %v3941_v6, 2  ;;  %v4039_v0 = vadd.f32 %v9280_v38, %v4017_v12  ;;  %v3709_v51 = vpop.f32.mrb[56].mxu0  ;;  %v3895_v15 = vpop.f32.mrb[56].mxu1  ;;  %6216 = vmatprep.subr.bf16.mxu0 %v9710_v7  ;;  %6237 = vmatprep.subr.bf16.mxu1 %v9710_v7  ;;  %v4060_v12 = vld [vmem:[%s9678_s7] sm:$0xff] }
 0x398   :  { %v3942_v13 = vmax.f32 %v3709_v51, %v3895_v15  ;;  %v3711_v62 = vpop.f32.mrb[57].mxu0  ;;  %v3897_v53 = vpop.f32.mrb[57].mxu1  ;;  %v5316_v51 = vld [vmem:[%s9677_s8 + $0x90] sm:$0xff] }
 0x399   :  { %v3984_v23 = vsel %vm897_vm2, %v3981_v3, %v3983_v4  ;;  %6862 = vtanh.f32 %v4039_v0  ;;  %v6857_v2 = vpop.eup %6856  ;;  %v4141_v62 = vld [vmem:[%s9677_s8 + $0x18] sm:$0xff] }
 0x39a   :  { %v4018_v60 = vmax.f32 %v3940_v27, %v3984_v23  ;;  %v3985_v9 = vrot.slane %v3942_v13, 2  ;;  %v5317_v23 = vld [vmem:[%s9677_s8 + $0x98] sm:$0xff] }
 0x39b   :  { %v6859_v14 = vpop.eup %6858  ;;  %v3714_v26 = vpop.f32.mrb[58].mxu0  ;;  %v6253_v53 = vpack.c.bf16 %v5317_v23, %v5316_v51  ;;  %v5338_v51 = vld [vmem:[%s9677_s8 + $0x128] sm:$0xff]  ;;  %v5330_v23 = vld [vmem:[%s9678_s7 + $0x10] sm:$0xff] }
 0x39c   :  { %v3900_v10 = vpop.f32.mrb[58].mxu1  ;;  %v4040_v21 = vadd.f32 %v9280_v38, %v4018_v60  ;;  %v3986_v11 = vsel %vm897_vm2, %v3983_v4, %v3985_v9  ;;  %v3716_v28 = vpop.f32.mrb[59].mxu0  ;;  %v9322_v29 = vpack.c.bf16 %v6859_v14, %v6857_v2  ;;  %v5318_v60 = vld [vmem:[%s9677_s8 + $0xa0] sm:$0xff] }
 0x39d   :  { %v3943_v55 = vmax.f32 %v3714_v26, %v3900_v10  ;;  %v3902_v58 = vpop.f32.mrb[59].mxu1  ;;  %v4019_v37 = vmax.f32 %v3941_v6, %v3986_v11  ;;  %v4138_v6 = vld [vmem:[%s9677_s8] sm:$0xff]  ;;  %v4143_v26 = vld [vmem:[%s9677_s8 + $0x28] sm:$0xff]  ;;  %v4144_v28 = vld [vmem:[%s9677_s8 + $0x30] sm:$0xff] }
 0x39e   :  { %6218 = vmatpush3.bf16.msra.mxu0 %v9322_v29  ;;  %6239 = vmatpush3.bf16.msra.mxu1 %v9322_v29  ;;  %6864 = vtanh.f32 %v4040_v21  ;;  %v6274_v15 = vpack.c.bf16 %v4139_v36, %v4138_v6  ;;  %v4142_v14 = vld [vmem:[%s9677_s8 + $0x20] sm:$0xff]  ;;  %v5320_v21 = vld [vmem:[%s9677_s8 + $0xb0] sm:$0xff]  ;;  %v4145_v58 = vld [vmem:[%s9677_s8 + $0x38] sm:$0xff] }
 0x39f   :  { %v3987_v31 = vrot.slane %v3943_v55, 2  ;;  %v4041_v30 = vadd.f32 %v9280_v38, %v4019_v37  ;;  %v3719_v16 = vpop.f32.mrb[60].mxu0  ;;  %v3905_v47 = vpop.f32.mrb[60].mxu1  ;;  %6219 = vmatprep.subr.bf16.mxu0 %v9710_v7  ;;  %6240 = vmatprep.subr.bf16.mxu1 %v9710_v7  ;;  %v6280_v11 = vpack.c.bf16 %v4143_v26, %v4142_v14  ;;  %v5336_v6 = vld [vmem:[%s9677_s8 + $0x118] sm:$0xff] }
 0x3a0   :  { %v3944_v52 = vmax.f32 %v3719_v16, %v3905_v47  ;;  %v3721_v18 = vpop.f32.mrb[61].mxu0  ;;  %v3907_v50 = vpop.f32.mrb[61].mxu1  ;;  %v5323_v16 = vld [vmem:[%s9677_s8 + $0xc8] sm:$0xff]  ;;  %v4146_v47 = vld [vmem:[%s9677_s8 + $0x40] sm:$0xff]  ;;  %v5348_v14 = vld [vmem:[%s9677_s8 + $0x178] sm:$0xff] }
 0x3a1   :  { %v3988_v42 = vsel %vm897_vm2, %v3985_v9, %v3987_v31  ;;  %6866 = vtanh.f32 %v4041_v30  ;;  %v6861_v59 = vpop.eup %6860  ;;  %v5319_v9 = vld [vmem:[%s9677_s8 + $0xa8] sm:$0xff]  ;;  %v6283_v30 = vpack.c.bf16 %v4145_v58, %v4144_v28  ;;  %v5324_v50 = vld [vmem:[%s9677_s8 + $0xd0] sm:$0xff]  ;;  %v5352_v58 = vld [vmem:[%s9677_s8 + $0x180] sm:$0xff] }
 0x3a2   :  { %v4020_v35 = vmax.f32 %v3942_v13, %v3988_v42  ;;  %v3989_v44 = vrot.slane %v3944_v52, 2  ;;  %v4140_v13 = vld [vmem:[%s9677_s8 + $0x10] sm:$0xff]  ;;  %v6256_v10 = vpack.c.bf16 %v5319_v9, %v5318_v60  ;;  %v4147_v42 = vld [vmem:[%s9677_s8 + $0x48] sm:$0xff] }
 0x3a3   :  { %v6863_v5 = vpop.eup %6862  ;;  %v3724_v1 = vpop.f32.mrb[62].mxu0  ;;  %v6277_v2 = vpack.c.bf16 %v4141_v62, %v4140_v13  ;;  %v6286_v18 = vpack.c.bf16 %v4147_v42, %v4146_v47  ;;  %v5344_v13 = vld [vmem:[%s9677_s8 + $0x158] sm:$0xff]  ;;  %v5346_v60 = vld [vmem:[%s9677_s8 + $0x168] sm:$0xff]  ;;  %v5347_v9 = vld [vmem:[%s9677_s8 + $0x170] sm:$0xff] }
 0x3a4   :  { %v3910_v20 = vpop.f32.mrb[62].mxu1  ;;  %v4042_v24 = vadd.f32 %v9280_v38, %v4020_v35  ;;  %v3990_v33 = vsel %vm897_vm2, %v3987_v31, %v3989_v44  ;;  %v3726_v22 = vpop.f32.mrb[63].mxu0  ;;  %v9332_v32 = vpack.c.bf16 %v6863_v5, %v6861_v59  ;;  %v5322_v31 = vld [vmem:[%s9677_s8 + $0xc0] sm:$0xff]  ;;  %v5325_v35 = vld [vmem:[%s9677_s8 + $0xd8] sm:$0xff]  ;;  %v5327_v5 = vld [vmem:[%s9677_s8 + $0xe8] sm:$0xff]  ;;  %v6340_v26 = vpack.c.bf16 %v5348_v14, %v5347_v9 }
 0x3a5   :  { %v3945_v48 = vmax.f32 %v3724_v1, %v3910_v20  ;;  %v3912_v54 = vpop.f32.mrb[63].mxu1  ;;  %v4021_v49 = vmax.f32 %v3943_v55, %v3990_v33  ;;  %v5321_v55 = vld [vmem:[%s9677_s8 + $0xb8] sm:$0xff]  ;;  %v6265_v59 = vpack.c.bf16 %v5325_v35, %v5324_v50  ;;  %v5328_v20 = vld [vmem:[%s9677_s8 + $0xf0] sm:$0xff]  ;;  %v5357_v50 = vld [vmem:[%s9677_s8 + $0x1a8] sm:$0xff] }
 0x3a6   :  { %6221 = vmatpush3.bf16.msra.mxu0 %v9332_v32  ;;  %6242 = vmatpush3.bf16.msra.mxu1 %v9332_v32  ;;  %6868 = vtanh.f32 %v4042_v24  ;;  %v6259_v37 = vpack.c.bf16 %v5321_v55, %v5320_v21  ;;  %v5329_v24 = vld [vmem:[%s9677_s8 + $0xf8] sm:$0xff] }
 0x3a7   :  { %v3991_v63 = vrot.slane %v3945_v48, 2  ;;  %v4043_v27 = vadd.f32 %v9280_v38, %v4021_v49  ;;  %6222 = vmatprep.subr.bf16.mxu0 %v9710_v7  ;;  %6243 = vmatprep.subr.bf16.mxu1 %v9710_v7  ;;  %v6271_v33 = vpack.c.bf16 %v5329_v24, %v5328_v20  ;;  %v4148_v48 = vld [vmem:[%s9677_s8 + $0x50] sm:$0xff]  ;;  %v4149_v22 = vld [vmem:[%s9677_s8 + $0x58] sm:$0xff]  ;;  %v4150_v49 = vld [vmem:[%s9677_s8 + $0x60] sm:$0xff] }
 0x3a8   :  { %v6865_v34 = vpop.eup %6864  ;;  %v6289_v54 = vpack.c.bf16 %v4149_v22, %v4148_v48  ;;  %v5362_v24 = vld [vmem:[%s9677_s8 + $0x1d0] sm:$0xff]  ;;  %v5364_v22 = vld [vmem:[%s9677_s8 + $0x1e0] sm:$0xff] }
 0x3a9   :  { %v3992_v19 = vsel %vm897_vm2, %v3989_v44, %v3991_v63  ;;  %6870 = vtanh.f32 %v4043_v27  ;;  %v5326_v44 = vld [vmem:[%s9677_s8 + $0xe0] sm:$0xff]  ;;  %v4151_v63 = vld [vmem:[%s9677_s8 + $0x68] sm:$0xff] }
 0x3aa   :  { %v4022_v25 = vmax.f32 %v3944_v52, %v3992_v19  ;;  %v6262_v52 = vpack.c.bf16 %v5323_v16, %v5322_v31  ;;  %v6268_v1 = vpack.c.bf16 %v5327_v5, %v5326_v44  ;;  %v6292_v27 = vpack.c.bf16 %v4151_v63, %v4150_v49  ;;  %v4152_v19 = vld [vmem:[%s9677_s8 + $0x70] sm:$0xff]  ;;  %v5355_v16 = vld [vmem:[%s9677_s8 + $0x198] sm:$0xff]  ;;  %v5360_v5 = vld [vmem:[%s9677_s8 + $0x1c0] sm:$0xff] }
 0x3ab   :  { %v6867_v41 = vpop.eup %6866  ;;  %v5366_v63 = vld [vmem:[%s9677_s8 + $0x1f0] sm:$0xff] }
 0x3ac   :  { %v4044_v3 = vadd.f32 %v9280_v38, %v4022_v25  ;;  %v9341_v61 = vpack.c.bf16 %v6867_v41, %v6865_v34  ;;  %v5315_v38 = vld [vmem:[%s9677_s8 + $0x88] sm:$0xff]  ;;  %v4153_v25 = vld [vmem:[%s9677_s8 + $0x78] sm:$0xff]  ;;  %v5333_v41 = vld [vmem:[%s9677_s8 + $0x100] sm:$0xff] }
 0x3ad   :  { %v6250_v0 = vpack.c.bf16 %v5315_v38, %v5314_v40  ;;  %v6295_v34 = vpack.c.bf16 %v4153_v25, %v4152_v19  ;;  %v5335_v38 = vld [vmem:[%s9677_s8 + $0x110] sm:$0xff] }
 0x3ae   :  { %6224 = vmatpush3.bf16.msra.mxu0 %v9341_v61  ;;  %6245 = vmatpush3.bf16.msra.mxu1 %v9341_v61  ;;  %6872 = vtanh.f32 %v4044_v3  ;;  %v5334_v3 = vld [vmem:[%s9677_s8 + $0x108] sm:$0xff] }
 0x3af   :  { %6225 = vmatprep.subr.bf16.mxu0 %v9710_v7  ;;  %6246 = vmatprep.subr.bf16.mxu1 %v9710_v7 }
 0x3b0   :  { %v6869_v57 = vpop.eup %6868 }
 0x3b3   :  { %v6871_v45 = vpop.eup %6870 }
 0x3b4   :  { %v9347_v46 = vpack.c.bf16 %v6871_v45, %v6869_v57  ;;  %v6319_v57 = vpack.c.bf16 %v5334_v3, %v5333_v41  ;;  %v4721_v41 = vld [vmem:[%s9679_s10] sm:$0xff]  ;;  %v4722_v3 = vld [vmem:[%s9679_s10 + $0x8] sm:$0xff] }
 0x3b6   :  { %6227 = vmatpush3.bf16.msra.mxu0 %v9347_v46  ;;  %6248 = vmatpush3.bf16.msra.mxu1 %v9347_v46 }
 0x3b7   :  { %5536 = vmatprep.subr.mxu0 %v9735_v43  ;;  %5569 = vmatprep.subr.mxu1 %v9735_v43 }
 0x3b8   :  { %v9371_v4 = vpop.eup %6872 }
 0x3ba   :  { %5537 = vmatpush3.msk.msra.mxu0 %vm122_vm0, %v9371_v4  ;;  %5570 = vmatpush3.msk.msra.mxu1 %vm122_vm0, %v9371_v4 }
 0x3bb   :  { %5572 = vmatmul.mubr.msk.f32.vlgmr.msra.gmra.mrb[64].mxu1 %vm4061_vm5, %v5311_v17  ;;  %5539 = vmatmul.mubr.msk.f32.vlgmr.msra.gmra.mrb[64].mxu0 %vm4061_vm5, %v4060_v12  ;;  %v6322_v12 = vpack.c.bf16 %v5336_v6, %v5335_v38 }
 0x3bc   :  { %6249 = vmatprep.subr.bf16.mxu0 %v9710_v7  ;;  %6273 = vmatprep.subr.bf16.mxu1 %v9710_v7 }
 0x3bd   :  { %6251 = vmatpush3.bf16.msra.mxu0 %v6250_v0  ;;  %6275 = vmatpush3.bf16.msra.mxu1 %v6274_v15  ;;  %v5337_v0 = vld [vmem:[%s9677_s8 + $0x120] sm:$0xff] }
 0x3be   :  { %6252 = vmatprep.subr.bf16.mxu0 %v9710_v7  ;;  %6276 = vmatprep.subr.bf16.mxu1 %v9710_v7  ;;  %v6325_v15 = vpack.c.bf16 %v5338_v51, %v5337_v0  ;;  %v5368_v0 = vld [vmem:[%s9680_s9] ss:$0 sm:$0xff] }
 0x3bf   :  { %5606 = vmatprep.mubr.msk.f32.mxu0 %vm6878_vm4, %v9735_v43  ;;  %5641 = vmatprep.mubr.msk.f32.mxu1 %vm6878_vm4, %v9735_v43 }
 0x3c1   :  { %6254 = vmatpush3.bf16.msra.mxu0 %v6253_v53  ;;  %6278 = vmatpush3.bf16.msra.mxu1 %v6277_v2  ;;  %v5345_v53 = vld [vmem:[%s9677_s8 + $0x160] sm:$0xff] }
 0x3c2   :  { %6255 = vmatprep.subr.bf16.mxu0 %v9710_v7  ;;  %6279 = vmatprep.subr.bf16.mxu1 %v9710_v7  ;;  %v6337_v2 = vpack.c.bf16 %v5346_v60, %v5345_v53 }
 0x3c5   :  { %6257 = vmatpush3.bf16.msra.mxu0 %v6256_v10  ;;  %6281 = vmatpush3.bf16.msra.mxu1 %v6280_v11 }
 0x3c6   :  { %6258 = vmatprep.subr.bf16.mxu0 %v9710_v7  ;;  %6282 = vmatprep.subr.bf16.mxu1 %v9710_v7 }
 0x3c9   :  { %6260 = vmatpush3.bf16.msra.mxu0 %v6259_v37  ;;  %6284 = vmatpush3.bf16.msra.mxu1 %v6283_v30  ;;  %v5353_v37 = vld [vmem:[%s9677_s8 + $0x188] sm:$0xff]  ;;  %v5354_v30 = vld [vmem:[%s9677_s8 + $0x190] sm:$0xff] }
 0x3ca   :  { %6261 = vmatprep.subr.bf16.mxu0 %v9710_v7  ;;  %6285 = vmatprep.subr.bf16.mxu1 %v9710_v7  ;;  %v6364_v31 = vpack.c.bf16 %v5353_v37, %v5352_v58 }
 0x3cd   :  { %6263 = vmatpush3.bf16.msra.mxu0 %v6262_v52  ;;  %6287 = vmatpush3.bf16.msra.mxu1 %v6286_v18  ;;  %v6367_v52 = vpack.c.bf16 %v5355_v16, %v5354_v30  ;;  %v5356_v18 = vld [vmem:[%s9677_s8 + $0x1a0] sm:$0xff] }
 0x3ce   :  { %6264 = vmatprep.subr.bf16.mxu0 %v9710_v7  ;;  %6288 = vmatprep.subr.bf16.mxu1 %v9710_v7  ;;  %v6370_v35 = vpack.c.bf16 %v5357_v50, %v5356_v18 }
 0x3d1   :  { %6266 = vmatpush3.bf16.msra.mxu0 %v6265_v59  ;;  %6290 = vmatpush3.bf16.msra.mxu1 %v6289_v54  ;;  %v5358_v59 = vld [vmem:[%s9677_s8 + $0x1b0] sm:$0xff]  ;;  %v5365_v54 = vld [vmem:[%s9677_s8 + $0x1e8] sm:$0xff] }
 0x3d2   :  { %6267 = vmatprep.subr.bf16.mxu0 %v9710_v7  ;;  %6291 = vmatprep.subr.bf16.mxu1 %v9710_v7  ;;  %v6382_v49 = vpack.c.bf16 %v5365_v54, %v5364_v22 }
 0x3d5   :  { %6269 = vmatpush3.bf16.msra.mxu0 %v6268_v1  ;;  %6293 = vmatpush3.bf16.msra.mxu1 %v6292_v27  ;;  %v5361_v1 = vld [vmem:[%s9677_s8 + $0x1c8] sm:$0xff]  ;;  %v5367_v27 = vld [vmem:[%s9677_s8 + $0x1f8] sm:$0xff] }
 0x3d6   :  { %6270 = vmatprep.subr.bf16.mxu0 %v9710_v7  ;;  %6294 = vmatprep.subr.bf16.mxu1 %v9710_v7  ;;  %v6376_v20 = vpack.c.bf16 %v5361_v1, %v5360_v5  ;;  %v6385_v19 = vpack.c.bf16 %v5367_v27, %v5366_v63 }
 0x3d9   :  { %6272 = vmatpush3.bf16.msra.mxu0 %v6271_v33  ;;  %6296 = vmatpush3.bf16.msra.mxu1 %v6295_v34  ;;  %v5363_v33 = vld [vmem:[%s9677_s8 + $0x1d8] sm:$0xff] }
 0x3da   :  { %6297 = vmatprep.subr.bf16.mxu0 %v9710_v7  ;;  %6318 = vmatprep.subr.bf16.mxu1 %v9710_v7  ;;  %v6379_v48 = vpack.c.bf16 %v5363_v33, %v5362_v24 }
 0x48e   :  { %v4225_v45 = vpop.f32.mrb[64].mxu1  ;;  %v4134_v40 = vpop.f32.mrb[64].mxu0 }
 0x48f   :  { %5607 = vmatmul.mubr.f32.vlgmr.msra.gmra.mrb[66].mxu0 %v4225_v45  ;;  %v5573_v36 = vpop.f32.mrb[65].mxu1  ;;  %5642 = vmatmul.mubr.f32.vlgmr.msra.gmra.mrb[66].mxu1 %v4134_v40  ;;  %v5540_v17 = vpop.f32.mrb[65].mxu0  ;;  %v6388_v45 = vpack.c.bf16 %v4722_v3, %v4721_v41  ;;  %v4724_v40 = vld [vmem:[%s9679_s10 + $0x18] sm:$0xff] }
 0x490   :  { %6299 = vmatpush3.bf16.msra.mxu0 %v9292_v56  ;;  %5674 = vmatprep.mubr.msk.f32.mxu0 %vm6878_vm4, %v9735_v43 }
 0x491   :  { %6300 = vmatprep.subr.bf16.mxu0 %v9710_v7  ;;  %6320 = vmatpush3.bf16.msra.mxu1 %v6319_v57  ;;  %v4723_v57 = vld [vmem:[%s9679_s10 + $0x10] sm:$0xff] }
 0x492   :  { %6321 = vmatprep.subr.bf16.mxu1 %v9710_v7  ;;  %5709 = vmatprep.mubr.msk.f32.mxu1 %vm6878_vm4, %v9735_v43  ;;  %v6391_v38 = vpack.c.bf16 %v4724_v40, %v4723_v57 }
 0x494   :  { %6302 = vmatpush3.bf16.msra.mxu0 %v9302_v8 }
 0x495   :  { %6303 = vmatprep.subr.bf16.mxu0 %v9710_v7  ;;  %6323 = vmatpush3.bf16.msra.mxu1 %v6322_v12 }
 0x496   :  { %6324 = vmatprep.subr.bf16.mxu1 %v9710_v7 }
 0x498   :  { %6305 = vmatpush3.bf16.msra.mxu0 %v9312_v39 }
 0x499   :  { %6306 = vmatprep.subr.bf16.mxu0 %v9710_v7  ;;  %6326 = vmatpush3.bf16.msra.mxu1 %v6325_v15 }
 0x49a   :  { %6327 = vmatprep.subr.bf16.mxu1 %v9710_v7 }
 0x49c   :  { %6308 = vmatpush3.bf16.msra.mxu0 %v9322_v29 }
 0x49d   :  { %6309 = vmatprep.subr.bf16.mxu0 %v9710_v7 }
 0x4a0   :  { %6311 = vmatpush3.bf16.msra.mxu0 %v9332_v32 }
 0x4a1   :  { %6312 = vmatprep.subr.bf16.mxu0 %v9710_v7 }
 0x4a4   :  { %6314 = vmatpush3.bf16.msra.mxu0 %v9341_v61 }
 0x4a5   :  { %6315 = vmatprep.subr.bf16.mxu0 %v9710_v7 }
 0x4a8   :  { %6317 = vmatpush3.bf16.msra.mxu0 %v9347_v46 }
 0x4a9   :  { %5672 = vmatprep.subr.mxu0 %v9735_v43 }
 0x4ac   :  { %5673 = vmatpush3.msk.msra.mxu0 %vm122_vm0, %v9371_v4 }
 0x4ad   :  { %5675 = vmatmul.mubr.msk.f32.vlgmr.msra.gmra.mrb[68].mxu0 %vm4061_vm5, %v5330_v23  ;;  %6342 = vmatprep.subr.bf16.mxu0 %v9710_v7 }
 0x4ae   :  { %6344 = vmatpush3.bf16.msra.mxu0 %v9292_v56  ;;  %5742 = vmatprep.mubr.msk.f32.mxu0 %vm6878_vm4, %v9735_v43  ;;  %v5349_v56 = vld [vmem:[%s9678_s7 + $0x18] sm:$0xff] }
 0x4af   :  { %6345 = vmatprep.subr.bf16.mxu0 %v9710_v7 }
 0x4b2   :  { %6347 = vmatpush3.bf16.msra.mxu0 %v9302_v8  ;;  %v5339_v8 = vld [vmem:[%s9677_s8 + $0x130] sm:$0xff] }
 0x4b3   :  { %6348 = vmatprep.subr.bf16.mxu0 %v9710_v7 }
 0x4b6   :  { %6350 = vmatpush3.bf16.msra.mxu0 %v9312_v39  ;;  %v5340_v39 = vld [vmem:[%s9677_s8 + $0x138] sm:$0xff] }
 0x4b7   :  { %6351 = vmatprep.subr.bf16.mxu0 %v9710_v7 }
 0x4ba   :  { %6353 = vmatpush3.bf16.msra.mxu0 %v9322_v29  ;;  %v6328_v29 = vpack.c.bf16 %v5340_v39, %v5339_v8 }
 0x4bb   :  { %6354 = vmatprep.subr.bf16.mxu0 %v9710_v7 }
 0x4bc   :  { %6329 = vmatpush3.bf16.msra.mxu1 %v6328_v29 }
 0x4bd   :  { %6330 = vmatprep.subr.bf16.mxu1 %v9710_v7 }
 0x4be   :  { %6356 = vmatpush3.bf16.msra.mxu0 %v9332_v32  ;;  %v5341_v32 = vld [vmem:[%s9677_s8 + $0x140] sm:$0xff] }
 0x4bf   :  { %6357 = vmatprep.subr.bf16.mxu0 %v9710_v7 }
 0x4c2   :  { %6359 = vmatpush3.bf16.msra.mxu0 %v9341_v61  ;;  %v5342_v61 = vld [vmem:[%s9677_s8 + $0x148] sm:$0xff] }
 0x4c3   :  { %6360 = vmatprep.subr.bf16.mxu0 %v9710_v7 }
 0x4c6   :  { %6362 = vmatpush3.bf16.msra.mxu0 %v9347_v46  ;;  %v6331_v46 = vpack.c.bf16 %v5342_v61, %v5341_v32 }
 0x4c7   :  { %5740 = vmatprep.subr.mxu0 %v9735_v43 }
 0x4c8   :  { %6332 = vmatpush3.bf16.msra.mxu1 %v6331_v46 }
 0x4c9   :  { %6333 = vmatprep.subr.bf16.mxu1 %v9710_v7 }
 0x4ca   :  { %5741 = vmatpush3.msk.msra.mxu0 %vm122_vm0, %v9371_v4  ;;  %v5343_v4 = vld [vmem:[%s9677_s8 + $0x150] sm:$0xff] }
 0x4cb   :  { %5743 = vmatmul.mubr.msk.f32.vlgmr.msra.gmra.mrb[70].mxu0 %vm4061_vm5, %v5349_v56  ;;  %6387 = vmatprep.subr.bf16.mxu0 %v9710_v7  ;;  %v6334_v62 = vpack.c.bf16 %v5344_v13, %v5343_v4 }
 0x4cc   :  { %5788 = vmatprep.mubr.msk.f32.mxu0 %vm6878_vm4, %v9735_v43  ;;  %6389 = vmatpush3.bf16.msra.mxu0 %v6388_v45 }
 0x4cd   :  { %6335 = vmatpush3.bf16.msra.mxu1 %v6334_v62  ;;  %6390 = vmatprep.subr.bf16.mxu0 %v9710_v7 }
 0x4ce   :  { %6336 = vmatprep.subr.bf16.mxu1 %v9710_v7 }
 0x4d0   :  { %6392 = vmatpush3.bf16.msra.mxu0 %v6391_v38 }
 0x4d1   :  { %6338 = vmatpush3.bf16.msra.mxu1 %v6337_v2 }
 0x4d2   :  { %6339 = vmatprep.subr.bf16.mxu1 %v9710_v7 }
 0x4d5   :  { %6341 = vmatpush3.bf16.msra.mxu1 %v6340_v26 }
 0x4d6   :  { %6363 = vmatprep.subr.bf16.mxu1 %v9710_v7 }
 0x562   :  { %v4312_v10 = vpop.f32.mrb[66].mxu0  ;;  %v4382_v21 = vpop.f32.mrb[66].mxu1 }
 0x563   :  { %v5608_v11 = vpop.f32.mrb[67].mxu0  ;;  %v4383_v55 = vadd.f32 %v4382_v21, %v4312_v10  ;;  %v5643_v28 = vpop.f32.mrb[67].mxu1 }
 0x580   :  { %v4457_v47 = vpop.f32.mrb[68].mxu0 }
 0x581   :  { %5710 = vmatmul.mubr.f32.vlgmr.msra.gmra.mrb[68].mxu1 %v4457_v47  ;;  %v5676_v42 = vpop.f32.mrb[69].mxu0 }
 0x582   :  { %6365 = vmatpush3.bf16.msra.mxu1 %v6364_v31  ;;  %5777 = vmatprep.mubr.msk.f32.mxu1 %vm6878_vm4, %v9735_v43  ;;  %v5359_v43 = vld [vmem:[%s9677_s8 + $0x1b8] sm:$0xff] }
 0x583   :  { %6366 = vmatprep.subr.bf16.mxu1 %v9710_v7  ;;  %v6373_v44 = vpack.c.bf16 %v5359_v43, %v5358_v59 }
 0x586   :  { %6368 = vmatpush3.bf16.msra.mxu1 %v6367_v52 }
 0x587   :  { %6369 = vmatprep.subr.bf16.mxu1 %v9710_v7 }
 0x58a   :  { %6371 = vmatpush3.bf16.msra.mxu1 %v6370_v35 }
 0x58b   :  { %6372 = vmatprep.subr.bf16.mxu1 %v9710_v7 }
 0x58e   :  { %6374 = vmatpush3.bf16.msra.mxu1 %v6373_v44 }
 0x58f   :  { %6375 = vmatprep.subr.bf16.mxu1 %v9710_v7 }
 0x592   :  { %6377 = vmatpush3.bf16.msra.mxu1 %v6376_v20 }
 0x593   :  { %6378 = vmatprep.subr.bf16.mxu1 %v9710_v7 }
 0x596   :  { %6380 = vmatpush3.bf16.msra.mxu1 %v6379_v48 }
 0x597   :  { %6381 = vmatprep.subr.bf16.mxu1 %v9710_v7 }
 0x59a   :  { %6383 = vmatpush3.bf16.msra.mxu1 %v6382_v49 }
 0x59b   :  { %6384 = vmatprep.subr.bf16.mxu1 %v9710_v7  ;;  %v5369_v7 = vld [vmem:[%s9681_s11] ss:$0 sm:$0xff] }
 0x59e   :  { %6386 = vmatpush3.bf16.msra.mxu1 %v6385_v19  ;;  %v4620_v25 = vpop.f32.mrb[70].mxu0 }
 0x59f   :  { %v5744_v34 = vpop.f32.mrb[71].mxu0 }
 0x5a1   :  { %5778 = vmatmul.mubr.f32.vlgmr.msra.gmra.mrb[70].mxu1 %v4620_v25 }
 0x654   :  { %v4544_v6 = vpop.f32.mrb[68].mxu1 }
 0x655   :  { %v4548_v36 = vadd.f32 %v4544_v6, %v4383_v55  ;;  %v5711_v17 = vpop.f32.mrb[69].mxu1 }
 0x674   :  { %v4707_v12 = vpop.f32.mrb[70].mxu1 }
 0x675   :  { %v4711_v51 = vadd.f32 %v4707_v12, %v4548_v36  ;;  %v5779_v15 = vpop.f32.mrb[71].mxu1 }
 0x677   :  { %v4719_v23 = vadd.f32 %v5368_v0, %v4711_v51 }
 0x679   :  { %6874 = vtanh.f32 %v4719_v23 }
 0x683   :  { %v6875_v56 = vpop.eup %6874 }
 0x684   :  { %5789 = vmatmul.mubr.msk.f32.vlgmr.msra.gmra.mrb[72].mxu0 %vm4732_vm6, %v6875_v56 }
 0x757   :  { %v4802_v8 = vpop.f32.mrb[72].mxu0 }
 0x758   :  { %v4803_v39 = vadd.f32 %v5369_v7, %v4802_v8  ;;  %v5790_v29 = vpop.f32.mrb[73].mxu0 }
 0x75a   :  { %4807 = vst.msk [vmem:[%s9682_s12] sm:$0xff] %vm4806_vm7, %v4803_v39 }

</bundles_post_ra>
